<compile_context>
chip_gen: v7x
topology: tpu7x:2x2x1
jax: 0.10.0
libtpu: 0.0.40
codegen_flags: <defaults>
</compile_context>

<pallas_src>
import jax
import jax.numpy as jnp
from jax.experimental import pallas as pl
from jax.experimental.pallas import tpu as pltpu


def _gated_attn_kernel(x_ref, wab_ref, bab_ref, wc_ref, bc_ref, out_ref):
    d = wc_ref.shape[0]
    # Fused branch matmul: one MXU pass of x through [L, 2D] (bf16 x bf16 -> f32 acc).
    h = jnp.dot(x_ref[...], wab_ref[...], preferred_element_type=jnp.float32)
    h = h + bab_ref[...]
    a = jnp.tanh(h[:, :d])                 # attention_a: Tanh    (EUP)
    b = jax.nn.sigmoid(h[:, d:])           # attention_b: Sigmoid (EUP)
    ab = (a * b).astype(wc_ref.dtype)      # gate (VPU), back to bf16 for the MXU
    out = jnp.dot(ab, wc_ref[...], preferred_element_type=jnp.float32)
    out_ref[...] = (out + bc_ref[...]).astype(out_ref.dtype)


def _round_up(v, m):
    return (v + m - 1) // m * m


def _vmem_capacity_bytes():
    try:
        info = pltpu.get_tpu_info()
        cap = getattr(info, "vmem_capacity_bytes", None)
        if cap:
            return int(cap)
    except Exception:
        pass
    return 64 * 1024 * 1024  # conservative default (v7x-sized)


def _pick_block_n(N, L, D, C_pad, in_itemsize):
    """VMEM-budgeted tile size over the instance axis (and the vmem limit to set)."""
    vmem_limit = min(int(_vmem_capacity_bytes() * 3 // 4), 96 * 1024 * 1024)
    # Resident constants (double-buffered by default): fused weight, Wc, biases.
    fixed = 2 * (L * 2 * D + D * C_pad) * in_itemsize + 2 * (2 * D + C_pad) * 4
    # Per-row cost: double-buffered x tile + double-buffered f32 out tile
    # + f32 intermediates (h, a, b, ab ~ 4 arrays of width <= 2D).
    per_row = 2 * L * in_itemsize + 2 * C_pad * 4 + 4 * (2 * D) * 4
    budget = max(vmem_limit - fixed, per_row * 128)
    bn = min(2048, max(128, (budget // per_row) // 128 * 128))
    if N <= bn:
        bn = N  # single tile covering the whole (small) instance axis
    return int(bn), int(vmem_limit)


def attn_net_gated_forward(x, params, *, block_n=None, compute_dtype=jnp.bfloat16):
    """Pallas forward pass. Returns (A, x) just like the PyTorch module."""
    wa, ba = params["wa"], params["ba"]
    wb, bb = params["wb"], params["bb"]
    wc, bc = params["wc"], params["bc"]

    N, L = x.shape
    D = wa.shape[1]
    C = wc.shape[1]
    C_pad = _round_up(C, 128)

    # Fuse the two branch weights into one [L, 2D] matmul; biases stay f32.
    wab = jnp.concatenate([wa, wb], axis=1).astype(compute_dtype)
    bab = jnp.concatenate([ba, bb], axis=1).astype(jnp.float32)
    # Zero-pad the classifier to a lane-dense 128-wide output.
    wc_p = jnp.pad(wc, ((0, 0), (0, C_pad - C))).astype(compute_dtype)
    bc_p = jnp.pad(bc, ((0, 0), (0, C_pad - C))).astype(jnp.float32)
    x_c = x.astype(compute_dtype)

    itemsize = jnp.dtype(compute_dtype).itemsize
    auto_bn, vmem_limit = _pick_block_n(N, L, D, C_pad, itemsize)
    if block_n is None:
        block_n = auto_bn

    grid = (pl.cdiv(N, block_n),)

    a_full = pl.pallas_call(
        _gated_attn_kernel,
        out_shape=jax.ShapeDtypeStruct((N, C_pad), jnp.float32),
        grid_spec=pltpu.PrefetchScalarGridSpec(
            num_scalar_prefetch=0,
            grid=grid,
            in_specs=[
                pl.BlockSpec((block_n, L), lambda i: (i, 0)),    # x tile (streams over N)
                pl.BlockSpec((L, 2 * D), lambda i: (0, 0)),      # fused Wa || Wb
                pl.BlockSpec((1, 2 * D), lambda i: (0, 0)),      # fused ba || bb
                pl.BlockSpec((D, C_pad), lambda i: (0, 0)),      # Wc (zero-padded)
                pl.BlockSpec((1, C_pad), lambda i: (0, 0)),      # bc (zero-padded)
            ],
            out_specs=pl.BlockSpec((block_n, C_pad), lambda i: (i, 0)),
        ),
        compiler_params=pltpu.CompilerParams(
            dimension_semantics=("parallel",),
            vmem_limit_bytes=vmem_limit,
        ),
    )(x_c, wab, bab, wc_p, bc_p)

    A = a_full[:, :C]
    return A, x


def init_params(key, L, D, n_classes):
    """nn.Linear-style U(-1/sqrt(fan_in), 1/sqrt(fan_in)) init; weights stored transposed."""
    k = jax.random.split(key, 6)
    bound_L = 1.0 / jnp.sqrt(L)
    bound_D = 1.0 / jnp.sqrt(D)
    wa = jax.random.uniform(k[0], (L, D), jnp.float32, -bound_L, bound_L)
    ba = jax.random.uniform(k[1], (1, D), jnp.float32, -bound_L, bound_L)
    wb = jax.random.uniform(k[2], (L, D), jnp.float32, -bound_L, bound_L)
    bb = jax.random.uniform(k[3], (1, D), jnp.float32, -bound_L, bound_L)
    wc = jax.random.uniform(k[4], (D, n_classes), jnp.float32, -bound_D, bound_D)
    bc = jax.random.uniform(k[5], (1, n_classes), jnp.float32, -bound_D, bound_D)
    return {"wa": wa, "ba": ba, "wb": wb, "bb": bb, "wc": wc, "bc": bc}


def _reference(x, p, compute_dtype=jnp.bfloat16):
    """Pure-JAX reference with matching bf16 input/weight quantization."""
    f32 = jnp.float32
    hi = jax.lax.Precision.HIGHEST
    xc = x.astype(compute_dtype).astype(f32)
    wa = p["wa"].astype(compute_dtype).astype(f32)
    wb = p["wb"].astype(compute_dtype).astype(f32)
    wc = p["wc"].astype(compute_dtype).astype(f32)
    a = jnp.tanh(jnp.dot(xc, wa, precision=hi) + p["ba"])
    b = jax.nn.sigmoid(jnp.dot(xc, wb, precision=hi) + p["bb"])
    ab = (a * b).astype(compute_dtype).astype(f32)
    return jnp.dot(ab, wc, precision=hi) + p["bc"]


if __name__ == "__main__":
    # Module defaults L=1024, D=256, n_classes=1 with a small bag of N=256 instances.
    N, L, D, n_classes = 256, 1024, 256, 1

    key = jax.random.PRNGKey(0)
    kx, kp = jax.random.split(key)
    x = jax.random.normal(kx, (N, L), jnp.float32)
    params = init_params(kp, L, D, n_classes)

    # TODO(synk): dropout=True path (nn.Dropout(0.25)) not implemented; module default is False.

    # Default (auto-budgeted) tiling: single tile since N is small.
    A, x_out = attn_net_gated_forward(x, params)
    A = jax.block_until_ready(A)
    x_out = jax.block_until_ready(x_out)

    # Explicit small tile -> 4-step grid, exercising the pipelined / multi-core path.
    A_tiled, _ = attn_net_gated_forward(x, params, block_n=64)
    A_tiled = jax.block_until_ready(A_tiled)

    # Correctness check against the quantization-matched pure-JAX reference.
    A_ref = _reference(x, params)
    assert A.shape == (N, n_classes)
    assert x_out.shape == (N, L)
    assert jnp.allclose(A, A_ref, atol=1e-2, rtol=1e-2), float(jnp.max(jnp.abs(A - A_ref)))
    assert jnp.allclose(A_tiled, A_ref, atol=1e-2, rtol=1e-2), float(jnp.max(jnp.abs(A_tiled - A_ref)))
    assert jnp.allclose(x_out, x)

    print("KERNEL_OK")
</pallas_src>

<mosaic_0001>
module attributes {stable_mosaic.version = 11 : i64} {
  func.func @_gated_attn_kernel(%arg0: i32, %arg1: memref<256x1024xbf16, #tpu.memory_space<vmem>>, %arg2: memref<1024x512xbf16, #tpu.memory_space<vmem>>, %arg3: memref<1x512xf32, #tpu.memory_space<vmem>>, %arg4: memref<256x128xbf16, #tpu.memory_space<vmem>>, %arg5: memref<1x128xf32, #tpu.memory_space<vmem>>, %arg6: memref<256x128xf32, #tpu.memory_space<vmem>>) attributes {dimension_semantics = [#tpu.dimension_semantics<parallel>], iteration_bounds = array<i64: 1>, scalar_prefetch = 0 : i64, scratch_operands = 0 : i64, tpu.core_type = #tpu.core_type<tc>, window_params = [{transform_indices = @transform_0, window_bounds = array<i64: 256, 1024>}, {pipeline_mode = #tpu.pipeline_mode<synchronous>, transform_indices = @transform_1, window_bounds = array<i64: 1024, 512>}, {pipeline_mode = #tpu.pipeline_mode<synchronous>, transform_indices = @transform_2, window_bounds = array<i64: 1, 512>}, {pipeline_mode = #tpu.pipeline_mode<synchronous>, transform_indices = @transform_3, window_bounds = array<i64: 256, 128>}, {pipeline_mode = #tpu.pipeline_mode<synchronous>, transform_indices = @transform_4, window_bounds = array<i64: 1, 128>}, {transform_indices = @transform_5, window_bounds = array<i64: 256, 128>}]} {
    %c0 = arith.constant 0 : index
    %c0_0 = arith.constant 0 : index
    %0 = vector.load %arg1[%c0, %c0_0] : memref<256x1024xbf16, #tpu.memory_space<vmem>>, vector<256x1024xbf16>
    %c0_1 = arith.constant 0 : index
    %c0_2 = arith.constant 0 : index
    %1 = vector.load %arg2[%c0_1, %c0_2] : memref<1024x512xbf16, #tpu.memory_space<vmem>>, vector<1024x512xbf16>
    %cst = arith.constant dense<0.000000e+00> : vector<256x512xf32>
    %2 = tpu.matmul %0, %1, %cst {dimension_numbers = #tpu.dot_dimension_numbers<[1], [0], [0], [1], [0, 0, 1, 1], [], []>} : vector<256x1024xbf16>, vector<1024x512xbf16>, vector<256x512xf32> -> vector<256x512xf32>
    %c0_3 = arith.constant 0 : index
    %c0_4 = arith.constant 0 : index
    %3 = vector.load %arg3[%c0_3, %c0_4] : memref<1x512xf32, #tpu.memory_space<vmem>>, vector<1x512xf32>
    %4 = vector.broadcast %3 : vector<1x512xf32> to vector<256x512xf32>
    %5 = arith.addf %2, %4 : vector<256x512xf32>
    %6 = vector.extract_strided_slice %5 {offsets = [0, 0], sizes = [256, 256], strides = [1, 1]} : vector<256x512xf32> to vector<256x256xf32>
    %7 = math.tanh %6 : vector<256x256xf32>
    %8 = vector.extract_strided_slice %5 {offsets = [0, 256], sizes = [256, 256], strides = [1, 1]} : vector<256x512xf32> to vector<256x256xf32>
    %9 = arith.negf %8 : vector<256x256xf32>
    %10 = math.exp %9 : vector<256x256xf32>
    %cst_5 = arith.constant 1.000000e+00 : f32
    %11 = vector.broadcast %cst_5 : f32 to vector<256x256xf32>
    %12 = arith.addf %11, %10 : vector<256x256xf32>
    %13 = arith.divf %11, %12 : vector<256x256xf32>
    %14 = arith.mulf %7, %13 : vector<256x256xf32>
    %15 = arith.truncf %14 : vector<256x256xf32> to vector<256x256xbf16>
    %c0_6 = arith.constant 0 : index
    %c0_7 = arith.constant 0 : index
    %16 = vector.load %arg4[%c0_6, %c0_7] : memref<256x128xbf16, #tpu.memory_space<vmem>>, vector<256x128xbf16>
    %cst_8 = arith.constant dense<0.000000e+00> : vector<256x128xf32>
    %17 = tpu.matmul %15, %16, %cst_8 {dimension_numbers = #tpu.dot_dimension_numbers<[1], [0], [0], [1], [0, 0, 1, 1], [], []>} : vector<256x256xbf16>, vector<256x128xbf16>, vector<256x128xf32> -> vector<256x128xf32>
    %c0_9 = arith.constant 0 : index
    %c0_10 = arith.constant 0 : index
    %18 = vector.load %arg5[%c0_9, %c0_10] : memref<1x128xf32, #tpu.memory_space<vmem>>, vector<1x128xf32>
    %19 = vector.broadcast %18 : vector<1x128xf32> to vector<256x128xf32>
    %20 = arith.addf %17, %19 : vector<256x128xf32>
    %c0_11 = arith.constant 0 : index
    %c0_12 = arith.constant 0 : index
    %21 = vector.load %arg6[%c0_11, %c0_12] : memref<256x128xf32, #tpu.memory_space<vmem>>, vector<256x128xf32>
    tpu.vector_store %arg6[%c0_11, %c0_12], %20 {strides = array<i32>} : memref<256x128xf32, #tpu.memory_space<vmem>>, vector<256x128xf32>,
    return
  }
  func.func @transform_0(%arg0: i32) -> (i32, i32) {
    %c0_i32 = arith.constant 0 : i32
    %c0_i32_0 = arith.constant 0 : i32
    return %arg0, %c0_i32 : i32, i32
  }
  func.func @transform_1(%arg0: i32) -> (i32, i32) {
    %c0_i32 = arith.constant 0 : i32
    %c0_i32_0 = arith.constant 0 : i32
    %c0_i32_1 = arith.constant 0 : i32
    return %c0_i32, %c0_i32_0 : i32, i32
  }
  func.func @transform_2(%arg0: i32) -> (i32, i32) {
    %c0_i32 = arith.constant 0 : i32
    %c0_i32_0 = arith.constant 0 : i32
    %c0_i32_1 = arith.constant 0 : i32
    return %c0_i32, %c0_i32_0 : i32, i32
  }
  func.func @transform_3(%arg0: i32) -> (i32, i32) {
    %c0_i32 = arith.constant 0 : i32
    %c0_i32_0 = arith.constant 0 : i32
    %c0_i32_1 = arith.constant 0 : i32
    return %c0_i32, %c0_i32_0 : i32, i32
  }
  func.func @transform_4(%arg0: i32) -> (i32, i32) {
    %c0_i32 = arith.constant 0 : i32
    %c0_i32_0 = arith.constant 0 : i32
    %c0_i32_1 = arith.constant 0 : i32
    return %c0_i32, %c0_i32_0 : i32, i32
  }
  func.func @transform_5(%arg0: i32) -> (i32, i32) {
    %c0_i32 = arith.constant 0 : i32
    %c0_i32_0 = arith.constant 0 : i32
    return %arg0, %c0_i32 : i32, i32
  }
}

</mosaic_0001>

<bundles_post_ra>
// kernel: tpu_custom_call.1
= control target key start
LH: loop header
LB: loop body
LE: loop exit
PB: predicated region body
PF: predicated region fallthrough
CT: control target
= control target key end

     0   :  { %10 = vsyncpa [#allocation3], 0  ;;  %s8105_s0 = inlined_call_operand.hbm [shape: bf16[256,1024], index: 0, kind: input, shape index: {}]   ;;  %s8106_s1 = inlined_call_operand.hbm [shape: bf16[1024,512], index: 1, kind: input, shape index: {}]   ;;  %s8107_s2 = inlined_call_operand.vmem [shape: f32[1,512], index: 2, kind: input, shape index: {}]   ;;  %s8108_s3 = inlined_call_operand.hbm [shape: bf16[256,128], index: 3, kind: input, shape index: {}]   ;;  %s8109_s4 = inlined_call_operand.vmem [shape: f32[1,128], index: 4, kind: input, shape index: {}]   ;;  %s8110_s5 = inlined_call_operand.hbm [shape: f32[256,128], index: 5, kind: output, shape index: {}]  }
   0x1   :  { %11 = vsyncpa [#allocation6], 0 }
   0x2   :  { %12 = vsyncpa [#allocation4], 0  ;;  %s6834_s18 = smov [#allocation5]   ;;  %s6740_s22 = scalar_lea.hbm %s8106_s1, 32768 }
   0x3   :  { %s30_s19 = sshll.u32 %s6834_s18, 4  ;;  %p6741_p0 = scmp.ne.s32.totalorder %s8106_s1, %s6740_s22  ;;  %s31_s19 = int_to_ptr.vmem [resolvable:$true] %s30_s19 }
   0x4   :  { %p6744_p1 = scmp.lt.u32.totalorder %s6740_s22, %s8106_s1 }
   0x6   :  { %p6746_p2 = pnand %p6744_p1, %p6741_p0 }
   0x8   :  { %6749 = shalt.err (!%p6746_p2)
}
   0x9   :  { %s6750_s27 = scalar_lea.vmem %s31_s19, 32768  ;;  %p6755_p4 = scmp.lt.s32.totalorder %s31_s19, %s31_s19 }
   0xa   :  { %p6751_p3 = scmp.ne.s32.totalorder %s31_s19, %s6750_s27  ;;  %p6756_p5 = scmp.lt.s32.totalorder %s6750_s27, %s6750_s27 }
   0xc   :  { %p6757_p6 = por %p6756_p5, %p6755_p4 }
   0xe   :  { %p6758_p7 = pnand %p6757_p6, %p6751_p3 }
  0x10   :  { %6761 = shalt.err (!%p6758_p7)
}
  0x11   :  { %s6835_s28 = smov 256   ;;  %s6836_s29 = smov 16  }
  0x12   :  { %36 = dma.hbm_to_vmem [thread:$0]  %s8106_s1, 32768, %s31_s19, [#allocation6], %s6835_s28, %s6835_s28, %s6836_s29  }
  0x13   :  { %s6837_s7 = smov [#allocation2]   ;;  %s6762_s11 = scalar_lea.hbm %s8105_s0, 16384 }
  0x14   :  { %s18_s8 = sshll.u32 %s6837_s7, 4  ;;  %p6763_p8 = scmp.ne.s32.totalorder %s8105_s0, %s6762_s11  ;;  %s19_s8 = int_to_ptr.vmem [resolvable:$true] %s18_s8 }
  0x15   :  { %p6766_p9 = scmp.lt.u32.totalorder %s6762_s11, %s8105_s0 }
  0x17   :  { %p6768_p10 = pnand %p6766_p9, %p6763_p8 }
  0x19   :  { %6771 = shalt.err (!%p6768_p10)
}
  0x1a   :  { %s6772_s16 = scalar_lea.vmem %s19_s8, 16384  ;;  %p6777_p12 = scmp.lt.s32.totalorder %s19_s8, %s19_s8 }
  0x1b   :  { %p6773_p11 = scmp.ne.s32.totalorder %s19_s8, %s6772_s16  ;;  %p6778_p13 = scmp.lt.s32.totalorder %s6772_s16, %s6772_s16 }
  0x1d   :  { %p6779_p0 = por %p6778_p13, %p6777_p12 }
  0x1f   :  { %p6780_p1 = pnand %p6779_p0, %p6773_p11 }
  0x21   :  { %6783 = shalt.err (!%p6780_p1)
}
  0x22   :  { %s6838_s1 = smov 512   ;;  %s6839_s17 = smov 32  }
  0x23   :  { %24 = dma.hbm_to_vmem [thread:$0]  %s8105_s0, 16384, %s19_s8, [#allocation3], %s6838_s1, %s6838_s1, %s6839_s17  }
  0x24   :  { %s6840_s20 = smov [#allocation7]   ;;  %s6784_s24 = scalar_lea.hbm %s8108_s3, 2048 }
  0x25   :  { %s44_s21 = sshll.u32 %s6840_s20, 4  ;;  %p6785_p2 = scmp.ne.s32.totalorder %s8108_s3, %s6784_s24  ;;  %s45_s21 = int_to_ptr.vmem [resolvable:$true] %s44_s21 }
  0x26   :  { %p6788_p3 = scmp.lt.u32.totalorder %s6784_s24, %s8108_s3 }
  0x28   :  { %p6790_p4 = pnand %p6788_p3, %p6785_p2 }
  0x2a   :  { %6793 = shalt.err (!%p6790_p4)
}
  0x2b   :  { %s6794_s29 = scalar_lea.vmem %s45_s21, 2048  ;;  %p6799_p6 = scmp.lt.s32.totalorder %s45_s21, %s45_s21 }
  0x2c   :  { %p6795_p5 = scmp.ne.s32.totalorder %s45_s21, %s6794_s29  ;;  %p6800_p7 = scmp.lt.s32.totalorder %s6794_s29, %s6794_s29 }
  0x2e   :  { %p6801_p8 = por %p6800_p7, %p6799_p6 }
  0x30   :  { %p6802_p9 = pnand %p6801_p8, %p6795_p5 }
  0x32   :  { %6805 = shalt.err (!%p6802_p9)
}
  0x33   :  { %s6841_s0 = smov 64   ;;  %s6842_s30 = smov 4  }
  0x34   :  { %50 = dma.hbm_to_vmem [thread:$0]  %s8108_s3, 2048, %s45_s21, [#allocation6], %s6841_s0, %s6841_s0, %s6842_s30  }
  0x35   :  { %6828 = dma.done.wait [#allocation3], 16384  }
  0x36   :  { %6829 = vsyncadd [#allocation3], 4294950912 }
  0x37   :  { %6830 = dma.done.wait [#allocation6], 34816  }
  0x38   :  { %6831 = vsyncadd [#allocation6], 4294932480  ;;  %v5956_v0 = vld [vmem:[#allocation5 + $0x4] ss:$16 sps:$4 sm:$0xff]   ;;  %v5958_v1 = vld [vmem:[#allocation5] ss:$16 sps:$4 sm:$0xff]  }
  0x39   :  { %2389 = vmatprep.subr.bf16.mxu0 %v5956_v0  ;;  %5400 = vmatprep.subr.bf16.mxu1 %v5956_v0  ;;  %v5959_v2 = vld [vmem:[#allocation5 + $0x24] ss:$16 sps:$4 sm:$0xff]   ;;  %v5961_v3 = vld [vmem:[#allocation5 + $0x20] ss:$16 sps:$4 sm:$0xff]   ;;  %v6009_v39 = vld [vmem:[#allocation5 + $0xc] ss:$16 sps:$4 sm:$0xff]  }
  0x3a   :  { %2390 = vmatpush1.bf16.msra.mxu0 %v5958_v1  ;;  %5416 = vmatpush1.bf16.msra.mxu1 %v5958_v1  ;;  %v5962_v4 = vld [vmem:[#allocation5 + $0x44] ss:$16 sps:$4 sm:$0xff]   ;;  %v5964_v5 = vld [vmem:[#allocation5 + $0x40] ss:$16 sps:$4 sm:$0xff]   ;;  %v6007_v47 = vld [vmem:[#allocation5 + $0x8] ss:$16 sps:$4 sm:$0xff]  }
  0x3b   :  { %2391 = vmatprep.subr.bf16.mxu0 %v5959_v2  ;;  %5401 = vmatprep.subr.bf16.mxu1 %v5959_v2  ;;  %v5965_v6 = vld [vmem:[#allocation5 + $0x64] ss:$16 sps:$4 sm:$0xff]   ;;  %v5967_v7 = vld [vmem:[#allocation5 + $0x60] ss:$16 sps:$4 sm:$0xff]   ;;  %v6015_v49 = vld [vmem:[#allocation5 + $0x2c] ss:$16 sps:$4 sm:$0xff]  }
  0x3c   :  { %v5968_v8 = vld [vmem:[#allocation5 + $0x84] ss:$16 sps:$4 sm:$0xff]   ;;  %v5970_v9 = vld [vmem:[#allocation5 + $0x80] ss:$16 sps:$4 sm:$0xff]   ;;  %v6013_v53 = vld [vmem:[#allocation5 + $0x28] ss:$16 sps:$4 sm:$0xff]  }
  0x3d   :  { %v5971_v10 = vld [vmem:[#allocation5 + $0xa4] ss:$16 sps:$4 sm:$0xff]   ;;  %v5973_v11 = vld [vmem:[#allocation5 + $0xa0] ss:$16 sps:$4 sm:$0xff]   ;;  %v6021_v55 = vld [vmem:[#allocation5 + $0x4c] ss:$16 sps:$4 sm:$0xff]  }
  0x3e   :  { %2392 = vmatpush1.bf16.msra.mxu0 %v5961_v3  ;;  %5417 = vmatpush1.bf16.msra.mxu1 %v5961_v3  ;;  %v5974_v12 = vld [vmem:[#allocation5 + $0xc4] ss:$16 sps:$4 sm:$0xff]   ;;  %v5976_v18 = vld [vmem:[#allocation5 + $0xc0] ss:$16 sps:$4 sm:$0xff]   ;;  %v6019_v63 = vld [vmem:[#allocation5 + $0x48] ss:$16 sps:$4 sm:$0xff]  }
  0x3f   :  { %2393 = vmatprep.subr.bf16.mxu0 %v5962_v4  ;;  %5402 = vmatprep.subr.bf16.mxu1 %v5962_v4  ;;  %v6912_v13 = vld [vmem:[#allocation2] sm:$0xff]  ;;  %v6027_v1 = vld [vmem:[#allocation5 + $0x6c] ss:$16 sps:$4 sm:$0xff]  }
  0x40   :  { %v6914_v14 = vld [vmem:[#allocation2 + $0x20] sm:$0xff] }
  0x41   :  { %v6918_v15 = vcombine.high %v6912_v13, %v6914_v14  ;;  %v6920_v16 = vld [vmem:[#allocation2 + $0x200] sm:$0xff]  ;;  %v6932_v43 = vcombine.low %v6912_v13, %v6914_v14 }
  0x42   :  { %2394 = vmatpush1.bf16.msra.mxu0 %v5964_v5  ;;  %5418 = vmatpush1.bf16.msra.mxu1 %v5964_v5  ;;  %v6922_v17 = vld [vmem:[#allocation2 + $0x220] sm:$0xff]  ;;  %v6025_v5 = vld [vmem:[#allocation5 + $0x68] ss:$16 sps:$4 sm:$0xff]  }
  0x43   :  { %2395 = vmatprep.subr.bf16.mxu0 %v5965_v6  ;;  %5403 = vmatprep.subr.bf16.mxu1 %v5965_v6  ;;  %v6926_v19 = vcombine.high %v6920_v16, %v6922_v17  ;;  %v5977_v20 = vld [vmem:[#allocation5 + $0xe4] ss:$16 sps:$4 sm:$0xff]   ;;  %v5979_v21 = vld [vmem:[#allocation5 + $0xe0] ss:$16 sps:$4 sm:$0xff]   ;;  %v6936_v44 = vcombine.low %v6920_v16, %v6922_v17  ;;  %v6031_v16 = vld [vmem:[#allocation5 + $0x88] ss:$16 sps:$4 sm:$0xff]  }
  0x44   :  { %2421 = vmatprep.mubr.bf16.mxu0 %v6918_v15  ;;  %v5980_v22 = vld [vmem:[#allocation5 + $0x104] ss:$16 sps:$4 sm:$0xff]   ;;  %v5982_v23 = vld [vmem:[#allocation5 + $0x100] ss:$16 sps:$4 sm:$0xff]  }
  0x45   :  { %2501 = vmatprep.mubr.bf16.mxu1 %v6926_v19  ;;  %v5983_v24 = vld [vmem:[#allocation5 + $0x124] ss:$16 sps:$4 sm:$0xff]   ;;  %v5985_v25 = vld [vmem:[#allocation5 + $0x120] ss:$16 sps:$4 sm:$0xff]  }
  0x46   :  { %2396 = vmatpush1.bf16.msra.mxu0 %v5967_v7  ;;  %5419 = vmatpush1.bf16.msra.mxu1 %v5967_v7  ;;  %v5986_v26 = vld [vmem:[#allocation5 + $0x144] ss:$16 sps:$4 sm:$0xff]   ;;  %v5988_v27 = vld [vmem:[#allocation5 + $0x140] ss:$16 sps:$4 sm:$0xff]   ;;  %v6033_v7 = vld [vmem:[#allocation5 + $0x8c] ss:$16 sps:$4 sm:$0xff]  }
  0x47   :  { %2397 = vmatprep.subr.bf16.mxu0 %v5968_v8  ;;  %5404 = vmatprep.subr.bf16.mxu1 %v5968_v8  ;;  %v5989_v28 = vld [vmem:[#allocation5 + $0x164] ss:$16 sps:$4 sm:$0xff]   ;;  %v5991_v29 = vld [vmem:[#allocation5 + $0x160] ss:$16 sps:$4 sm:$0xff]  }
  0x48   :  { %v5992_v30 = vld [vmem:[#allocation5 + $0x184] ss:$16 sps:$4 sm:$0xff]   ;;  %v5994_v31 = vld [vmem:[#allocation5 + $0x180] ss:$16 sps:$4 sm:$0xff]  }
  0x49   :  { %v5995_v32 = vld [vmem:[#allocation5 + $0x1a4] ss:$16 sps:$4 sm:$0xff]   ;;  %v5997_v33 = vld [vmem:[#allocation5 + $0x1a0] ss:$16 sps:$4 sm:$0xff]  }
  0x4a   :  { %2398 = vmatpush1.bf16.msra.mxu0 %v5970_v9  ;;  %5420 = vmatpush1.bf16.msra.mxu1 %v5970_v9  ;;  %v5998_v34 = vld [vmem:[#allocation5 + $0x1c4] ss:$16 sps:$4 sm:$0xff]   ;;  %v6000_v35 = vld [vmem:[#allocation5 + $0x1c0] ss:$16 sps:$4 sm:$0xff]  }
  0x4b   :  { %2399 = vmatprep.subr.bf16.mxu0 %v5971_v10  ;;  %5405 = vmatprep.subr.bf16.mxu1 %v5971_v10  ;;  %v6001_v36 = vld [vmem:[#allocation5 + $0x1e4] ss:$16 sps:$4 sm:$0xff]   ;;  %v6003_v37 = vld [vmem:[#allocation5 + $0x1e0] ss:$16 sps:$4 sm:$0xff]  }
  0x4c   :  { %v6006_v38 = vld [vmem:[#allocation5 + $0x204] ss:$16 sps:$4 sm:$0xff]   ;;  %v6004_v40 = vld [vmem:[#allocation5 + $0x200] ss:$16 sps:$4 sm:$0xff]  }
  0x4d   :  { %v71_v41 = vld [vmem:[#allocation2 + $0x40] sm:$0xff] }
  0x4e   :  { %2400 = vmatpush1.bf16.msra.mxu0 %v5973_v11  ;;  %5421 = vmatpush1.bf16.msra.mxu1 %v5973_v11  ;;  %v75_v42 = vld [vmem:[#allocation2 + $0x60] sm:$0xff] }
  0x4f   :  { %2401 = vmatprep.subr.bf16.mxu0 %v5974_v12  ;;  %5406 = vmatprep.subr.bf16.mxu1 %v5974_v12  ;;  %v135_v45 = vld [vmem:[#allocation2 + $0x240] sm:$0xff]  ;;  %v6938_v50 = vcombine.high %v71_v41, %v75_v42  ;;  %v6946_v59 = vcombine.low %v71_v41, %v75_v42  ;;  %v6057_v41 = vld [vmem:[#allocation5 + $0x10c] ss:$16 sps:$4 sm:$0xff]  }
  0x50   :  { %v139_v46 = vld [vmem:[#allocation2 + $0x260] sm:$0xff] }
  0x51   :  { %v6012_v48 = vld [vmem:[#allocation5 + $0x224] ss:$16 sps:$4 sm:$0xff]   ;;  %v6940_v51 = vcombine.high %v135_v45, %v139_v46  ;;  %v6010_v52 = vld [vmem:[#allocation5 + $0x220] ss:$16 sps:$4 sm:$0xff]   ;;  %v6948_v60 = vcombine.low %v135_v45, %v139_v46 }
  0x52   :  { %2402 = vmatpush1.bf16.msra.mxu0 %v5976_v18  ;;  %5422 = vmatpush1.bf16.msra.mxu1 %v5976_v18  ;;  %v6018_v54 = vld [vmem:[#allocation5 + $0x244] ss:$16 sps:$4 sm:$0xff]   ;;  %v6016_v57 = vld [vmem:[#allocation5 + $0x240] ss:$16 sps:$4 sm:$0xff]   ;;  %v6039_v18 = vld [vmem:[#allocation5 + $0xac] ss:$16 sps:$4 sm:$0xff]  }
  0x53   :  { %2403 = vmatprep.subr.bf16.mxu0 %v5977_v20  ;;  %5407 = vmatprep.subr.bf16.mxu1 %v5977_v20  ;;  %v79_v56 = vld [vmem:[#allocation2 + $0x80] sm:$0xff] }
  0x54   :  { %v83_v58 = vld [vmem:[#allocation2 + $0xa0] sm:$0xff] }
  0x55   :  { %v143_v61 = vld [vmem:[#allocation2 + $0x280] sm:$0xff]  ;;  %v6950_v2 = vcombine.high %v79_v56, %v83_v58  ;;  %v6958_v10 = vcombine.low %v79_v56, %v83_v58 }
  0x56   :  { %2404 = vmatpush1.bf16.msra.mxu0 %v5979_v21  ;;  %5423 = vmatpush1.bf16.msra.mxu1 %v5979_v21  ;;  %v147_v62 = vld [vmem:[#allocation2 + $0x2a0] sm:$0xff] }
  0x57   :  { %2405 = vmatprep.subr.bf16.mxu0 %v5980_v22  ;;  %5408 = vmatprep.subr.bf16.mxu1 %v5980_v22  ;;  %v6024_v0 = vld [vmem:[#allocation5 + $0x264] ss:$16 sps:$4 sm:$0xff]   ;;  %v6952_v3 = vcombine.high %v143_v61, %v147_v62  ;;  %v6022_v4 = vld [vmem:[#allocation5 + $0x260] ss:$16 sps:$4 sm:$0xff]   ;;  %v6960_v11 = vcombine.low %v143_v61, %v147_v62  ;;  %v6061_v61 = vld [vmem:[#allocation5 + $0x128] ss:$16 sps:$4 sm:$0xff]  }
  0x58   :  { %v6030_v6 = vld [vmem:[#allocation5 + $0x284] ss:$16 sps:$4 sm:$0xff]   ;;  %v6028_v8 = vld [vmem:[#allocation5 + $0x280] ss:$16 sps:$4 sm:$0xff]  }
  0x59   :  { %v87_v9 = vld [vmem:[#allocation2 + $0xc0] sm:$0xff] }
  0x5a   :  { %2406 = vmatpush1.bf16.msra.mxu0 %v5982_v23  ;;  %5424 = vmatpush1.bf16.msra.mxu1 %v5982_v23  ;;  %v91_v12 = vld [vmem:[#allocation2 + $0xe0] sm:$0xff]  ;;  %v6037_v23 = vld [vmem:[#allocation5 + $0xa8] ss:$16 sps:$4 sm:$0xff]  }
  0x5b   :  { %2407 = vmatprep.subr.bf16.mxu0 %v5983_v24  ;;  %5409 = vmatprep.subr.bf16.mxu1 %v5983_v24  ;;  %v151_v13 = vld [vmem:[#allocation2 + $0x2c0] sm:$0xff]  ;;  %v6962_v20 = vcombine.high %v87_v9, %v91_v12 }
  0x5c   :  { %v155_v14 = vld [vmem:[#allocation2 + $0x2e0] sm:$0xff] }
  0x5d   :  { %v6036_v17 = vld [vmem:[#allocation5 + $0x2a4] ss:$16 sps:$4 sm:$0xff]   ;;  %v6964_v21 = vcombine.high %v151_v13, %v155_v14  ;;  %v6034_v22 = vld [vmem:[#allocation5 + $0x2a0] ss:$16 sps:$4 sm:$0xff]  }
  0x5e   :  { %2408 = vmatpush1.bf16.msra.mxu0 %v5985_v25  ;;  %5425 = vmatpush1.bf16.msra.mxu1 %v5985_v25  ;;  %v6042_v24 = vld [vmem:[#allocation5 + $0x2c4] ss:$16 sps:$4 sm:$0xff]   ;;  %v6045_v25 = vld [vmem:[#allocation5 + $0xcc] ss:$16 sps:$4 sm:$0xff]   ;;  %v6058_v58 = vld [vmem:[#allocation5 + $0x320] ss:$16 sps:$4 sm:$0xff]  }
  0x5f   :  { %2409 = vmatprep.subr.bf16.mxu0 %v5986_v26  ;;  %5410 = vmatprep.subr.bf16.mxu1 %v5986_v26  ;;  %v6040_v26 = vld [vmem:[#allocation5 + $0x2c0] ss:$16 sps:$4 sm:$0xff]   ;;  %v6066_v62 = vld [vmem:[#allocation5 + $0x344] ss:$16 sps:$4 sm:$0xff]  }
  0x60   :  { %v103_v42 = vld [vmem:[#allocation2 + $0x140] sm:$0xff] }
  0x61   :  { %v107_v45 = vld [vmem:[#allocation2 + $0x160] sm:$0xff] }
  0x62   :  { %2410 = vmatpush1.bf16.msra.mxu0 %v5988_v27  ;;  %5426 = vmatpush1.bf16.msra.mxu1 %v5988_v27  ;;  %v95_v27 = vld [vmem:[#allocation2 + $0x100] sm:$0xff]  ;;  %v6986_v56 = vcombine.high %v103_v42, %v107_v45 }
  0x63   :  { %2411 = vmatprep.subr.bf16.mxu0 %v5989_v28  ;;  %5411 = vmatprep.subr.bf16.mxu1 %v5989_v28  ;;  %v6970_v28 = vcombine.low %v87_v9, %v91_v12  ;;  %v167_v46 = vld [vmem:[#allocation2 + $0x340] sm:$0xff]  ;;  %v6067_v9 = vld [vmem:[#allocation5 + $0x148] ss:$16 sps:$4 sm:$0xff]  }
  0x64   :  { %v6072_v12 = vld [vmem:[#allocation5 + $0x364] ss:$16 sps:$4 sm:$0xff]  }
  0x66   :  { %2412 = vmatpush1.bf16.msra.mxu0 %v5991_v29  ;;  %5427 = vmatpush1.bf16.msra.mxu1 %v5991_v29  ;;  %v6972_v29 = vcombine.low %v151_v13, %v155_v14  ;;  %v6075_v13 = vld [vmem:[#allocation5 + $0x16c] ss:$16 sps:$4 sm:$0xff]  }
  0x67   :  { %2413 = vmatprep.subr.bf16.mxu0 %v5992_v30  ;;  %5412 = vmatprep.subr.bf16.mxu1 %v5992_v30  ;;  %v99_v30 = vld [vmem:[#allocation2 + $0x120] sm:$0xff] }
  0x6a   :  { %2414 = vmatpush1.bf16.msra.mxu0 %v5994_v31  ;;  %5428 = vmatpush1.bf16.msra.mxu1 %v5994_v31  ;;  %v159_v31 = vld [vmem:[#allocation2 + $0x300] sm:$0xff] }
  0x6b   :  { %2415 = vmatprep.subr.bf16.mxu0 %v5995_v32  ;;  %5413 = vmatprep.subr.bf16.mxu1 %v5995_v32  ;;  %v163_v32 = vld [vmem:[#allocation2 + $0x320] sm:$0xff] }
  0x6e   :  { %2416 = vmatpush1.bf16.msra.mxu0 %v5997_v33  ;;  %5429 = vmatpush1.bf16.msra.mxu1 %v5997_v33  ;;  %v6043_v33 = vld [vmem:[#allocation5 + $0xc8] ss:$16 sps:$4 sm:$0xff]  }
  0x6f   :  { %2417 = vmatprep.subr.bf16.mxu0 %v5998_v34  ;;  %5414 = vmatprep.subr.bf16.mxu1 %v5998_v34  ;;  %v6048_v34 = vld [vmem:[#allocation5 + $0x2e4] ss:$16 sps:$4 sm:$0xff]  }
  0x72   :  { %2418 = vmatpush1.bf16.msra.mxu0 %v6000_v35  ;;  %5430 = vmatpush1.bf16.msra.mxu1 %v6000_v35  ;;  %v6051_v35 = vld [vmem:[#allocation5 + $0xec] ss:$16 sps:$4 sm:$0xff]  }
  0x73   :  { %2419 = vmatprep.subr.bf16.mxu0 %v6001_v36  ;;  %5415 = vmatprep.subr.bf16.mxu1 %v6001_v36  ;;  %v6974_v36 = vcombine.high %v95_v27, %v99_v30 }
  0x76   :  { %2420 = vmatpush1.bf16.msra.mxu0 %v6003_v37  ;;  %5431 = vmatpush1.bf16.msra.mxu1 %v6003_v37  ;;  %v6976_v37 = vcombine.high %v159_v31, %v163_v32 }
  0x77   :  { %2582 = vmatprep.subr.bf16.mxu0 %v6006_v38  ;;  %3161 = vmatprep.subr.bf16.mxu1 %v6009_v39  ;;  %v6046_v38 = vld [vmem:[#allocation5 + $0x2e0] ss:$16 sps:$4 sm:$0xff]   ;;  %v6049_v39 = vld [vmem:[#allocation5 + $0xe8] ss:$16 sps:$4 sm:$0xff]  }
  0x79   :  { %2422 = vmatmul.mubr.bf16.vlgmr.msra.gmra.mrb[0].mxu0 %v6932_v43  ;;  %2502 = vmatmul.mubr.bf16.vlgmr.msra.gmra.mrb[0].mxu1 %v6936_v44 }
  0x7a   :  { %2583 = vmatpush1.bf16.msra.mxu0 %v6004_v40  ;;  %3162 = vmatpush1.bf16.msra.mxu1 %v6007_v47  ;;  %v6054_v40 = vld [vmem:[#allocation5 + $0x304] ss:$16 sps:$4 sm:$0xff]   ;;  %v6982_v47 = vcombine.low %v95_v27, %v99_v30 }
  0x7b   :  { %2584 = vmatprep.subr.bf16.mxu0 %v6012_v48  ;;  %3163 = vmatprep.subr.bf16.mxu1 %v6015_v49  ;;  %v6984_v48 = vcombine.low %v159_v31, %v163_v32  ;;  %v171_v49 = vld [vmem:[#allocation2 + $0x360] sm:$0xff] }
  0x7c   :  { %2431 = vmatprep.mubr.bf16.mxu0 %v6938_v50  ;;  %2511 = vmatprep.mubr.bf16.mxu1 %v6940_v51  ;;  %v183_v27 = vld [vmem:[#allocation2 + $0x3c0] sm:$0xff] }
  0x7d   :  { %v187_v32 = vld [vmem:[#allocation2 + $0x3e0] sm:$0xff] }
  0x7e   :  { %2585 = vmatpush1.bf16.msra.mxu0 %v6010_v52  ;;  %3164 = vmatpush1.bf16.msra.mxu1 %v6013_v53  ;;  %v6052_v52 = vld [vmem:[#allocation5 + $0x300] ss:$16 sps:$4 sm:$0xff]   ;;  %v6055_v53 = vld [vmem:[#allocation5 + $0x108] ss:$16 sps:$4 sm:$0xff]  }
  0x7f   :  { %2586 = vmatprep.subr.bf16.mxu0 %v6018_v54  ;;  %3165 = vmatprep.subr.bf16.mxu1 %v6021_v55  ;;  %v6060_v54 = vld [vmem:[#allocation5 + $0x324] ss:$16 sps:$4 sm:$0xff]   ;;  %v6063_v55 = vld [vmem:[#allocation5 + $0x12c] ss:$16 sps:$4 sm:$0xff]  }
  0x81   :  { %2432 = vmatmul.mubr.bf16.gmra.mrb[4].mxu0 %v6946_v59  ;;  %2512 = vmatmul.mubr.bf16.gmra.mrb[4].mxu1 %v6948_v60 }
  0x82   :  { %2587 = vmatpush1.bf16.msra.mxu0 %v6016_v57  ;;  %3166 = vmatpush1.bf16.msra.mxu1 %v6019_v63  ;;  %v6988_v57 = vcombine.high %v167_v46, %v171_v49  ;;  %v6069_v63 = vld [vmem:[#allocation5 + $0x14c] ss:$16 sps:$4 sm:$0xff]  }
  0x83   :  { %2588 = vmatprep.subr.bf16.mxu0 %v6024_v0  ;;  %3167 = vmatprep.subr.bf16.mxu1 %v6027_v1  ;;  %v111_v0 = vld [vmem:[#allocation2 + $0x180] sm:$0xff] }
  0x84   :  { %2441 = vmatprep.mubr.bf16.mxu0 %v6950_v2  ;;  %2521 = vmatprep.mubr.bf16.mxu1 %v6952_v3  ;;  %v6064_v1 = vld [vmem:[#allocation5 + $0x340] ss:$16 sps:$4 sm:$0xff]  }
  0x86   :  { %2589 = vmatpush1.bf16.msra.mxu0 %v6022_v4  ;;  %3168 = vmatpush1.bf16.msra.mxu1 %v6025_v5  ;;  %v115_v4 = vld [vmem:[#allocation2 + $0x1a0] sm:$0xff] }
  0x87   :  { %2590 = vmatprep.subr.bf16.mxu0 %v6030_v6  ;;  %3169 = vmatprep.subr.bf16.mxu1 %v6033_v7  ;;  %v175_v5 = vld [vmem:[#allocation2 + $0x380] sm:$0xff]  ;;  %v6994_v6 = vcombine.low %v103_v42, %v107_v45  ;;  %v6996_v7 = vcombine.low %v167_v46, %v171_v49  ;;  %v6998_v14 = vcombine.high %v111_v0, %v115_v4  ;;  %v6093_v45 = vld [vmem:[#allocation5 + $0x1cc] ss:$16 sps:$4 sm:$0xff]  }
  0x88   :  { %v7006_v30 = vcombine.low %v111_v0, %v115_v4  ;;  %v6090_v42 = vld [vmem:[#allocation5 + $0x3c4] ss:$16 sps:$4 sm:$0xff]   ;;  %v7020_v49 = vcombine.low %v183_v27, %v187_v32  ;;  %v6097_v0 = vld [vmem:[#allocation5 + $0x1e8] ss:$16 sps:$4 sm:$0xff]  }
  0x89   :  { %2442 = vmatmul.mubr.bf16.gmra.mrb[8].mxu0 %v6958_v10  ;;  %2522 = vmatmul.mubr.bf16.gmra.mrb[8].mxu1 %v6960_v11  ;;  %v72_v4 = vld [vmem:[#allocation2 + $0x48] sm:$0xff] }
  0x8a   :  { %2591 = vmatpush1.bf16.msra.mxu0 %v6028_v8  ;;  %3170 = vmatpush1.bf16.msra.mxu1 %v6031_v16  ;;  %v179_v8 = vld [vmem:[#allocation2 + $0x3a0] sm:$0xff] }
  0x8b   :  { %2592 = vmatprep.subr.bf16.mxu0 %v6036_v17  ;;  %3171 = vmatprep.subr.bf16.mxu1 %v6039_v18  ;;  %v7000_v16 = vcombine.high %v175_v5, %v179_v8  ;;  %v6070_v17 = vld [vmem:[#allocation5 + $0x360] ss:$16 sps:$4 sm:$0xff]   ;;  %v6073_v18 = vld [vmem:[#allocation5 + $0x168] ss:$16 sps:$4 sm:$0xff]   ;;  %v7008_v31 = vcombine.low %v175_v5, %v179_v8  ;;  %v6126_v8 = vld [vmem:[#allocation5 + $0x404] ss:$16 sps:$4 sm:$0xff]  }
  0x8c   :  { %2451 = vmatprep.mubr.bf16.mxu0 %v6962_v20  ;;  %2531 = vmatprep.mubr.bf16.mxu1 %v6964_v21  ;;  %v76_v5 = vld [vmem:[#allocation2 + $0x68] sm:$0xff] }
  0x8e   :  { %2593 = vmatpush1.bf16.msra.mxu0 %v6034_v22  ;;  %3172 = vmatpush1.bf16.msra.mxu1 %v6037_v23  ;;  %v6078_v22 = vld [vmem:[#allocation5 + $0x384] ss:$16 sps:$4 sm:$0xff]   ;;  %v6081_v23 = vld [vmem:[#allocation5 + $0x18c] ss:$16 sps:$4 sm:$0xff]  }
  0x8f   :  { %2594 = vmatprep.subr.bf16.mxu0 %v6042_v24  ;;  %3173 = vmatprep.subr.bf16.mxu1 %v6045_v25  ;;  %v6076_v24 = vld [vmem:[#allocation5 + $0x380] ss:$16 sps:$4 sm:$0xff]  }
  0x90   :  { %v119_v25 = vld [vmem:[#allocation2 + $0x1c0] sm:$0xff] }
  0x91   :  { %2452 = vmatmul.mubr.bf16.gmra.mrb[12].mxu0 %v6970_v28  ;;  %2532 = vmatmul.mubr.bf16.gmra.mrb[12].mxu1 %v6972_v29 }
  0x92   :  { %2595 = vmatpush1.bf16.msra.mxu0 %v6040_v26  ;;  %3174 = vmatpush1.bf16.msra.mxu1 %v6043_v33  ;;  %v123_v26 = vld [vmem:[#allocation2 + $0x1e0] sm:$0xff]  ;;  %v6079_v33 = vld [vmem:[#allocation5 + $0x188] ss:$16 sps:$4 sm:$0xff]  }
  0x93   :  { %2596 = vmatprep.subr.bf16.mxu0 %v6048_v34  ;;  %3175 = vmatprep.subr.bf16.mxu1 %v6051_v35  ;;  %v6084_v34 = vld [vmem:[#allocation5 + $0x3a4] ss:$16 sps:$4 sm:$0xff]   ;;  %v6087_v35 = vld [vmem:[#allocation5 + $0x1ac] ss:$16 sps:$4 sm:$0xff]   ;;  %v7018_v46 = vcombine.low %v119_v25, %v123_v26 }
  0x94   :  { %2461 = vmatprep.mubr.bf16.mxu0 %v6974_v36  ;;  %2541 = vmatprep.mubr.bf16.mxu1 %v6976_v37 }
  0x96   :  { %2597 = vmatpush1.bf16.msra.mxu0 %v6046_v38  ;;  %3176 = vmatpush1.bf16.msra.mxu1 %v6049_v39  ;;  %v7010_v38 = vcombine.high %v119_v25, %v123_v26  ;;  %v7012_v39 = vcombine.high %v183_v27, %v187_v32  ;;  %v6132_v25 = vld [vmem:[#allocation5 + $0x424] ss:$16 sps:$4 sm:$0xff]   ;;  %v6130_v26 = vld [vmem:[#allocation5 + $0x420] ss:$16 sps:$4 sm:$0xff]   ;;  %v7036_v27 = vcombine.low %v72_v4, %v76_v5  ;;  %v6106_v32 = vld [vmem:[#allocation5 + $0x248] ss:$16 sps:$4 sm:$0xff]  }
  0x97   :  { %2598 = vmatprep.subr.bf16.mxu0 %v6054_v40  ;;  %3177 = vmatprep.subr.bf16.mxu1 %v6057_v41  ;;  %v6082_v40 = vld [vmem:[#allocation5 + $0x3a0] ss:$16 sps:$4 sm:$0xff]   ;;  %v6085_v41 = vld [vmem:[#allocation5 + $0x1a8] ss:$16 sps:$4 sm:$0xff]  }
  0x99   :  { %2462 = vmatmul.mubr.bf16.gmra.mrb[16].mxu0 %v6982_v47  ;;  %2542 = vmatmul.mubr.bf16.gmra.mrb[16].mxu1 %v6984_v48 }
  0x9a   :  { %2599 = vmatpush1.bf16.msra.mxu0 %v6052_v52  ;;  %3178 = vmatpush1.bf16.msra.mxu1 %v6055_v53  ;;  %v6088_v52 = vld [vmem:[#allocation5 + $0x3c0] ss:$16 sps:$4 sm:$0xff]   ;;  %v64_v53 = vld [vmem:[#allocation2 + $0x8] sm:$0xff] }
  0x9b   :  { %2600 = vmatprep.subr.bf16.mxu0 %v6060_v54  ;;  %3179 = vmatprep.subr.bf16.mxu1 %v6063_v55  ;;  %v68_v54 = vld [vmem:[#allocation2 + $0x28] sm:$0xff] }
  0x9c   :  { %2471 = vmatprep.mubr.bf16.mxu0 %v6986_v56  ;;  %2551 = vmatprep.mubr.bf16.mxu1 %v6988_v57  ;;  %v6091_v55 = vld [vmem:[#allocation5 + $0x1c8] ss:$16 sps:$4 sm:$0xff]  }
  0x9e   :  { %2601 = vmatpush1.bf16.msra.mxu0 %v6058_v58  ;;  %3180 = vmatpush1.bf16.msra.mxu1 %v6061_v61  ;;  %v6096_v58 = vld [vmem:[#allocation5 + $0x3e4] ss:$16 sps:$4 sm:$0xff]   ;;  %v6099_v61 = vld [vmem:[#allocation5 + $0x1ec] ss:$16 sps:$4 sm:$0xff]  }
  0x9f   :  { %2602 = vmatprep.subr.bf16.mxu0 %v6066_v62  ;;  %3181 = vmatprep.subr.bf16.mxu1 %v6069_v63  ;;  %v6094_v62 = vld [vmem:[#allocation5 + $0x3e0] ss:$16 sps:$4 sm:$0xff]   ;;  %v7022_v63 = vcombine.high %v64_v53, %v68_v54 }
  0xa1   :  { %2472 = vmatmul.mubr.bf16.gmra.mrb[20].mxu0 %v6994_v6  ;;  %2552 = vmatmul.mubr.bf16.gmra.mrb[20].mxu1 %v6996_v7 }
  0xa2   :  { %2603 = vmatpush1.bf16.msra.mxu0 %v6064_v1  ;;  %3182 = vmatpush1.bf16.msra.mxu1 %v6067_v9  ;;  %v6102_v1 = vld [vmem:[#allocation5 + $0x20c] ss:$16 sps:$4 sm:$0xff]   ;;  %v7028_v9 = vcombine.low %v64_v53, %v68_v54  ;;  %v6112_v54 = vld [vmem:[#allocation5 + $0x288] ss:$16 sps:$4 sm:$0xff]  }
  0xa3   :  { %2604 = vmatprep.subr.bf16.mxu0 %v6072_v12  ;;  %3183 = vmatprep.subr.bf16.mxu1 %v6075_v13  ;;  %v6100_v12 = vld [vmem:[#allocation5 + $0x208] ss:$16 sps:$4 sm:$0xff]   ;;  %v7030_v13 = vcombine.high %v72_v4, %v76_v5  ;;  %v6120_v4 = vld [vmem:[#allocation5 + $0x2cc] ss:$16 sps:$4 sm:$0xff]   ;;  %v6148_v5 = vld [vmem:[#allocation5 + $0x4a0] ss:$16 sps:$4 sm:$0xff]  }
  0xa4   :  { %2481 = vmatprep.mubr.bf16.mxu0 %v6998_v14  ;;  %2561 = vmatprep.mubr.bf16.mxu1 %v7000_v16 }
  0xa6   :  { %2605 = vmatpush1.bf16.msra.mxu0 %v6070_v17  ;;  %3184 = vmatpush1.bf16.msra.mxu1 %v6073_v18  ;;  %v6105_v17 = vld [vmem:[#allocation5 + $0x22c] ss:$16 sps:$4 sm:$0xff]   ;;  %v6124_v18 = vld [vmem:[#allocation5 + $0x400] ss:$16 sps:$4 sm:$0xff]  }
  0xa7   :  { %2606 = vmatprep.subr.bf16.mxu0 %v6078_v22  ;;  %3185 = vmatprep.subr.bf16.mxu1 %v6081_v23  ;;  %v6103_v22 = vld [vmem:[#allocation5 + $0x228] ss:$16 sps:$4 sm:$0xff]  }
  0xa8   :  { %v80_v23 = vld [vmem:[#allocation2 + $0x88] sm:$0xff] }
  0xa9   :  { %2482 = vmatmul.mubr.bf16.gmra.mrb[24].mxu0 %v7006_v30  ;;  %2562 = vmatmul.mubr.bf16.gmra.mrb[24].mxu1 %v7008_v31 }
  0xaa   :  { %2607 = vmatpush1.bf16.msra.mxu0 %v6076_v24  ;;  %3186 = vmatpush1.bf16.msra.mxu1 %v6079_v33  ;;  %v84_v24 = vld [vmem:[#allocation2 + $0xa8] sm:$0xff]  ;;  %v6135_v33 = vld [vmem:[#allocation5 + $0x444] ss:$16 sps:$4 sm:$0xff]  }
  0xab   :  { %2608 = vmatprep.subr.bf16.mxu0 %v6084_v34  ;;  %3187 = vmatprep.subr.bf16.mxu1 %v6087_v35  ;;  %v7038_v34 = vcombine.high %v80_v23, %v84_v24  ;;  %v6133_v35 = vld [vmem:[#allocation5 + $0x440] ss:$16 sps:$4 sm:$0xff]   ;;  %v7044_v53 = vcombine.low %v80_v23, %v84_v24  ;;  %v108_v23 = vld [vmem:[#allocation2 + $0x168] sm:$0xff] }
  0xac   :  { %2491 = vmatprep.mubr.bf16.mxu0 %v7010_v38  ;;  %2571 = vmatprep.mubr.bf16.mxu1 %v7012_v39  ;;  %v6121_v24 = vld [vmem:[#allocation5 + $0x2e8] ss:$16 sps:$4 sm:$0xff]  }
  0xae   :  { %2609 = vmatpush1.bf16.msra.mxu0 %v6082_v40  ;;  %3188 = vmatpush1.bf16.msra.mxu1 %v6085_v41  ;;  %v88_v40 = vld [vmem:[#allocation2 + $0xc8] sm:$0xff] }
  0xaf   :  { %2610 = vmatprep.subr.bf16.mxu0 %v6090_v42  ;;  %3189 = vmatprep.subr.bf16.mxu1 %v6093_v45  ;;  %v6109_v41 = vld [vmem:[#allocation5 + $0x268] ss:$16 sps:$4 sm:$0xff]   ;;  %v6141_v42 = vld [vmem:[#allocation5 + $0x464] ss:$16 sps:$4 sm:$0xff]   ;;  %v6114_v45 = vld [vmem:[#allocation5 + $0x28c] ss:$16 sps:$4 sm:$0xff]  }
  0xb1   :  { %2492 = vmatmul.mubr.bf16.gmra.mrb[28].mxu0 %v7018_v46  ;;  %2572 = vmatmul.mubr.bf16.gmra.mrb[28].mxu1 %v7020_v49 }
  0xb2   :  { %2611 = vmatpush1.bf16.msra.mxu0 %v6088_v52  ;;  %3190 = vmatpush1.bf16.msra.mxu1 %v6091_v55  ;;  %v6139_v52 = vld [vmem:[#allocation5 + $0x460] ss:$16 sps:$4 sm:$0xff]   ;;  %v6144_v55 = vld [vmem:[#allocation5 + $0x484] ss:$16 sps:$4 sm:$0xff]  }
  0xb3   :  { %2612 = vmatprep.subr.bf16.mxu0 %v6096_v58  ;;  %3191 = vmatprep.subr.bf16.mxu1 %v6099_v61  ;;  %v6117_v58 = vld [vmem:[#allocation5 + $0x2ac] ss:$16 sps:$4 sm:$0xff]   ;;  %v6142_v61 = vld [vmem:[#allocation5 + $0x480] ss:$16 sps:$4 sm:$0xff]  }
  0xb4   :  { %2614 = vmatprep.mubr.bf16.mxu0 %v7022_v63  ;;  %3193 = vmatprep.mubr.bf16.mxu1 %v6918_v15  ;;  %v6108_v15 = vld [vmem:[#allocation5 + $0x24c] ss:$16 sps:$4 sm:$0xff]  }
  0xb6   :  { %2613 = vmatpush1.bf16.msra.mxu0 %v6094_v62  ;;  %3192 = vmatpush1.bf16.msra.mxu1 %v6097_v0  ;;  %v100_v62 = vld [vmem:[#allocation2 + $0x128] sm:$0xff] }
  0xb7   :  { %3354 = vmatprep.subr.bf16.mxu1 %v6102_v1  ;;  %2775 = vmatprep.subr.bf16.mxu0 %v6126_v8  ;;  %v6115_v0 = vld [vmem:[#allocation5 + $0x2a8] ss:$16 sps:$4 sm:$0xff]   ;;  %v6150_v1 = vld [vmem:[#allocation5 + $0x4a4] ss:$16 sps:$4 sm:$0xff]  }
  0xb9   :  { %2615 = vmatmul.mubr.bf16.vlgmr.msra.gmra.mrb[0].mxu0 %v7028_v9  ;;  %3194 = vmatmul.mubr.bf16.vlgmr.msra.gmra.mrb[32].mxu1 %v6932_v43  ;;  %v6111_v43 = vld [vmem:[#allocation5 + $0x26c] ss:$16 sps:$4 sm:$0xff]  }
  0xba   :  { %3355 = vmatpush1.bf16.msra.mxu1 %v6100_v12  ;;  %2624 = vmatprep.mubr.bf16.mxu0 %v7030_v13  ;;  %v6118_v12 = vld [vmem:[#allocation5 + $0x2c8] ss:$16 sps:$4 sm:$0xff]  }
  0xbb   :  { %3203 = vmatprep.mubr.bf16.mxu1 %v6938_v50  ;;  %3356 = vmatprep.subr.bf16.mxu1 %v6105_v17  ;;  %v92_v50 = vld [vmem:[#allocation2 + $0xe8] sm:$0xff]  ;;  %v6153_v17 = vld [vmem:[#allocation5 + $0x4c4] ss:$16 sps:$4 sm:$0xff]  }
  0xbc   :  { %2776 = vmatpush1.bf16.msra.mxu0 %v6124_v18  ;;  %v7052_v8 = vcombine.low %v88_v40, %v92_v50  ;;  %v6123_v18 = vld [vmem:[#allocation5 + $0x2ec] ss:$16 sps:$4 sm:$0xff]  }
  0xbd   :  { %2777 = vmatprep.subr.bf16.mxu0 %v6132_v25  ;;  %v6159_v25 = vld [vmem:[#allocation5 + $0x4e4] ss:$16 sps:$4 sm:$0xff]  }
  0xbe   :  { %3357 = vmatpush1.bf16.msra.mxu1 %v6103_v22  ;;  %v6151_v22 = vld [vmem:[#allocation5 + $0x4c0] ss:$16 sps:$4 sm:$0xff]  }
  0xbf   :  { %3358 = vmatprep.subr.bf16.mxu1 %v6108_v15  ;;  %v6129_v15 = vld [vmem:[#allocation5 + $0x30c] ss:$16 sps:$4 sm:$0xff]  }
  0xc0   :  { %2778 = vmatpush1.bf16.msra.mxu0 %v6130_v26  ;;  %v6157_v26 = vld [vmem:[#allocation5 + $0x4e0] ss:$16 sps:$4 sm:$0xff]  }
  0xc1   :  { %2625 = vmatmul.mubr.bf16.gmra.mrb[4].mxu0 %v7036_v27  ;;  %3204 = vmatmul.mubr.bf16.gmra.mrb[36].mxu1 %v6946_v59  ;;  %v7046_v59 = vcombine.high %v88_v40, %v92_v50  ;;  %v6160_v40 = vld [vmem:[#allocation5 + $0x500] ss:$16 sps:$4 sm:$0xff]   ;;  %v116_v50 = vld [vmem:[#allocation2 + $0x1a8] sm:$0xff] }
  0xc2   :  { %2634 = vmatprep.mubr.bf16.mxu0 %v7038_v34  ;;  %3213 = vmatprep.mubr.bf16.mxu1 %v6950_v2  ;;  %v96_v2 = vld [vmem:[#allocation2 + $0x108] sm:$0xff] }
  0xc3   :  { %3359 = vmatpush1.bf16.msra.mxu1 %v6106_v32  ;;  %2779 = vmatprep.subr.bf16.mxu0 %v6135_v33  ;;  %v7060_v32 = vcombine.low %v96_v2, %v100_v62  ;;  %v6127_v33 = vld [vmem:[#allocation5 + $0x308] ss:$16 sps:$4 sm:$0xff]  }
  0xc4   :  { %3360 = vmatprep.subr.bf16.mxu1 %v6111_v43  ;;  %2780 = vmatpush1.bf16.msra.mxu0 %v6133_v35  ;;  %v6162_v43 = vld [vmem:[#allocation5 + $0x504] ss:$16 sps:$4 sm:$0xff]   ;;  %v6138_v35 = vld [vmem:[#allocation5 + $0x32c] ss:$16 sps:$4 sm:$0xff]  }
  0xc5   :  { %2781 = vmatprep.subr.bf16.mxu0 %v6141_v42  ;;  %v6168_v42 = vld [vmem:[#allocation5 + $0x524] ss:$16 sps:$4 sm:$0xff]  }
  0xc7   :  { %3361 = vmatpush1.bf16.msra.mxu1 %v6109_v41  ;;  %v6136_v41 = vld [vmem:[#allocation5 + $0x328] ss:$16 sps:$4 sm:$0xff]  }
  0xc8   :  { %3362 = vmatprep.subr.bf16.mxu1 %v6114_v45  ;;  %2782 = vmatpush1.bf16.msra.mxu0 %v6139_v52  ;;  %v6147_v45 = vld [vmem:[#allocation5 + $0x34c] ss:$16 sps:$4 sm:$0xff]   ;;  %v6166_v52 = vld [vmem:[#allocation5 + $0x520] ss:$16 sps:$4 sm:$0xff]  }
  0xc9   :  { %2635 = vmatmul.mubr.bf16.gmra.mrb[8].mxu0 %v7044_v53  ;;  %3214 = vmatmul.mubr.bf16.gmra.mrb[40].mxu1 %v6958_v10  ;;  %v7054_v10 = vcombine.high %v96_v2, %v100_v62  ;;  %v6169_v2 = vld [vmem:[#allocation5 + $0x540] ss:$16 sps:$4 sm:$0xff]   ;;  %v124_v62 = vld [vmem:[#allocation2 + $0x1e8] sm:$0xff] }
  0xca   :  { %2644 = vmatprep.mubr.bf16.mxu0 %v7046_v59  ;;  %3223 = vmatprep.mubr.bf16.mxu1 %v6962_v20  ;;  %v104_v20 = vld [vmem:[#allocation2 + $0x148] sm:$0xff] }
  0xcb   :  { %3363 = vmatpush1.bf16.msra.mxu1 %v6112_v54  ;;  %2783 = vmatprep.subr.bf16.mxu0 %v6144_v55  ;;  %v7068_v54 = vcombine.low %v104_v20, %v108_v23  ;;  %v6145_v55 = vld [vmem:[#allocation5 + $0x348] ss:$16 sps:$4 sm:$0xff]  }
  0xcc   :  { %3364 = vmatprep.subr.bf16.mxu1 %v6117_v58  ;;  %2784 = vmatpush1.bf16.msra.mxu0 %v6142_v61  ;;  %v6171_v58 = vld [vmem:[#allocation5 + $0x544] ss:$16 sps:$4 sm:$0xff]   ;;  %v6156_v61 = vld [vmem:[#allocation5 + $0x36c] ss:$16 sps:$4 sm:$0xff]  }
  0xcd   :  { %2785 = vmatprep.subr.bf16.mxu0 %v6150_v1  ;;  %v6177_v1 = vld [vmem:[#allocation5 + $0x564] ss:$16 sps:$4 sm:$0xff]  }
  0xcf   :  { %3365 = vmatpush1.bf16.msra.mxu1 %v6115_v0  ;;  %v6154_v0 = vld [vmem:[#allocation5 + $0x368] ss:$16 sps:$4 sm:$0xff]  }
  0xd0   :  { %3366 = vmatprep.subr.bf16.mxu1 %v6120_v4  ;;  %2786 = vmatpush1.bf16.msra.mxu0 %v6148_v5  ;;  %v6165_v4 = vld [vmem:[#allocation5 + $0x38c] ss:$16 sps:$4 sm:$0xff]   ;;  %v6175_v5 = vld [vmem:[#allocation5 + $0x560] ss:$16 sps:$4 sm:$0xff]  }
  0xd1   :  { %2645 = vmatmul.mubr.bf16.gmra.mrb[12].mxu0 %v7052_v8  ;;  %3224 = vmatmul.mubr.bf16.gmra.mrb[44].mxu1 %v6970_v28  ;;  %v7062_v28 = vcombine.high %v104_v20, %v108_v23  ;;  %v6178_v20 = vld [vmem:[#allocation5 + $0x580] ss:$16 sps:$4 sm:$0xff]   ;;  %v6186_v23 = vld [vmem:[#allocation5 + $0x5a4] ss:$16 sps:$4 sm:$0xff]  }
  0xd2   :  { %2654 = vmatprep.mubr.bf16.mxu0 %v7054_v10  ;;  %3233 = vmatprep.mubr.bf16.mxu1 %v6974_v36  ;;  %v112_v36 = vld [vmem:[#allocation2 + $0x188] sm:$0xff] }
  0xd3   :  { %3367 = vmatpush1.bf16.msra.mxu1 %v6118_v12  ;;  %2787 = vmatprep.subr.bf16.mxu0 %v6153_v17  ;;  %v7076_v12 = vcombine.low %v112_v36, %v116_v50  ;;  %v6163_v17 = vld [vmem:[#allocation5 + $0x388] ss:$16 sps:$4 sm:$0xff]  }
  0xd4   :  { %3368 = vmatprep.subr.bf16.mxu1 %v6123_v18  ;;  %2788 = vmatpush1.bf16.msra.mxu0 %v6151_v22  ;;  %v6180_v18 = vld [vmem:[#allocation5 + $0x584] ss:$16 sps:$4 sm:$0xff]   ;;  %v6174_v22 = vld [vmem:[#allocation5 + $0x3ac] ss:$16 sps:$4 sm:$0xff]  }
  0xd5   :  { %2789 = vmatprep.subr.bf16.mxu0 %v6159_v25  ;;  %v6172_v25 = vld [vmem:[#allocation5 + $0x3a8] ss:$16 sps:$4 sm:$0xff]  }
  0xd7   :  { %3369 = vmatpush1.bf16.msra.mxu1 %v6121_v24  ;;  %v132_v24 = vld [vmem:[#allocation2 + $0x228] sm:$0xff] }
  0xd8   :  { %3370 = vmatprep.subr.bf16.mxu1 %v6129_v15  ;;  %2790 = vmatpush1.bf16.msra.mxu0 %v6157_v26  ;;  %v6183_v15 = vld [vmem:[#allocation5 + $0x3cc] ss:$16 sps:$4 sm:$0xff]   ;;  %v6184_v26 = vld [vmem:[#allocation5 + $0x5a0] ss:$16 sps:$4 sm:$0xff]  }
  0xd9   :  { %2655 = vmatmul.mubr.bf16.gmra.mrb[16].mxu0 %v7060_v32  ;;  %3234 = vmatmul.mubr.bf16.gmra.mrb[48].mxu1 %v6982_v47  ;;  %v7070_v47 = vcombine.high %v112_v36, %v116_v50  ;;  %v6195_v36 = vld [vmem:[#allocation5 + $0x5e4] ss:$16 sps:$4 sm:$0xff]   ;;  %v136_v50 = vld [vmem:[#allocation2 + $0x248] sm:$0xff] }
  0xda   :  { %2664 = vmatprep.mubr.bf16.mxu0 %v7062_v28  ;;  %3243 = vmatprep.mubr.bf16.mxu1 %v6986_v56  ;;  %v120_v56 = vld [vmem:[#allocation2 + $0x1c8] sm:$0xff] }
  0xdb   :  { %3371 = vmatpush1.bf16.msra.mxu1 %v6127_v33  ;;  %2791 = vmatprep.subr.bf16.mxu0 %v6162_v43  ;;  %v7084_v33 = vcombine.low %v120_v56, %v124_v62 }
  0xdc   :  { %3372 = vmatprep.subr.bf16.mxu1 %v6138_v35  ;;  %2792 = vmatpush1.bf16.msra.mxu0 %v6160_v40  ;;  %v6189_v35 = vld [vmem:[#allocation5 + $0x5c4] ss:$16 sps:$4 sm:$0xff]   ;;  %v6187_v40 = vld [vmem:[#allocation5 + $0x5c0] ss:$16 sps:$4 sm:$0xff]  }
  0xdd   :  { %2793 = vmatprep.subr.bf16.mxu0 %v6168_v42  ;;  %v6190_v42 = vld [vmem:[#allocation5 + $0x3e8] ss:$16 sps:$4 sm:$0xff]  }
  0xdf   :  { %3373 = vmatpush1.bf16.msra.mxu1 %v6136_v41  ;;  %v140_v41 = vld [vmem:[#allocation2 + $0x268] sm:$0xff] }
  0xe0   :  { %3374 = vmatprep.subr.bf16.mxu1 %v6147_v45  ;;  %2794 = vmatpush1.bf16.msra.mxu0 %v6166_v52  ;;  %v6193_v45 = vld [vmem:[#allocation5 + $0x5e0] ss:$16 sps:$4 sm:$0xff]   ;;  %v6198_v52 = vld [vmem:[#allocation5 + $0x40c] ss:$16 sps:$4 sm:$0xff]  }
  0xe1   :  { %2665 = vmatmul.mubr.bf16.gmra.mrb[20].mxu0 %v7068_v54  ;;  %3244 = vmatmul.mubr.bf16.gmra.mrb[52].mxu1 %v6994_v6  ;;  %v7078_v6 = vcombine.high %v120_v56, %v124_v62  ;;  %v156_v62 = vld [vmem:[#allocation2 + $0x2e8] sm:$0xff] }
  0xe2   :  { %2674 = vmatprep.mubr.bf16.mxu0 %v7070_v47  ;;  %3253 = vmatprep.mubr.bf16.mxu1 %v6998_v14  ;;  %v128_v14 = vld [vmem:[#allocation2 + $0x208] sm:$0xff] }
  0xe3   :  { %3375 = vmatpush1.bf16.msra.mxu1 %v6145_v55  ;;  %2795 = vmatprep.subr.bf16.mxu0 %v6171_v58  ;;  %v7086_v43 = vcombine.high %v128_v14, %v132_v24  ;;  %v7092_v55 = vcombine.low %v128_v14, %v132_v24  ;;  %v7094_v58 = vcombine.high %v136_v50, %v140_v41 }
  0xe4   :  { %3376 = vmatprep.subr.bf16.mxu1 %v6156_v61  ;;  %2796 = vmatpush1.bf16.msra.mxu0 %v6169_v2  ;;  %v148_v61 = vld [vmem:[#allocation2 + $0x2a8] sm:$0xff]  ;;  %v7100_v2 = vcombine.low %v136_v50, %v140_v41  ;;  %v6226_v50 = vld [vmem:[#allocation5 + $0x620] ss:$16 sps:$4 sm:$0xff]  }
  0xe5   :  { %2797 = vmatprep.subr.bf16.mxu0 %v6177_v1  ;;  %v160_v1 = vld [vmem:[#allocation2 + $0x308] sm:$0xff] }
  0xe7   :  { %3377 = vmatpush1.bf16.msra.mxu1 %v6154_v0 }
  0xe8   :  { %3378 = vmatprep.subr.bf16.mxu1 %v6165_v4  ;;  %2798 = vmatpush1.bf16.msra.mxu0 %v6175_v5 }
  0xe9   :  { %2675 = vmatmul.mubr.bf16.gmra.mrb[24].mxu0 %v7076_v12  ;;  %3254 = vmatmul.mubr.bf16.gmra.mrb[56].mxu1 %v7006_v30  ;;  %v6181_v30 = vld [vmem:[#allocation5 + $0x3c8] ss:$16 sps:$4 sm:$0xff]  }
  0xea   :  { %2684 = vmatprep.mubr.bf16.mxu0 %v7078_v6  ;;  %3263 = vmatprep.mubr.bf16.mxu1 %v7010_v38  ;;  %v6192_v38 = vld [vmem:[#allocation5 + $0x3ec] ss:$16 sps:$4 sm:$0xff]  }
  0xeb   :  { %3379 = vmatpush1.bf16.msra.mxu1 %v6163_v17  ;;  %2799 = vmatprep.subr.bf16.mxu0 %v6180_v18 }
  0xec   :  { %3380 = vmatprep.subr.bf16.mxu1 %v6174_v22  ;;  %2800 = vmatpush1.bf16.msra.mxu0 %v6178_v20 }
  0xed   :  { %2801 = vmatprep.subr.bf16.mxu0 %v6186_v23 }
  0xef   :  { %3381 = vmatpush1.bf16.msra.mxu1 %v6172_v25 }
  0xf0   :  { %3382 = vmatprep.subr.bf16.mxu1 %v6183_v15  ;;  %2802 = vmatpush1.bf16.msra.mxu0 %v6184_v26  ;;  %v6196_v26 = vld [vmem:[#allocation5 + $0x408] ss:$16 sps:$4 sm:$0xff]  }
  0xf1   :  { %2685 = vmatmul.mubr.bf16.gmra.mrb[28].mxu0 %v7084_v33  ;;  %3264 = vmatmul.mubr.bf16.gmra.mrb[60].mxu1 %v7018_v46  ;;  %v6222_v46 = vld [vmem:[#allocation5 + $0x604] ss:$16 sps:$4 sm:$0xff]  }
  0xf2   :  { %2694 = vmatprep.mubr.bf16.mxu0 %v7086_v43  ;;  %3273 = vmatprep.mubr.bf16.mxu1 %v6926_v19  ;;  %v144_v19 = vld [vmem:[#allocation2 + $0x288] sm:$0xff] }
  0xf3   :  { %3383 = vmatpush1.bf16.msra.mxu1 %v6181_v30  ;;  %2803 = vmatprep.subr.bf16.mxu0 %v6189_v35  ;;  %v7102_v56 = vcombine.high %v144_v19, %v148_v61  ;;  %v7108_v0 = vcombine.low %v144_v19, %v148_v61  ;;  %v6201_v30 = vld [vmem:[#allocation5 + $0x42c] ss:$16 sps:$4 sm:$0xff]   ;;  %v6220_v35 = vld [vmem:[#allocation5 + $0x600] ss:$16 sps:$4 sm:$0xff]  }
  0xf4   :  { %3384 = vmatprep.subr.bf16.mxu1 %v6192_v38  ;;  %2804 = vmatpush1.bf16.msra.mxu0 %v6187_v40  ;;  %v6228_v40 = vld [vmem:[#allocation5 + $0x624] ss:$16 sps:$4 sm:$0xff]  }
  0xf5   :  { %2805 = vmatprep.subr.bf16.mxu0 %v6195_v36  ;;  %v85_v38 = vld [vmem:[#allocation2 + $0xb0] sm:$0xff]  ;;  %v6204_v36 = vld [vmem:[#allocation5 + $0x44c] ss:$16 sps:$4 sm:$0xff]  }
  0xf6   :  { %v89_v19 = vld [vmem:[#allocation2 + $0xd0] sm:$0xff] }
  0xf7   :  { %3385 = vmatpush1.bf16.msra.mxu1 %v6190_v42  ;;  %v93_v61 = vld [vmem:[#allocation2 + $0xf0] sm:$0xff] }
  0xf8   :  { %2806 = vmatpush1.bf16.msra.mxu0 %v6193_v45  ;;  %3547 = vmatprep.subr.bf16.mxu1 %v6198_v52  ;;  %v6231_v45 = vld [vmem:[#allocation5 + $0x644] ss:$16 sps:$4 sm:$0xff]   ;;  %v6207_v52 = vld [vmem:[#allocation5 + $0x46c] ss:$16 sps:$4 sm:$0xff]  }
  0xf9   :  { %2695 = vmatmul.mubr.bf16.gmra.mrb[32].mxu0 %v7092_v55  ;;  %3274 = vmatmul.mubr.bf16.gmra.mrb[64].mxu1 %v6936_v44  ;;  %v152_v44 = vld [vmem:[#allocation2 + $0x2c8] sm:$0xff] }
  0xfa   :  { %2704 = vmatprep.mubr.bf16.mxu0 %v7094_v58  ;;  %3283 = vmatprep.mubr.bf16.mxu1 %v6940_v51  ;;  %v7110_v51 = vcombine.high %v152_v44, %v156_v62  ;;  %v7116_v4 = vcombine.low %v152_v44, %v156_v62  ;;  %v6205_v44 = vld [vmem:[#allocation5 + $0x468] ss:$16 sps:$4 sm:$0xff]   ;;  %v6210_v62 = vld [vmem:[#allocation5 + $0x48c] ss:$16 sps:$4 sm:$0xff]  }
  0xfb   :  { %2968 = vmatprep.subr.bf16.mxu0 %v6222_v46  ;;  %v6229_v46 = vld [vmem:[#allocation5 + $0x640] ss:$16 sps:$4 sm:$0xff]  }
 0x101   :  { %2705 = vmatmul.mubr.bf16.gmra.mrb[36].mxu0 %v7100_v2  ;;  %3284 = vmatmul.mubr.bf16.gmra.mrb[68].mxu1 %v6948_v60  ;;  %v164_v60 = vld [vmem:[#allocation2 + $0x328] sm:$0xff] }
 0x102   :  { %2714 = vmatprep.mubr.bf16.mxu0 %v7102_v56  ;;  %3293 = vmatprep.mubr.bf16.mxu1 %v6952_v3  ;;  %v7118_v5 = vcombine.high %v160_v1, %v164_v60  ;;  %v168_v3 = vld [vmem:[#allocation2 + $0x348] sm:$0xff]  ;;  %v7124_v17 = vcombine.low %v160_v1, %v164_v60  ;;  %v6235_v1 = vld [vmem:[#allocation5 + $0x660] ss:$16 sps:$4 sm:$0xff]  }
 0x109   :  { %2715 = vmatmul.mubr.bf16.gmra.mrb[40].mxu0 %v7108_v0  ;;  %3294 = vmatmul.mubr.bf16.gmra.mrb[72].mxu1 %v6960_v11  ;;  %v172_v11 = vld [vmem:[#allocation2 + $0x368] sm:$0xff] }
 0x10a   :  { %2724 = vmatprep.mubr.bf16.mxu0 %v7110_v51  ;;  %3303 = vmatprep.mubr.bf16.mxu1 %v6964_v21  ;;  %v7126_v18 = vcombine.high %v168_v3, %v172_v11  ;;  %v176_v21 = vld [vmem:[#allocation2 + $0x388] sm:$0xff]  ;;  %v7132_v22 = vcombine.low %v168_v3, %v172_v11  ;;  %v7174_v3 = vcombine.high %v89_v19, %v93_v61  ;;  %v6240_v11 = vld [vmem:[#allocation5 + $0x684] ss:$16 sps:$4 sm:$0xff]  }
 0x111   :  { %2725 = vmatmul.mubr.bf16.gmra.mrb[44].mxu0 %v7116_v4  ;;  %3304 = vmatmul.mubr.bf16.gmra.mrb[76].mxu1 %v6972_v29  ;;  %v180_v29 = vld [vmem:[#allocation2 + $0x3a8] sm:$0xff] }
 0x112   :  { %2734 = vmatprep.mubr.bf16.mxu0 %v7118_v5  ;;  %3313 = vmatprep.mubr.bf16.mxu1 %v6976_v37  ;;  %v7134_v20 = vcombine.high %v176_v21, %v180_v29  ;;  %v184_v37 = vld [vmem:[#allocation2 + $0x3c8] sm:$0xff]  ;;  %v7140_v14 = vcombine.low %v176_v21, %v180_v29  ;;  %v6246_v29 = vld [vmem:[#allocation5 + $0x6a4] ss:$16 sps:$4 sm:$0xff]  }
 0x113   :  { %v6213_v21 = vld [vmem:[#allocation5 + $0x4ac] ss:$16 sps:$4 sm:$0xff]  }
 0x119   :  { %2735 = vmatmul.mubr.bf16.gmra.mrb[48].mxu0 %v7124_v17  ;;  %3314 = vmatmul.mubr.bf16.gmra.mrb[80].mxu1 %v6984_v48  ;;  %v188_v48 = vld [vmem:[#allocation2 + $0x3e8] sm:$0xff] }
 0x11a   :  { %2744 = vmatprep.mubr.bf16.mxu0 %v7126_v18  ;;  %3323 = vmatprep.mubr.bf16.mxu1 %v6988_v57  ;;  %v7142_v23 = vcombine.high %v184_v37, %v188_v48  ;;  %v65_v57 = vld [vmem:[#allocation2 + $0x10] sm:$0xff]  ;;  %v7148_v24 = vcombine.low %v184_v37, %v188_v48 }
 0x11b   :  { %v97_v37 = vld [vmem:[#allocation2 + $0x110] sm:$0xff] }
 0x11c   :  { %v101_v48 = vld [vmem:[#allocation2 + $0x130] sm:$0xff] }
 0x121   :  { %2745 = vmatmul.mubr.bf16.gmra.mrb[52].mxu0 %v7132_v22  ;;  %3324 = vmatmul.mubr.bf16.gmra.mrb[84].mxu1 %v6996_v7  ;;  %v69_v7 = vld [vmem:[#allocation2 + $0x30] sm:$0xff] }
 0x122   :  { %2754 = vmatprep.mubr.bf16.mxu0 %v7134_v20  ;;  %3333 = vmatprep.mubr.bf16.mxu1 %v7000_v16  ;;  %v7150_v25 = vcombine.high %v65_v57, %v69_v7  ;;  %v73_v16 = vld [vmem:[#allocation2 + $0x50] sm:$0xff]  ;;  %v7156_v15 = vcombine.low %v65_v57, %v69_v7  ;;  %v6211_v57 = vld [vmem:[#allocation5 + $0x4a8] ss:$16 sps:$4 sm:$0xff]  }
 0x129   :  { %2755 = vmatmul.mubr.bf16.gmra.mrb[56].mxu0 %v7140_v14  ;;  %3334 = vmatmul.mubr.bf16.gmra.mrb[88].mxu1 %v7008_v31  ;;  %v77_v31 = vld [vmem:[#allocation2 + $0x70] sm:$0xff] }
 0x12a   :  { %2764 = vmatprep.mubr.bf16.mxu0 %v7142_v23  ;;  %3343 = vmatprep.mubr.bf16.mxu1 %v7012_v39  ;;  %v7158_v39 = vcombine.high %v73_v16, %v77_v31  ;;  %v7164_v41 = vcombine.low %v73_v16, %v77_v31  ;;  %v6216_v16 = vld [vmem:[#allocation5 + $0x4cc] ss:$16 sps:$4 sm:$0xff]   ;;  %v6244_v31 = vld [vmem:[#allocation5 + $0x6a0] ss:$16 sps:$4 sm:$0xff]  }
 0x131   :  { %2765 = vmatmul.mubr.bf16.gmra.mrb[60].mxu0 %v7148_v24  ;;  %3344 = vmatmul.mubr.bf16.gmra.mrb[92].mxu1 %v7020_v49  ;;  %v6199_v49 = vld [vmem:[#allocation5 + $0x428] ss:$16 sps:$4 sm:$0xff]  }
 0x132   :  { %2807 = vmatprep.mubr.bf16.mxu0 %v7150_v25  ;;  %3386 = vmatprep.mubr.bf16.mxu1 %v7022_v63  ;;  %v81_v63 = vld [vmem:[#allocation2 + $0x90] sm:$0xff] }
 0x133   :  { %v7166_v42 = vcombine.high %v81_v63, %v85_v38  ;;  %v7172_v60 = vcombine.low %v81_v63, %v85_v38  ;;  %v6219_v63 = vld [vmem:[#allocation5 + $0x4ec] ss:$16 sps:$4 sm:$0xff]   ;;  %v6247_v38 = vld [vmem:[#allocation5 + $0x6c0] ss:$16 sps:$4 sm:$0xff]  }
 0x139   :  { %2808 = vmatmul.mubr.bf16.vlgmr.msra.gmra.mrb[0].mxu0 %v7156_v15  ;;  %3387 = vmatmul.mubr.bf16.vlgmr.msra.gmra.mrb[32].mxu1 %v7028_v9  ;;  %v6202_v9 = vld [vmem:[#allocation5 + $0x448] ss:$16 sps:$4 sm:$0xff]  }
 0x13a   :  { %3548 = vmatpush1.bf16.msra.mxu1 %v6196_v26  ;;  %2817 = vmatprep.mubr.bf16.mxu0 %v7158_v39 }
 0x13b   :  { %3396 = vmatprep.mubr.bf16.mxu1 %v7030_v13  ;;  %3549 = vmatprep.subr.bf16.mxu1 %v6201_v30  ;;  %v6237_v13 = vld [vmem:[#allocation5 + $0x664] ss:$16 sps:$4 sm:$0xff]   ;;  %v7184_v30 = vcombine.low %v89_v19, %v93_v61  ;;  %v7200_v61 = vcombine.low %v97_v37, %v101_v48 }
 0x13c   :  { %2969 = vmatpush1.bf16.msra.mxu0 %v6220_v35  ;;  %v7188_v35 = vcombine.high %v97_v37, %v101_v48  ;;  %v6232_v37 = vld [vmem:[#allocation5 + $0x528] ss:$16 sps:$4 sm:$0xff]  }
 0x13d   :  { %2970 = vmatprep.subr.bf16.mxu0 %v6228_v40  ;;  %v6214_v40 = vld [vmem:[#allocation5 + $0x4c8] ss:$16 sps:$4 sm:$0xff]  }
 0x13e   :  { %3550 = vmatpush1.bf16.msra.mxu1 %v6199_v49  ;;  %v6249_v49 = vld [vmem:[#allocation5 + $0x6c4] ss:$16 sps:$4 sm:$0xff]  }
 0x13f   :  { %3551 = vmatprep.subr.bf16.mxu1 %v6204_v36  ;;  %v6255_v36 = vld [vmem:[#allocation5 + $0x6e4] ss:$16 sps:$4 sm:$0xff]  }
 0x140   :  { %2971 = vmatpush1.bf16.msra.mxu0 %v6226_v50  ;;  %v105_v50 = vld [vmem:[#allocation2 + $0x150] sm:$0xff] }
 0x141   :  { %2818 = vmatmul.mubr.bf16.gmra.mrb[4].mxu0 %v7164_v41  ;;  %3397 = vmatmul.mubr.bf16.gmra.mrb[36].mxu1 %v7036_v27  ;;  %v6208_v27 = vld [vmem:[#allocation5 + $0x488] ss:$16 sps:$4 sm:$0xff]  }
 0x142   :  { %2827 = vmatprep.mubr.bf16.mxu0 %v7166_v42  ;;  %3406 = vmatprep.mubr.bf16.mxu1 %v7038_v34  ;;  %v6238_v34 = vld [vmem:[#allocation5 + $0x680] ss:$16 sps:$4 sm:$0xff]  }
 0x143   :  { %3552 = vmatpush1.bf16.msra.mxu1 %v6202_v9  ;;  %2972 = vmatprep.subr.bf16.mxu0 %v6231_v45  ;;  %v109_v9 = vld [vmem:[#allocation2 + $0x170] sm:$0xff]  ;;  %v6217_v45 = vld [vmem:[#allocation5 + $0x4e8] ss:$16 sps:$4 sm:$0xff]  }
 0x144   :  { %3553 = vmatprep.subr.bf16.mxu1 %v6207_v52  ;;  %2973 = vmatpush1.bf16.msra.mxu0 %v6229_v46  ;;  %v6225_v46 = vld [vmem:[#allocation5 + $0x50c] ss:$16 sps:$4 sm:$0xff]  }
 0x145   :  { %2974 = vmatprep.subr.bf16.mxu0 %v6237_v13  ;;  %v6253_v13 = vld [vmem:[#allocation5 + $0x6e0] ss:$16 sps:$4 sm:$0xff]  }
 0x147   :  { %3554 = vmatpush1.bf16.msra.mxu1 %v6205_v44  ;;  %v7204_v44 = vcombine.high %v105_v50, %v109_v9 }
 0x148   :  { %3555 = vmatprep.subr.bf16.mxu1 %v6210_v62  ;;  %2975 = vmatpush1.bf16.msra.mxu0 %v6235_v1  ;;  %v6223_v62 = vld [vmem:[#allocation5 + $0x508] ss:$16 sps:$4 sm:$0xff]   ;;  %v6258_v1 = vld [vmem:[#allocation5 + $0x704] ss:$16 sps:$4 sm:$0xff]  }
 0x149   :  { %2828 = vmatmul.mubr.bf16.gmra.mrb[8].mxu0 %v7172_v60  ;;  %3407 = vmatmul.mubr.bf16.gmra.mrb[40].mxu1 %v7044_v53 }
 0x14a   :  { %2837 = vmatprep.mubr.bf16.mxu0 %v7174_v3  ;;  %3416 = vmatprep.mubr.bf16.mxu1 %v7046_v59 }
 0x14b   :  { %3556 = vmatpush1.bf16.msra.mxu1 %v6208_v27  ;;  %2976 = vmatprep.subr.bf16.mxu0 %v6240_v11  ;;  %v6234_v27 = vld [vmem:[#allocation5 + $0x52c] ss:$16 sps:$4 sm:$0xff]   ;;  %v6256_v11 = vld [vmem:[#allocation5 + $0x700] ss:$16 sps:$4 sm:$0xff]  }
 0x14c   :  { %v7180_v7 = vpop.f32.mrb[0].mxu1  ;;  %3557 = vmatprep.subr.bf16.mxu1 %v6213_v21  ;;  %2977 = vmatpush1.bf16.msra.mxu0 %v6238_v34  ;;  %v6264_v21 = vld [vmem:[#allocation5 + $0x724] ss:$16 sps:$4 sm:$0xff]  }
 0x14d   :  { %v7182_v26 = vpop.f32.mrb[1].mxu1  ;;  %2978 = vmatprep.subr.bf16.mxu0 %v6246_v29  ;;  %v113_v34 = vld [vmem:[#allocation2 + $0x190] sm:$0xff] }
 0x14e   :  { %v7186_v53 = vpop.f32.mrb[2].mxu1  ;;  %v117_v29 = vld [vmem:[#allocation2 + $0x1b0] sm:$0xff] }
 0x14f   :  { %v7190_v59 = vpop.f32.mrb[3].mxu1  ;;  %3558 = vmatpush1.bf16.msra.mxu1 %v6211_v57  ;;  %v6243_v57 = vld [vmem:[#allocation5 + $0x54c] ss:$16 sps:$4 sm:$0xff]  }
 0x150   :  { %3559 = vmatprep.subr.bf16.mxu1 %v6216_v16  ;;  %2979 = vmatpush1.bf16.msra.mxu0 %v6244_v31  ;;  %v6262_v16 = vld [vmem:[#allocation5 + $0x720] ss:$16 sps:$4 sm:$0xff]  }
 0x151   :  { %2838 = vmatmul.mubr.bf16.gmra.mrb[12].mxu0 %v7184_v30  ;;  %3417 = vmatmul.mubr.bf16.gmra.mrb[44].mxu1 %v7052_v8 }
 0x152   :  { %2847 = vmatprep.mubr.bf16.mxu0 %v7188_v35  ;;  %3426 = vmatprep.mubr.bf16.mxu1 %v7054_v10 }
 0x153   :  { %3560 = vmatpush1.bf16.msra.mxu1 %v6214_v40  ;;  %2980 = vmatprep.subr.bf16.mxu0 %v6249_v49  ;;  %v7216_v40 = vcombine.low %v105_v50, %v109_v9  ;;  %v7220_v49 = vcombine.high %v113_v34, %v117_v29  ;;  %v6273_v50 = vld [vmem:[#allocation5 + $0x764] ss:$16 sps:$4 sm:$0xff]  }
 0x154   :  { %v7196_v52 = vpop.f32.mrb[4].mxu1  ;;  %3561 = vmatprep.subr.bf16.mxu1 %v6219_v63  ;;  %2981 = vmatpush1.bf16.msra.mxu0 %v6247_v38  ;;  %v6241_v63 = vld [vmem:[#allocation5 + $0x548] ss:$16 sps:$4 sm:$0xff]   ;;  %v6267_v38 = vld [vmem:[#allocation5 + $0x744] ss:$16 sps:$4 sm:$0xff]  }
 0x155   :  { %v7198_v19 = vpop.f32.mrb[5].mxu1  ;;  %2982 = vmatprep.subr.bf16.mxu0 %v6255_v36  ;;  %v6252_v36 = vld [vmem:[#allocation5 + $0x56c] ss:$16 sps:$4 sm:$0xff]   ;;  %v121_v9 = vld [vmem:[#allocation2 + $0x1d0] sm:$0xff] }
 0x156   :  { %v7202_v8 = vpop.f32.mrb[6].mxu1 }
 0x157   :  { %v7206_v10 = vpop.f32.mrb[7].mxu1  ;;  %3562 = vmatpush1.bf16.msra.mxu1 %v6217_v45  ;;  %v6265_v45 = vld [vmem:[#allocation5 + $0x740] ss:$16 sps:$4 sm:$0xff]  }
 0x158   :  { %3563 = vmatprep.subr.bf16.mxu1 %v6225_v46  ;;  %2983 = vmatpush1.bf16.msra.mxu0 %v6253_v13  ;;  %v125_v46 = vld [vmem:[#allocation2 + $0x1f0] sm:$0xff]  ;;  %v6250_v13 = vld [vmem:[#allocation5 + $0x568] ss:$16 sps:$4 sm:$0xff]  }
 0x159   :  { %2848 = vmatmul.mubr.bf16.gmra.mrb[16].mxu0 %v7200_v61  ;;  %3427 = vmatmul.mubr.bf16.gmra.mrb[48].mxu1 %v7060_v32 }
 0x15a   :  { %2857 = vmatprep.mubr.bf16.mxu0 %v7204_v44  ;;  %3436 = vmatprep.mubr.bf16.mxu1 %v7062_v28 }
 0x15b   :  { %3564 = vmatpush1.bf16.msra.mxu1 %v6223_v62  ;;  %2984 = vmatprep.subr.bf16.mxu0 %v6258_v1  ;;  %v6261_v1 = vld [vmem:[#allocation5 + $0x58c] ss:$16 sps:$4 sm:$0xff]  }
 0x15c   :  { %v7212_v48 = vpop.f32.mrb[8].mxu1  ;;  %3565 = vmatprep.subr.bf16.mxu1 %v6234_v27  ;;  %2985 = vmatpush1.bf16.msra.mxu0 %v6256_v11  ;;  %v6271_v27 = vld [vmem:[#allocation5 + $0x760] ss:$16 sps:$4 sm:$0xff]  }
 0x15d   :  { %v7214_v31 = vpop.f32.mrb[9].mxu1  ;;  %2986 = vmatprep.subr.bf16.mxu0 %v6264_v21  ;;  %v7232_v21 = vcombine.low %v113_v34, %v117_v29  ;;  %v6282_v34 = vld [vmem:[#allocation5 + $0x7a4] ss:$16 sps:$4 sm:$0xff]  }
 0x15e   :  { %v7218_v32 = vpop.f32.mrb[10].mxu1  ;;  %v129_v29 = vld [vmem:[#allocation2 + $0x210] sm:$0xff] }
 0x15f   :  { %v7222_v28 = vpop.f32.mrb[11].mxu1  ;;  %3566 = vmatpush1.bf16.msra.mxu1 %v6232_v37  ;;  %v7236_v37 = vcombine.high %v121_v9, %v125_v46 }
 0x160   :  { %3567 = vmatprep.subr.bf16.mxu1 %v6243_v57  ;;  %2987 = vmatpush1.bf16.msra.mxu0 %v6262_v16  ;;  %v6259_v57 = vld [vmem:[#allocation5 + $0x588] ss:$16 sps:$4 sm:$0xff]   ;;  %v6276_v16 = vld [vmem:[#allocation5 + $0x784] ss:$16 sps:$4 sm:$0xff]  }
 0x161   :  { %2858 = vmatmul.mubr.bf16.gmra.mrb[20].mxu0 %v7216_v40  ;;  %3437 = vmatmul.mubr.bf16.gmra.mrb[52].mxu1 %v7068_v54 }
 0x162   :  { %2867 = vmatprep.mubr.bf16.mxu0 %v7220_v49  ;;  %3446 = vmatprep.mubr.bf16.mxu1 %v7070_v47 }
 0x163   :  { %3568 = vmatpush1.bf16.msra.mxu1 %v6241_v63  ;;  %2988 = vmatprep.subr.bf16.mxu0 %v6267_v38  ;;  %v6270_v63 = vld [vmem:[#allocation5 + $0x5ac] ss:$16 sps:$4 sm:$0xff]   ;;  %v6274_v38 = vld [vmem:[#allocation5 + $0x780] ss:$16 sps:$4 sm:$0xff]  }
 0x164   :  { %v7228_v62 = vpop.f32.mrb[12].mxu1  ;;  %3569 = vmatprep.subr.bf16.mxu1 %v6252_v36  ;;  %2989 = vmatpush1.bf16.msra.mxu0 %v6265_v45  ;;  %v133_v36 = vld [vmem:[#allocation2 + $0x230] sm:$0xff]  ;;  %v6268_v45 = vld [vmem:[#allocation5 + $0x5a8] ss:$16 sps:$4 sm:$0xff]  }
 0x165   :  { %v7230_v11 = vpop.f32.mrb[13].mxu1  ;;  %2990 = vmatprep.subr.bf16.mxu0 %v6273_v50 }
 0x166   :  { %v7234_v54 = vpop.f32.mrb[14].mxu1 }
 0x167   :  { %8115 = vst [vmem:[#allocation12_spill] sm:$0xff] %v7234_v54  ;;  %v7238_v47 = vpop.f32.mrb[15].mxu1  ;;  %3570 = vmatpush1.bf16.msra.mxu1 %v6250_v13  ;;  %v6279_v13 = vld [vmem:[#allocation5 + $0x5cc] ss:$16 sps:$4 sm:$0xff]   ;;  %v7252_v54 = vcombine.high %v129_v29, %v133_v36 }
 0x168   :  { %8116 = vst [vmem:[#allocation13_spill] sm:$0xff] %v7238_v47  ;;  %3571 = vmatprep.subr.bf16.mxu1 %v6261_v1  ;;  %2991 = vmatpush1.bf16.msra.mxu0 %v6271_v27  ;;  %v6280_v1 = vld [vmem:[#allocation5 + $0x7a0] ss:$16 sps:$4 sm:$0xff]   ;;  %v7248_v47 = vcombine.low %v121_v9, %v125_v46  ;;  %v6291_v9 = vld [vmem:[#allocation5 + $0x7e4] ss:$16 sps:$4 sm:$0xff]  }
 0x169   :  { %2868 = vmatmul.mubr.bf16.gmra.mrb[24].mxu0 %v7232_v21  ;;  %3447 = vmatmul.mubr.bf16.gmra.mrb[56].mxu1 %v7076_v12  ;;  %v137_v46 = vld [vmem:[#allocation2 + $0x250] sm:$0xff] }
 0x16a   :  { %2877 = vmatprep.mubr.bf16.mxu0 %v7236_v37  ;;  %3456 = vmatprep.mubr.bf16.mxu1 %v7078_v6 }
 0x16b   :  { %3572 = vmatpush1.bf16.msra.mxu1 %v6259_v57  ;;  %2992 = vmatprep.subr.bf16.mxu0 %v6276_v16  ;;  %v6277_v57 = vld [vmem:[#allocation5 + $0x5c8] ss:$16 sps:$4 sm:$0xff]   ;;  %v6285_v16 = vld [vmem:[#allocation5 + $0x7c4] ss:$16 sps:$4 sm:$0xff]  }
 0x16c   :  { %v7244_v50 = vpop.f32.mrb[16].mxu1  ;;  %3573 = vmatprep.subr.bf16.mxu1 %v6270_v63  ;;  %2993 = vmatpush1.bf16.msra.mxu0 %v6274_v38  ;;  %v6283_v63 = vld [vmem:[#allocation5 + $0x7c0] ss:$16 sps:$4 sm:$0xff]  }
 0x16d   :  { %8117 = vst [vmem:[#allocation14_spill] sm:$0xff] %v7244_v50  ;;  %v7246_v27 = vpop.f32.mrb[17].mxu1  ;;  %2994 = vmatprep.subr.bf16.mxu0 %v6282_v34  ;;  %v6288_v50 = vld [vmem:[#allocation5 + $0x5ec] ss:$16 sps:$4 sm:$0xff]   ;;  %v141_v38 = vld [vmem:[#allocation2 + $0x270] sm:$0xff] }
 0x16e   :  { %8118 = vst [vmem:[#allocation15_spill] sm:$0xff] %v7246_v27  ;;  %v7250_v12 = vpop.f32.mrb[18].mxu1  ;;  %v6286_v34 = vld [vmem:[#allocation5 + $0x5e8] ss:$16 sps:$4 sm:$0xff]   ;;  %v7268_v27 = vcombine.high %v137_v46, %v141_v38 }
 0x16f   :  { %8119 = vst [vmem:[#allocation16_spill] sm:$0xff] %v7250_v12  ;;  %v7254_v6 = vpop.f32.mrb[19].mxu1  ;;  %3574 = vmatpush1.bf16.msra.mxu1 %v6268_v45  ;;  %v7264_v12 = vcombine.low %v129_v29, %v133_v36  ;;  %v145_v29 = vld [vmem:[#allocation2 + $0x290] sm:$0xff] }
 0x170   :  { %8120 = vst [vmem:[#allocation17_spill] sm:$0xff] %v7254_v6  ;;  %3575 = vmatprep.subr.bf16.mxu1 %v6279_v13  ;;  %2995 = vmatpush1.bf16.msra.mxu0 %v6280_v1  ;;  %v6289_v13 = vld [vmem:[#allocation5 + $0x7e0] ss:$16 sps:$4 sm:$0xff]   ;;  %v6294_v1 = vld [vmem:[#allocation5 + $0x60c] ss:$16 sps:$4 sm:$0xff]  }
 0x171   :  { %2878 = vmatmul.mubr.bf16.gmra.mrb[28].mxu0 %v7248_v47  ;;  %3457 = vmatmul.mubr.bf16.gmra.mrb[60].mxu1 %v7084_v33  ;;  %v149_v36 = vld [vmem:[#allocation2 + $0x2b0] sm:$0xff] }
 0x172   :  { %2887 = vmatprep.mubr.bf16.mxu0 %v7252_v54  ;;  %3466 = vmatprep.mubr.bf16.mxu1 %v7086_v43 }
 0x173   :  { %3576 = vmatpush1.bf16.msra.mxu1 %v6277_v57  ;;  %2996 = vmatprep.subr.bf16.mxu0 %v6285_v16  ;;  %v7280_v16 = vcombine.low %v137_v46, %v141_v38  ;;  %v7296_v38 = vcombine.low %v145_v29, %v149_v36 }
 0x174   :  { %v7260_v45 = vpop.f32.mrb[20].mxu1  ;;  %3577 = vmatprep.subr.bf16.mxu1 %v6288_v50  ;;  %2997 = vmatpush1.bf16.msra.mxu0 %v6283_v63 }
 0x175   :  { %v7262_v6 = vpop.f32.mrb[21].mxu1  ;;  %2998 = vmatprep.subr.bf16.mxu0 %v6291_v9  ;;  %v7284_v9 = vcombine.high %v145_v29, %v149_v36  ;;  %v169_v36 = vld [vmem:[#allocation2 + $0x350] sm:$0xff] }
 0x176   :  { %v7266_v33 = vpop.f32.mrb[22].mxu1 }
 0x177   :  { %v7270_v43 = vpop.f32.mrb[23].mxu1  ;;  %3578 = vmatpush1.bf16.msra.mxu1 %v6286_v34 }
 0x178   :  { %2999 = vmatpush1.bf16.msra.mxu0 %v6289_v13  ;;  %3740 = vmatprep.subr.bf16.mxu1 %v6294_v1 }
 0x179   :  { %2888 = vmatmul.mubr.bf16.gmra.mrb[32].mxu0 %v7264_v12  ;;  %3467 = vmatmul.mubr.bf16.gmra.mrb[64].mxu1 %v7092_v55  ;;  %v153_v55 = vld [vmem:[#allocation2 + $0x2d0] sm:$0xff] }
 0x17a   :  { %2897 = vmatprep.mubr.bf16.mxu0 %v7268_v27  ;;  %3476 = vmatprep.mubr.bf16.mxu1 %v7094_v58  ;;  %v157_v58 = vld [vmem:[#allocation2 + $0x2f0] sm:$0xff] }
 0x17c   :  { %v7276_v50 = vpop.f32.mrb[24].mxu1 }
 0x17d   :  { %8121 = vst [vmem:[#allocation18_spill] sm:$0xff] %v7276_v50  ;;  %v7278_v57 = vpop.f32.mrb[25].mxu1  ;;  %v6303_v50 = vld [vmem:[#allocation5 + $0x66c] ss:$16 sps:$4 sm:$0xff]  }
 0x17e   :  { %8122 = vst [vmem:[#allocation19_spill] sm:$0xff] %v7278_v57  ;;  %v7282_v63 = vpop.f32.mrb[26].mxu1  ;;  %v6298_v57 = vld [vmem:[#allocation5 + $0x648] ss:$16 sps:$4 sm:$0xff]  }
 0x17f   :  { %8123 = vst [vmem:[#allocation20_spill] sm:$0xff] %v7282_v63  ;;  %v7286_v34 = vpop.f32.mrb[27].mxu1  ;;  %v7300_v63 = vcombine.high %v153_v55, %v157_v58 }
 0x180   :  { %8124 = vst [vmem:[#allocation21_spill] sm:$0xff] %v7286_v34 }
 0x181   :  { %2898 = vmatmul.mubr.bf16.gmra.mrb[36].mxu0 %v7280_v16  ;;  %3477 = vmatmul.mubr.bf16.gmra.mrb[68].mxu1 %v7100_v2  ;;  %v161_v2 = vld [vmem:[#allocation2 + $0x310] sm:$0xff] }
 0x182   :  { %2907 = vmatprep.mubr.bf16.mxu0 %v7284_v9  ;;  %3486 = vmatprep.mubr.bf16.mxu1 %v7102_v56  ;;  %v165_v56 = vld [vmem:[#allocation2 + $0x330] sm:$0xff] }
 0x183   :  { %v7310_v29 = vcombine.high %v161_v2, %v165_v56 }
 0x184   :  { %v7292_v13 = vpop.f32.mrb[28].mxu1 }
 0x185   :  { %8125 = vst [vmem:[#allocation22_spill] sm:$0xff] %v7292_v13  ;;  %v7294_v46 = vpop.f32.mrb[29].mxu1  ;;  %v7308_v13 = vcombine.low %v153_v55, %v157_v58 }
 0x186   :  { %8126 = vst [vmem:[#allocation23_spill] sm:$0xff] %v7294_v46  ;;  %v7298_v1 = vpop.f32.mrb[30].mxu1  ;;  %v6297_v46 = vld [vmem:[#allocation5 + $0x62c] ss:$16 sps:$4 sm:$0xff]  }
 0x187   :  { %8127 = vst [vmem:[#allocation24_spill] sm:$0xff] %v7298_v1  ;;  %v7302_v34 = vpop.f32.mrb[31].mxu1 }
 0x188   :  { %8128 = vst [vmem:[#allocation25_spill] sm:$0xff] %v7302_v34  ;;  %v7316_v34 = vcombine.low %v161_v2, %v165_v56 }
 0x189   :  { %2908 = vmatmul.mubr.bf16.gmra.mrb[40].mxu0 %v7296_v38  ;;  %3487 = vmatmul.mubr.bf16.gmra.mrb[72].mxu1 %v7108_v0  ;;  %v173_v0 = vld [vmem:[#allocation2 + $0x370] sm:$0xff] }
 0x18a   :  { %2917 = vmatprep.mubr.bf16.mxu0 %v7300_v63  ;;  %3496 = vmatprep.mubr.bf16.mxu1 %v7110_v51  ;;  %v7318_v1 = vcombine.high %v169_v36, %v173_v0  ;;  %v177_v51 = vld [vmem:[#allocation2 + $0x390] sm:$0xff]  ;;  %v7324_v55 = vcombine.low %v169_v36, %v173_v0 }
 0x191   :  { %2918 = vmatmul.mubr.bf16.gmra.mrb[44].mxu0 %v7308_v13  ;;  %3497 = vmatmul.mubr.bf16.gmra.mrb[76].mxu1 %v7116_v4  ;;  %v181_v4 = vld [vmem:[#allocation2 + $0x3b0] sm:$0xff] }
 0x192   :  { %2927 = vmatprep.mubr.bf16.mxu0 %v7310_v29  ;;  %3506 = vmatprep.mubr.bf16.mxu1 %v7118_v5  ;;  %v7326_v58 = vcombine.high %v177_v51, %v181_v4  ;;  %v185_v5 = vld [vmem:[#allocation2 + $0x3d0] sm:$0xff]  ;;  %v7332_v2 = vcombine.low %v177_v51, %v181_v4  ;;  %v6292_v4 = vld [vmem:[#allocation5 + $0x608] ss:$16 sps:$4 sm:$0xff]  }
 0x199   :  { %2928 = vmatmul.mubr.bf16.gmra.mrb[48].mxu0 %v7316_v34  ;;  %3507 = vmatmul.mubr.bf16.gmra.mrb[80].mxu1 %v7124_v17  ;;  %v189_v17 = vld [vmem:[#allocation2 + $0x3f0] sm:$0xff] }
 0x19a   :  { %2937 = vmatprep.mubr.bf16.mxu0 %v7318_v1  ;;  %3516 = vmatprep.mubr.bf16.mxu1 %v7126_v18  ;;  %v7334_v56 = vcombine.high %v185_v5, %v189_v17  ;;  %v66_v18 = vld [vmem:[#allocation2 + $0x18] sm:$0xff]  ;;  %v7340_v36 = vcombine.low %v185_v5, %v189_v17 }
 0x19b   :  { %v86_v5 = vld [vmem:[#allocation2 + $0xb8] sm:$0xff] }
 0x19c   :  { %v6300_v17 = vld [vmem:[#allocation5 + $0x64c] ss:$16 sps:$4 sm:$0xff]  }
 0x1a1   :  { %2938 = vmatmul.mubr.bf16.gmra.mrb[52].mxu0 %v7324_v55  ;;  %3517 = vmatmul.mubr.bf16.gmra.mrb[84].mxu1 %v7132_v22  ;;  %v70_v22 = vld [vmem:[#allocation2 + $0x38] sm:$0xff] }
 0x1a2   :  { %2947 = vmatprep.mubr.bf16.mxu0 %v7326_v58  ;;  %3526 = vmatprep.mubr.bf16.mxu1 %v7134_v20  ;;  %v7342_v0 = vcombine.high %v66_v18, %v70_v22  ;;  %v74_v20 = vld [vmem:[#allocation2 + $0x58] sm:$0xff]  ;;  %v7348_v51 = vcombine.low %v66_v18, %v70_v22 }
 0x1a9   :  { %2948 = vmatmul.mubr.bf16.gmra.mrb[56].mxu0 %v7332_v2  ;;  %3527 = vmatmul.mubr.bf16.gmra.mrb[88].mxu1 %v7140_v14  ;;  %v78_v14 = vld [vmem:[#allocation2 + $0x78] sm:$0xff] }
 0x1aa   :  { %2957 = vmatprep.mubr.bf16.mxu0 %v7334_v56  ;;  %3536 = vmatprep.mubr.bf16.mxu1 %v7142_v23  ;;  %v7350_v23 = vcombine.high %v74_v20, %v78_v14  ;;  %v7356_v18 = vcombine.low %v74_v20, %v78_v14  ;;  %v6306_v20 = vld [vmem:[#allocation5 + $0x68c] ss:$16 sps:$4 sm:$0xff]  }
 0x1b1   :  { %2958 = vmatmul.mubr.bf16.gmra.mrb[60].mxu0 %v7340_v36  ;;  %3537 = vmatmul.mubr.bf16.gmra.mrb[92].mxu1 %v7148_v24  ;;  %v6295_v24 = vld [vmem:[#allocation5 + $0x628] ss:$16 sps:$4 sm:$0xff]  }
 0x1b2   :  { %3000 = vmatprep.mubr.bf16.mxu0 %v7342_v0  ;;  %3579 = vmatprep.mubr.bf16.mxu1 %v7150_v25  ;;  %v82_v25 = vld [vmem:[#allocation2 + $0x98] sm:$0xff] }
 0x1b3   :  { %v7358_v22 = vcombine.high %v82_v25, %v86_v5  ;;  %v7364_v14 = vcombine.low %v82_v25, %v86_v5 }
 0x1b9   :  { %3001 = vmatmul.mubr.bf16.vlgmr.msra.gmra.mrb[0].mxu0 %v7348_v51  ;;  %3580 = vmatmul.mubr.bf16.vlgmr.msra.gmra.mrb[32].mxu1 %v7156_v15  ;;  %v90_v15 = vld [vmem:[#allocation2 + $0xd8] sm:$0xff] }
 0x1ba   :  { %3741 = vmatpush1.bf16.msra.mxu1 %v6292_v4  ;;  %3010 = vmatprep.mubr.bf16.mxu0 %v7350_v23 }
 0x1bb   :  { %3589 = vmatprep.mubr.bf16.mxu1 %v7158_v39  ;;  %3742 = vmatprep.subr.bf16.mxu1 %v6297_v46  ;;  %v94_v39 = vld [vmem:[#allocation2 + $0xf8] sm:$0xff] }
 0x1bc   :  { %v6301_v46 = vld [vmem:[#allocation5 + $0x668] ss:$16 sps:$4 sm:$0xff]   ;;  %v7366_v4 = vcombine.high %v90_v15, %v94_v39  ;;  %v7372_v25 = vcombine.low %v90_v15, %v94_v39  ;;  %v6318_v15 = vld [vmem:[#allocation5 + $0x70c] ss:$16 sps:$4 sm:$0xff]  }
 0x1be   :  { %3743 = vmatpush1.bf16.msra.mxu1 %v6295_v24  ;;  %v6304_v24 = vld [vmem:[#allocation5 + $0x688] ss:$16 sps:$4 sm:$0xff]  }
 0x1bf   :  { %3744 = vmatprep.subr.bf16.mxu1 %v6300_v17  ;;  %v6309_v17 = vld [vmem:[#allocation5 + $0x6ac] ss:$16 sps:$4 sm:$0xff]  }
 0x1c1   :  { %3011 = vmatmul.mubr.bf16.gmra.mrb[4].mxu0 %v7356_v18  ;;  %3590 = vmatmul.mubr.bf16.gmra.mrb[36].mxu1 %v7164_v41  ;;  %v98_v41 = vld [vmem:[#allocation2 + $0x118] sm:$0xff] }
 0x1c2   :  { %3020 = vmatprep.mubr.bf16.mxu0 %v7358_v22  ;;  %3599 = vmatprep.mubr.bf16.mxu1 %v7166_v42  ;;  %v102_v42 = vld [vmem:[#allocation2 + $0x138] sm:$0xff] }
 0x1c3   :  { %3745 = vmatpush1.bf16.msra.mxu1 %v6298_v57  ;;  %v6312_v57 = vld [vmem:[#allocation5 + $0x6cc] ss:$16 sps:$4 sm:$0xff]   ;;  %v7374_v5 = vcombine.high %v98_v41, %v102_v42  ;;  %v7380_v39 = vcombine.low %v98_v41, %v102_v42 }
 0x1c4   :  { %3746 = vmatprep.subr.bf16.mxu1 %v6303_v50  ;;  %v6307_v50 = vld [vmem:[#allocation5 + $0x6a8] ss:$16 sps:$4 sm:$0xff]   ;;  %v6324_v41 = vld [vmem:[#allocation5 + $0x74c] ss:$16 sps:$4 sm:$0xff]  }
 0x1c7   :  { %3747 = vmatpush1.bf16.msra.mxu1 %v6301_v46  ;;  %v6310_v46 = vld [vmem:[#allocation5 + $0x6c8] ss:$16 sps:$4 sm:$0xff]  }
 0x1c8   :  { %3748 = vmatprep.subr.bf16.mxu1 %v6306_v20  ;;  %v6315_v20 = vld [vmem:[#allocation5 + $0x6ec] ss:$16 sps:$4 sm:$0xff]  }
 0x1c9   :  { %3021 = vmatmul.mubr.bf16.gmra.mrb[8].mxu0 %v7364_v14  ;;  %3600 = vmatmul.mubr.bf16.gmra.mrb[40].mxu1 %v7172_v60  ;;  %v106_v60 = vld [vmem:[#allocation2 + $0x158] sm:$0xff] }
 0x1ca   :  { %3030 = vmatprep.mubr.bf16.mxu0 %v7366_v4  ;;  %3609 = vmatprep.mubr.bf16.mxu1 %v7174_v3  ;;  %v110_v3 = vld [vmem:[#allocation2 + $0x178] sm:$0xff] }
 0x1cb   :  { %3749 = vmatpush1.bf16.msra.mxu1 %v6304_v24  ;;  %v6313_v24 = vld [vmem:[#allocation5 + $0x6e8] ss:$16 sps:$4 sm:$0xff]   ;;  %v7388_v42 = vcombine.low %v106_v60, %v110_v3 }
 0x1cc   :  { %3750 = vmatprep.subr.bf16.mxu1 %v6309_v17  ;;  %v7382_v17 = vcombine.high %v106_v60, %v110_v3  ;;  %v6330_v60 = vld [vmem:[#allocation5 + $0x78c] ss:$16 sps:$4 sm:$0xff]  }
 0x1cf   :  { %3751 = vmatpush1.bf16.msra.mxu1 %v6307_v50  ;;  %v6316_v50 = vld [vmem:[#allocation5 + $0x708] ss:$16 sps:$4 sm:$0xff]  }
 0x1d0   :  { %3752 = vmatprep.subr.bf16.mxu1 %v6312_v57  ;;  %v6321_v57 = vld [vmem:[#allocation5 + $0x72c] ss:$16 sps:$4 sm:$0xff]  }
 0x1d1   :  { %3031 = vmatmul.mubr.bf16.gmra.mrb[12].mxu0 %v7372_v25  ;;  %3610 = vmatmul.mubr.bf16.gmra.mrb[44].mxu1 %v7184_v30  ;;  %v114_v30 = vld [vmem:[#allocation2 + $0x198] sm:$0xff] }
 0x1d2   :  { %3040 = vmatprep.mubr.bf16.mxu0 %v7374_v5  ;;  %3619 = vmatprep.mubr.bf16.mxu1 %v7188_v35  ;;  %v118_v35 = vld [vmem:[#allocation2 + $0x1b8] sm:$0xff] }
 0x1d3   :  { %3753 = vmatpush1.bf16.msra.mxu1 %v6310_v46  ;;  %v6319_v46 = vld [vmem:[#allocation5 + $0x728] ss:$16 sps:$4 sm:$0xff]   ;;  %v7396_v3 = vcombine.low %v114_v30, %v118_v35 }
 0x1d4   :  { %3754 = vmatprep.subr.bf16.mxu1 %v6315_v20  ;;  %v7390_v20 = vcombine.high %v114_v30, %v118_v35  ;;  %v6336_v30 = vld [vmem:[#allocation5 + $0x7cc] ss:$16 sps:$4 sm:$0xff]  }
 0x1d7   :  { %3755 = vmatpush1.bf16.msra.mxu1 %v6313_v24  ;;  %v6322_v24 = vld [vmem:[#allocation5 + $0x748] ss:$16 sps:$4 sm:$0xff]  }
 0x1d8   :  { %3756 = vmatprep.subr.bf16.mxu1 %v6318_v15  ;;  %v6327_v15 = vld [vmem:[#allocation5 + $0x76c] ss:$16 sps:$4 sm:$0xff]  }
 0x1d9   :  { %3041 = vmatmul.mubr.bf16.gmra.mrb[16].mxu0 %v7380_v39  ;;  %3620 = vmatmul.mubr.bf16.gmra.mrb[48].mxu1 %v7200_v61  ;;  %v122_v61 = vld [vmem:[#allocation2 + $0x1d8] sm:$0xff] }
 0x1da   :  { %3050 = vmatprep.mubr.bf16.mxu0 %v7382_v17  ;;  %3629 = vmatprep.mubr.bf16.mxu1 %v7204_v44  ;;  %v126_v44 = vld [vmem:[#allocation2 + $0x1f8] sm:$0xff] }
 0x1db   :  { %3757 = vmatpush1.bf16.msra.mxu1 %v6316_v50  ;;  %v6325_v50 = vld [vmem:[#allocation5 + $0x768] ss:$16 sps:$4 sm:$0xff]   ;;  %v7404_v35 = vcombine.low %v122_v61, %v126_v44 }
 0x1dc   :  { %3758 = vmatprep.subr.bf16.mxu1 %v6321_v57  ;;  %v7398_v57 = vcombine.high %v122_v61, %v126_v44 }
 0x1df   :  { %3759 = vmatpush1.bf16.msra.mxu1 %v6319_v46  ;;  %v6328_v46 = vld [vmem:[#allocation5 + $0x788] ss:$16 sps:$4 sm:$0xff]  }
 0x1e0   :  { %3760 = vmatprep.subr.bf16.mxu1 %v6324_v41  ;;  %v6333_v41 = vld [vmem:[#allocation5 + $0x7ac] ss:$16 sps:$4 sm:$0xff]  }
 0x1e1   :  { %3051 = vmatmul.mubr.bf16.gmra.mrb[20].mxu0 %v7388_v42  ;;  %3630 = vmatmul.mubr.bf16.gmra.mrb[52].mxu1 %v7216_v40  ;;  %v130_v40 = vld [vmem:[#allocation2 + $0x218] sm:$0xff] }
 0x1e2   :  { %3060 = vmatprep.mubr.bf16.mxu0 %v7390_v20  ;;  %3639 = vmatprep.mubr.bf16.mxu1 %v7220_v49  ;;  %v134_v49 = vld [vmem:[#allocation2 + $0x238] sm:$0xff] }
 0x1e3   :  { %3761 = vmatpush1.bf16.msra.mxu1 %v6322_v24  ;;  %v6331_v24 = vld [vmem:[#allocation5 + $0x7a8] ss:$16 sps:$4 sm:$0xff]   ;;  %v7412_v61 = vcombine.low %v130_v40, %v134_v49 }
 0x1e4   :  { %3762 = vmatprep.subr.bf16.mxu1 %v6327_v15  ;;  %v7406_v15 = vcombine.high %v130_v40, %v134_v49  ;;  %v154_v40 = vld [vmem:[#allocation2 + $0x2d8] sm:$0xff] }
 0x1e7   :  { %3763 = vmatpush1.bf16.msra.mxu1 %v6325_v50  ;;  %v6334_v50 = vld [vmem:[#allocation5 + $0x7c8] ss:$16 sps:$4 sm:$0xff]  }
 0x1e8   :  { %3764 = vmatprep.subr.bf16.mxu1 %v6330_v60  ;;  %v6339_v60 = vld [vmem:[#allocation5 + $0x7ec] ss:$16 sps:$4 sm:$0xff]  }
 0x1e9   :  { %3061 = vmatmul.mubr.bf16.gmra.mrb[24].mxu0 %v7396_v3  ;;  %3640 = vmatmul.mubr.bf16.gmra.mrb[56].mxu1 %v7232_v21  ;;  %v138_v21 = vld [vmem:[#allocation2 + $0x258] sm:$0xff] }
 0x1ea   :  { %3070 = vmatprep.mubr.bf16.mxu0 %v7398_v57  ;;  %3649 = vmatprep.mubr.bf16.mxu1 %v7236_v37  ;;  %v142_v37 = vld [vmem:[#allocation2 + $0x278] sm:$0xff] }
 0x1eb   :  { %3765 = vmatpush1.bf16.msra.mxu1 %v6328_v46  ;;  %v6337_v46 = vld [vmem:[#allocation5 + $0x7e8] ss:$16 sps:$4 sm:$0xff]   ;;  %v7414_v44 = vcombine.high %v138_v21, %v142_v37 }
 0x1ec   :  { %3766 = vmatprep.subr.bf16.mxu1 %v6333_v41  ;;  %v7420_v41 = vcombine.low %v138_v21, %v142_v37 }
 0x1ef   :  { %3767 = vmatpush1.bf16.msra.mxu1 %v6331_v24 }
 0x1f0   :  { %3768 = vmatprep.subr.bf16.mxu1 %v6336_v30 }
 0x1f1   :  { %3071 = vmatmul.mubr.bf16.gmra.mrb[28].mxu0 %v7404_v35  ;;  %3650 = vmatmul.mubr.bf16.gmra.mrb[60].mxu1 %v7248_v47  ;;  %v146_v47 = vld [vmem:[#allocation2 + $0x298] sm:$0xff] }
 0x1f2   :  { %3080 = vmatprep.mubr.bf16.mxu0 %v7406_v15  ;;  %3659 = vmatprep.mubr.bf16.mxu1 %v7252_v54  ;;  %v150_v54 = vld [vmem:[#allocation2 + $0x2b8] sm:$0xff] }
 0x1f3   :  { %3769 = vmatpush1.bf16.msra.mxu1 %v6334_v50  ;;  %v7422_v24 = vcombine.high %v146_v47, %v150_v54  ;;  %v7428_v49 = vcombine.low %v146_v47, %v150_v54 }
 0x1f4   :  { %3770 = vmatprep.subr.bf16.mxu1 %v6339_v60 }
 0x1f7   :  { %3771 = vmatpush1.bf16.msra.mxu1 %v6337_v46 }
 0x1f9   :  { %3081 = vmatmul.mubr.bf16.gmra.mrb[32].mxu0 %v7412_v61  ;;  %3660 = vmatmul.mubr.bf16.gmra.mrb[64].mxu1 %v7264_v12  ;;  %v158_v12 = vld [vmem:[#allocation2 + $0x2f8] sm:$0xff] }
 0x1fa   :  { %3090 = vmatprep.mubr.bf16.mxu0 %v7414_v44  ;;  %3669 = vmatprep.mubr.bf16.mxu1 %v7268_v27  ;;  %v7430_v30 = vcombine.high %v154_v40, %v158_v12  ;;  %v162_v27 = vld [vmem:[#allocation2 + $0x318] sm:$0xff]  ;;  %v7436_v50 = vcombine.low %v154_v40, %v158_v12 }
 0x201   :  { %3091 = vmatmul.mubr.bf16.gmra.mrb[36].mxu0 %v7420_v41  ;;  %3670 = vmatmul.mubr.bf16.gmra.mrb[68].mxu1 %v7280_v16  ;;  %v166_v16 = vld [vmem:[#allocation2 + $0x338] sm:$0xff] }
 0x202   :  { %3100 = vmatprep.mubr.bf16.mxu0 %v7422_v24  ;;  %3679 = vmatprep.mubr.bf16.mxu1 %v7284_v9  ;;  %v7438_v60 = vcombine.high %v162_v27, %v166_v16  ;;  %v170_v9 = vld [vmem:[#allocation2 + $0x358] sm:$0xff]  ;;  %v7444_v21 = vcombine.low %v162_v27, %v166_v16 }
 0x209   :  { %3101 = vmatmul.mubr.bf16.gmra.mrb[40].mxu0 %v7428_v49  ;;  %3680 = vmatmul.mubr.bf16.gmra.mrb[72].mxu1 %v7296_v38  ;;  %v174_v38 = vld [vmem:[#allocation2 + $0x378] sm:$0xff] }
 0x20a   :  { %3110 = vmatprep.mubr.bf16.mxu0 %v7430_v30  ;;  %3689 = vmatprep.mubr.bf16.mxu1 %v7300_v63  ;;  %v7446_v37 = vcombine.high %v170_v9, %v174_v38  ;;  %v178_v63 = vld [vmem:[#allocation2 + $0x398] sm:$0xff]  ;;  %v7452_v46 = vcombine.low %v170_v9, %v174_v38 }
 0x20b   :  { %v6355_v9 = vld [vmem:[#allocation7 + $0x38] sm:$0xff]  }
 0x211   :  { %3111 = vmatmul.mubr.bf16.gmra.mrb[44].mxu0 %v7436_v50  ;;  %3690 = vmatmul.mubr.bf16.gmra.mrb[76].mxu1 %v7308_v13  ;;  %v182_v13 = vld [vmem:[#allocation2 + $0x3b8] sm:$0xff] }
 0x212   :  { %3120 = vmatprep.mubr.bf16.mxu0 %v7438_v60  ;;  %3699 = vmatprep.mubr.bf16.mxu1 %v7310_v29  ;;  %v7454_v47 = vcombine.high %v178_v63, %v182_v13  ;;  %v186_v29 = vld [vmem:[#allocation2 + $0x3d8] sm:$0xff]  ;;  %v7460_v54 = vcombine.low %v178_v63, %v182_v13 }
 0x219   :  { %3121 = vmatmul.mubr.bf16.gmra.mrb[48].mxu0 %v7444_v21  ;;  %3700 = vmatmul.mubr.bf16.gmra.mrb[80].mxu1 %v7316_v34  ;;  %v190_v34 = vld [vmem:[#allocation2 + $0x3f8] sm:$0xff] }
 0x21a   :  { %3130 = vmatprep.mubr.bf16.mxu0 %v7446_v37  ;;  %3709 = vmatprep.mubr.bf16.mxu1 %v7318_v1  ;;  %v7462_v40 = vcombine.high %v186_v29, %v190_v34  ;;  %v7468_v1 = vcombine.low %v186_v29, %v190_v34 }
 0x221   :  { %3131 = vmatmul.mubr.bf16.gmra.mrb[52].mxu0 %v7452_v46  ;;  %3710 = vmatmul.mubr.bf16.gmra.mrb[84].mxu1 %v7324_v55  ;;  %v6340_v55 = vld [vmem:[#allocation7 + $0x40] sm:$0xff]  }
 0x222   :  { %3140 = vmatprep.mubr.bf16.mxu0 %v7454_v47  ;;  %3719 = vmatprep.mubr.bf16.mxu1 %v7326_v58  ;;  %v6341_v58 = vld [vmem:[#allocation7] sm:$0xff]  }
 0x223   :  { %5288 = vmatprep.subr.bf16.mxu0 %v6340_v55 }
 0x224   :  { %5289 = vmatpush3.bf16.msra.mxu0 %v6341_v58  ;;  %v7566_v58 = vld [vmem:[%s8107_s2] sm:$0xf] }
 0x225   :  { %8130 = vst [vmem:[#allocation27_spill] sm:$0xff] %v7566_v58 }
 0x229   :  { %3141 = vmatmul.mubr.bf16.gmra.mrb[56].mxu0 %v7460_v54  ;;  %3720 = vmatmul.mubr.bf16.gmra.mrb[88].mxu1 %v7332_v2  ;;  %v6342_v2 = vld [vmem:[#allocation7 + $0x48] sm:$0xff]  }
 0x22a   :  { %3150 = vmatprep.mubr.bf16.mxu0 %v7462_v40  ;;  %3729 = vmatprep.mubr.bf16.mxu1 %v7334_v56  ;;  %v6343_v56 = vld [vmem:[#allocation7 + $0x8] sm:$0xff]  }
 0x22b   :  { %5290 = vmatprep.subr.bf16.mxu0 %v6342_v2 }
 0x22c   :  { %5291 = vmatpush3.bf16.msra.mxu0 %v6343_v56 }
 0x231   :  { %3151 = vmatmul.mubr.bf16.gmra.mrb[60].mxu0 %v7468_v1  ;;  %3730 = vmatmul.mubr.bf16.gmra.mrb[92].mxu1 %v7340_v36  ;;  %v6344_v36 = vld [vmem:[#allocation7 + $0x50] sm:$0xff]  }
 0x232   :  { %3772 = vmatprep.mubr.bf16.mxu1 %v7342_v0  ;;  %v6345_v0 = vld [vmem:[#allocation7 + $0x10] sm:$0xff]   ;;  %5292 = vmatprep.subr.bf16.mxu0 %v6344_v36 }
 0x233   :  { %5293 = vmatpush3.bf16.msra.mxu0 %v6345_v0 }
 0x239   :  { %3773 = vmatmul.mubr.bf16.vlgmr.msra.gmra.mrb[32].mxu1 %v7348_v51  ;;  %v6346_v51 = vld [vmem:[#allocation7 + $0x58] sm:$0xff]  }
 0x23a   :  { %3782 = vmatprep.mubr.bf16.mxu1 %v7350_v23  ;;  %v6347_v23 = vld [vmem:[#allocation7 + $0x18] sm:$0xff]   ;;  %5294 = vmatprep.subr.bf16.mxu0 %v6346_v51 }
 0x23b   :  { %5295 = vmatpush3.bf16.msra.mxu0 %v6347_v23 }
 0x241   :  { %3783 = vmatmul.mubr.bf16.gmra.mrb[36].mxu1 %v7356_v18  ;;  %v6348_v18 = vld [vmem:[#allocation7 + $0x60] sm:$0xff]  }
 0x242   :  { %3792 = vmatprep.mubr.bf16.mxu1 %v7358_v22  ;;  %v6349_v22 = vld [vmem:[#allocation7 + $0x20] sm:$0xff]   ;;  %5296 = vmatprep.subr.bf16.mxu0 %v6348_v18 }
 0x243   :  { %5297 = vmatpush3.bf16.msra.mxu0 %v6349_v22 }
 0x249   :  { %3793 = vmatmul.mubr.bf16.gmra.mrb[40].mxu1 %v7364_v14  ;;  %v6350_v14 = vld [vmem:[#allocation7 + $0x68] sm:$0xff]  }
 0x24a   :  { %3802 = vmatprep.mubr.bf16.mxu1 %v7366_v4  ;;  %v6351_v4 = vld [vmem:[#allocation7 + $0x28] sm:$0xff]   ;;  %5298 = vmatprep.subr.bf16.mxu0 %v6350_v14 }
 0x24b   :  { %5299 = vmatpush3.bf16.msra.mxu0 %v6351_v4 }
 0x251   :  { %3803 = vmatmul.mubr.bf16.gmra.mrb[44].mxu1 %v7372_v25 }
 0x252   :  { %3812 = vmatprep.mubr.bf16.mxu1 %v7374_v5 }
 0x259   :  { %3813 = vmatmul.mubr.bf16.gmra.mrb[48].mxu1 %v7380_v39 }
 0x25a   :  { %3822 = vmatprep.mubr.bf16.mxu1 %v7382_v17 }
 0x261   :  { %3823 = vmatmul.mubr.bf16.gmra.mrb[52].mxu1 %v7388_v42 }
 0x262   :  { %3832 = vmatprep.mubr.bf16.mxu1 %v7390_v20 }
 0x269   :  { %3833 = vmatmul.mubr.bf16.gmra.mrb[56].mxu1 %v7396_v3 }
 0x26a   :  { %3842 = vmatprep.mubr.bf16.mxu1 %v7398_v57 }
 0x271   :  { %3843 = vmatmul.mubr.bf16.gmra.mrb[60].mxu1 %v7404_v35 }
 0x272   :  { %3852 = vmatprep.mubr.bf16.mxu1 %v7406_v15 }
 0x279   :  { %3853 = vmatmul.mubr.bf16.gmra.mrb[64].mxu1 %v7412_v61 }
 0x27a   :  { %3862 = vmatprep.mubr.bf16.mxu1 %v7414_v44 }
 0x281   :  { %3863 = vmatmul.mubr.bf16.gmra.mrb[68].mxu1 %v7420_v41  ;;  %v6352_v41 = vld [vmem:[#allocation7 + $0x70] sm:$0xff]  }
 0x282   :  { %3872 = vmatprep.mubr.bf16.mxu1 %v7422_v24  ;;  %v6353_v24 = vld [vmem:[#allocation7 + $0x30] sm:$0xff]   ;;  %5300 = vmatprep.subr.bf16.mxu0 %v6352_v41 }
 0x283   :  { %5301 = vmatpush3.bf16.msra.mxu0 %v6353_v24 }
 0x289   :  { %3873 = vmatmul.mubr.bf16.gmra.mrb[72].mxu1 %v7428_v49 }
 0x28a   :  { %3882 = vmatprep.mubr.bf16.mxu1 %v7430_v30 }
 0x28c   :  { %v7495_v25 = vpop.f32.mrb[0].mxu0 }
 0x28d   :  { %v7497_v5 = vpop.f32.mrb[1].mxu0 }
 0x28e   :  { %v7499_v39 = vpop.f32.mrb[2].mxu0 }
 0x28f   :  { %v7501_v17 = vpop.f32.mrb[3].mxu0 }
 0x291   :  { %3883 = vmatmul.mubr.bf16.gmra.mrb[76].mxu1 %v7436_v50  ;;  %v6354_v50 = vld [vmem:[#allocation7 + $0x78] sm:$0xff]  }
 0x292   :  { %3892 = vmatprep.mubr.bf16.mxu1 %v7438_v60  ;;  %5302 = vmatprep.subr.bf16.mxu0 %v6354_v50 }
 0x293   :  { %5303 = vmatpush3.bf16.msra.mxu0 %v6355_v9 }
 0x294   :  { %v7505_v42 = vpop.f32.mrb[4].mxu0 }
 0x295   :  { %v7507_v20 = vpop.f32.mrb[5].mxu0 }
 0x296   :  { %v7509_v3 = vpop.f32.mrb[6].mxu0 }
 0x297   :  { %v7511_v57 = vpop.f32.mrb[7].mxu0 }
 0x299   :  { %3893 = vmatmul.mubr.bf16.gmra.mrb[80].mxu1 %v7444_v21 }
 0x29a   :  { %3902 = vmatprep.mubr.bf16.mxu1 %v7446_v37 }
 0x29c   :  { %v7515_v35 = vpop.f32.mrb[8].mxu0 }
 0x29d   :  { %v7517_v15 = vpop.f32.mrb[9].mxu0 }
 0x29e   :  { %v7519_v61 = vpop.f32.mrb[10].mxu0 }
 0x29f   :  { %v7521_v44 = vpop.f32.mrb[11].mxu0 }
 0x2a1   :  { %3903 = vmatmul.mubr.bf16.gmra.mrb[84].mxu1 %v7452_v46 }
 0x2a2   :  { %3912 = vmatprep.mubr.bf16.mxu1 %v7454_v47  ;;  %v449_v47 = vlaneseq }
 0x2a4   :  { %v7525_v12 = vpop.f32.mrb[12].mxu0 }
 0x2a5   :  { %v7527_v49 = vpop.f32.mrb[13].mxu0 }
 0x2a6   :  { %v7529_v30 = vpop.f32.mrb[14].mxu0 }
 0x2a7   :  { %v7531_v27 = vpop.f32.mrb[15].mxu0 }
 0x2a9   :  { %3913 = vmatmul.mubr.bf16.gmra.mrb[88].mxu1 %v7460_v54 }
 0x2aa   :  { %3922 = vmatprep.mubr.bf16.mxu1 %v7462_v40  ;;  %v7558_v40 = vshrl.u32 %v449_v47, 7 }
 0x2ac   :  { %v7535_v16 = vpop.f32.mrb[16].mxu0  ;;  %8129 = vst [vmem:[#allocation26_spill] sm:$0xff] %v7558_v40  ;;  %v455_v2 = vsub.s32 1, %v7558_v40 }
 0x2ad   :  { %v7537_v60 = vpop.f32.mrb[17].mxu0 }
 0x2ae   :  { %v7539_v38 = vpop.f32.mrb[18].mxu0  ;;  %v7581_v18 = vrot.slane %v7566_v58, %v455_v2 }
 0x2af   :  { %v7541_v21 = vpop.f32.mrb[19].mxu0 }
 0x2b0   :  { %v2506_v14 = vadd.f32 %v7182_v26, %v7581_v18  ;;  %v2510_v9 = vadd.f32 %v7190_v59, %v7581_v18 }
 0x2b1   :  { %3923 = vmatmul.mubr.bf16.gmra.mrb[92].mxu1 %v7468_v1  ;;  %v451_v1 = vsub.s32 0, %v7558_v40 }
 0x2b3   :  { %v7576_v51 = vrot.slane %v7566_v58, %v451_v1 }
 0x2b4   :  { %v7544_v37 = vpop.f32.mrb[20].mxu0 }
 0x2b5   :  { %v7546_v63 = vpop.f32.mrb[21].mxu0  ;;  %v2504_v22 = vadd.f32 %v7180_v7, %v7576_v51  ;;  %v2508_v41 = vadd.f32 %v7186_v53, %v7576_v51  ;;  %v2514_v26 = vadd.f32 %v7196_v52, %v7576_v51  ;;  %v2516_v53 = vadd.f32 %v7198_v19, %v7581_v18 }
 0x2b6   :  { %v7548_v13 = vpop.f32.mrb[22].mxu0  ;;  %v5432_v19 = vadd.f32 %v7495_v25, %v7576_v51 }
 0x2b7   :  { %v7550_v46 = vpop.f32.mrb[23].mxu0 }
 0x2b8   :  { %6356 = vtanh.f32 %v5432_v19  ;;  %v5441_v19 = vadd.f32 %v7517_v15, %v7581_v18  ;;  %v8132_v15 = vld [vmem:[#allocation13_spill] sm:$0xff] }
 0x2bc   :  { %v7552_v29 = vpop.f32.mrb[24].mxu0 }
 0x2bd   :  { %v7554_v34 = vpop.f32.mrb[25].mxu0 }
 0x2be   :  { %v7556_v54 = vpop.f32.mrb[26].mxu0 }
 0x2bf   :  { %v7560_v55 = vpop.f32.mrb[27].mxu0 }
 0x2c4   :  { %v7569_v56 = vpop.f32.mrb[28].mxu0 }
 0x2c5   :  { %v7571_v36 = vpop.f32.mrb[29].mxu0 }
 0x2c6   :  { %v7573_v0 = vpop.f32.mrb[30].mxu0 }
 0x2c7   :  { %v7578_v23 = vpop.f32.mrb[31].mxu0 }
 0x2cc   :  { %v3082_v4 = vpop.f32.mrb[32].mxu0 }
 0x2cd   :  { %v7589_v24 = vadd.f32 %v3082_v4, %v2504_v22  ;;  %v3084_v50 = vpop.f32.mrb[33].mxu0  ;;  %v2518_v4 = vadd.f32 %v7202_v8, %v7576_v51  ;;  %v2524_v8 = vadd.f32 %v7212_v48, %v7576_v51  ;;  %v2530_v48 = vadd.f32 %v7222_v28, %v7581_v18 }
 0x2ce   :  { %v7593_v47 = vadd.f32 %v3084_v50, %v2506_v14  ;;  %v3086_v1 = vpop.f32.mrb[34].mxu0  ;;  %v2520_v14 = vadd.f32 %v7206_v10, %v7581_v18  ;;  %v2526_v10 = vadd.f32 %v7214_v31, %v7581_v18  ;;  %v5436_v31 = vadd.f32 %v7505_v42, %v7576_v51 }
 0x2cf   :  { %v7595_v2 = vadd.f32 %v3086_v1, %v2508_v41  ;;  %v3088_v58 = vpop.f32.mrb[35].mxu0  ;;  %v5433_v1 = vadd.f32 %v7497_v5, %v7581_v18  ;;  %v5439_v28 = vadd.f32 %v7511_v57, %v7581_v18  ;;  %v5440_v42 = vadd.f32 %v7515_v35, %v7576_v51  ;;  %v8131_v57 = vld [vmem:[#allocation12_spill] sm:$0xff] }
 0x2d0   :  { %v7597_v7 = vadd.f32 %v3088_v58, %v2510_v9  ;;  %v5443_v35 = vadd.f32 %v7521_v44, %v7581_v18 }
 0x2d1   :  { %6358 = vtanh.f32 %v5433_v1 }
 0x2d4   :  { %v3092_v22 = vpop.f32.mrb[36].mxu0 }
 0x2d5   :  { %v7605_v40 = vadd.f32 %v3092_v22, %v2514_v26  ;;  %v3094_v59 = vpop.f32.mrb[37].mxu0  ;;  %v5434_v26 = vadd.f32 %v7499_v39, %v7576_v51  ;;  %v2528_v22 = vadd.f32 %v7218_v32, %v7576_v51  ;;  %v5437_v32 = vadd.f32 %v7507_v20, %v7581_v18 }
 0x2d6   :  { %v7609_v41 = vadd.f32 %v3094_v59, %v2516_v53  ;;  %v3096_v58 = vpop.f32.mrb[38].mxu0  ;;  %v2534_v20 = vadd.f32 %v7228_v62, %v7576_v51 }
 0x2d7   :  { %v7611_v50 = vadd.f32 %v3096_v58, %v2518_v4  ;;  %v3098_v9 = vpop.f32.mrb[39].mxu0  ;;  %v5435_v4 = vadd.f32 %v7501_v17, %v7581_v18  ;;  %6360 = vtanh.f32 %v5434_v26  ;;  %v5438_v58 = vadd.f32 %v7509_v3, %v7576_v51 }
 0x2d8   :  { %v7613_v52 = vadd.f32 %v3098_v9, %v2520_v14  ;;  %v2536_v3 = vadd.f32 %v7230_v11, %v7581_v18  ;;  %v5444_v11 = vadd.f32 %v7525_v12, %v7576_v51  ;;  %v5447_v12 = vadd.f32 %v7531_v27, %v7581_v18 }
 0x2d9   :  { %6362 = vtanh.f32 %v5435_v4  ;;  %v5445_v4 = vadd.f32 %v7527_v49, %v7581_v18  ;;  %v5448_v49 = vadd.f32 %v7535_v16, %v7576_v51 }
 0x2da   :  { %6364 = vtanh.f32 %v5436_v31  ;;  %v5446_v31 = vadd.f32 %v7529_v30, %v7576_v51  ;;  %v5449_v30 = vadd.f32 %v7537_v60, %v7581_v18 }
 0x2db   :  { %6366 = vtanh.f32 %v5437_v32 }
 0x2dc   :  { %v3102_v53 = vpop.f32.mrb[40].mxu0  ;;  %6368 = vtanh.f32 %v5438_v58 }
 0x2dd   :  { %v7629_v25 = vadd.f32 %v3102_v53, %v2524_v8  ;;  %v3104_v59 = vpop.f32.mrb[41].mxu0  ;;  %v5442_v8 = vadd.f32 %v7519_v61, %v7576_v51  ;;  %6370 = vtanh.f32 %v5439_v28  ;;  %v2540_v53 = vadd.f32 %v8132_v15, %v7581_v18  ;;  %v8133_v28 = vld [vmem:[#allocation14_spill] sm:$0xff]  ;;  %v8136_v15 = vld [vmem:[#allocation17_spill] sm:$0xff] }
 0x2de   :  { %v7635_v5 = vadd.f32 %v3104_v59, %v2526_v10  ;;  %v3106_v39 = vpop.f32.mrb[42].mxu0  ;;  %v2538_v10 = vadd.f32 %v8131_v57, %v7576_v51  ;;  %6372 = vtanh.f32 %v5440_v42  ;;  %v2544_v42 = vadd.f32 %v8133_v28, %v7576_v51 }
 0x2df   :  { %v7639_v14 = vadd.f32 %v3106_v39, %v2528_v22  ;;  %v3108_v17 = vpop.f32.mrb[43].mxu0  ;;  %6374 = vtanh.f32 %v5441_v19  ;;  %v8134_v19 = vld [vmem:[#allocation15_spill] sm:$0xff] }
 0x2e0   :  { %v7643_v9 = vadd.f32 %v3108_v17, %v2530_v48  ;;  %v7673_v48 = vpop.eup %6356  ;;  %6376 = vtanh.f32 %v5442_v8  ;;  %v2546_v27 = vadd.f32 %v8134_v19, %v7581_v18 }
 0x2e1   :  { %v7679_v32 = vpop.eup %6358  ;;  %6378 = vtanh.f32 %v5443_v35 }
 0x2e2   :  { %v7683_v17 = vpop.eup %6360  ;;  %6380 = vtanh.f32 %v5444_v11 }
 0x2e3   :  { %v7687_v58 = vpop.eup %6362  ;;  %6382 = vtanh.f32 %v5445_v4 }
 0x2e4   :  { %v3112_v1 = vpop.f32.mrb[44].mxu0  ;;  %6384 = vtanh.f32 %v5446_v31 }
 0x2e5   :  { %v7661_v62 = vadd.f32 %v3112_v1, %v2534_v20  ;;  %v3114_v26 = vpop.f32.mrb[45].mxu0  ;;  %v7693_v20 = vpop.eup %6364  ;;  %v8135_v1 = vld [vmem:[#allocation16_spill] sm:$0xff]  ;;  %6386 = vtanh.f32 %v5447_v12 }
 0x2e6   :  { %v7667_v22 = vadd.f32 %v3114_v26, %v2536_v3  ;;  %v3116_v61 = vpop.f32.mrb[46].mxu0  ;;  %v5450_v3 = vadd.f32 %v7539_v38, %v7576_v51  ;;  %v7699_v16 = vpop.eup %6366  ;;  %v2548_v57 = vadd.f32 %v8135_v1, %v7576_v51  ;;  %6388 = vtanh.f32 %v5448_v49 }
 0x2e7   :  { %v7671_v59 = vadd.f32 %v3116_v61, %v2538_v10  ;;  %v3118_v44 = vpop.f32.mrb[47].mxu0  ;;  %v5451_v10 = vadd.f32 %v7541_v21, %v7581_v18  ;;  %v7707_v26 = vpop.eup %6368  ;;  %v5452_v38 = vadd.f32 %v7544_v37, %v7576_v51  ;;  %6390 = vtanh.f32 %v5449_v30 }
 0x2e8   :  { %v7677_v39 = vadd.f32 %v3118_v44, %v2540_v53  ;;  %v2550_v53 = vadd.f32 %v8136_v15, %v7581_v18  ;;  %v7715_v4 = vpop.eup %6370  ;;  %v5453_v21 = vadd.f32 %v7546_v63, %v7581_v18  ;;  %6392 = vtanh.f32 %v5450_v3 }
 0x2e9   :  { %v7721_v12 = vpop.eup %6372  ;;  %v5454_v49 = vadd.f32 %v7548_v13, %v7576_v51  ;;  %6394 = vtanh.f32 %v5451_v10  ;;  %v5456_v63 = vadd.f32 %v7552_v29, %v7576_v51  ;;  %v5457_v13 = vadd.f32 %v7554_v34, %v7581_v18 }
 0x2ea   :  { %v7727_v37 = vpop.eup %6374  ;;  %6396 = vtanh.f32 %v5452_v38 }
 0x2eb   :  { %v7731_v30 = vpop.eup %6376  ;;  %6398 = vtanh.f32 %v5453_v21 }
 0x2ec   :  { %v3122_v8 = vpop.f32.mrb[48].mxu0  ;;  %v7735_v19 = vpop.eup %6378  ;;  %6400 = vtanh.f32 %v5454_v49  ;;  %v5463_v49 = vadd.f32 %v7578_v23, %v7581_v18  ;;  %v8139_v23 = vld [vmem:[#allocation20_spill] sm:$0xff] }
 0x2ed   :  { %v7705_v60 = vadd.f32 %v3122_v8, %v2544_v42  ;;  %v3124_v35 = vpop.f32.mrb[49].mxu0  ;;  %v5455_v42 = vadd.f32 %v7550_v46, %v7581_v18  ;;  %v7741_v3 = vpop.eup %6380  ;;  %v2556_v46 = vadd.f32 %v7262_v6, %v7581_v18  ;;  %v5458_v8 = vadd.f32 %v7556_v54, %v7576_v51 }
 0x2ee   :  { %v7713_v11 = vadd.f32 %v3124_v35, %v2546_v27  ;;  %v3126_v61 = vpop.f32.mrb[50].mxu0  ;;  %v2554_v27 = vadd.f32 %v7260_v45, %v7576_v51  ;;  %v7747_v29 = vpop.eup %6382  ;;  %v5459_v45 = vadd.f32 %v7560_v55, %v7581_v18  ;;  %v2560_v6 = vadd.f32 %v7270_v43, %v7581_v18 }
 0x2ef   :  { %v7719_v44 = vadd.f32 %v3126_v61, %v2548_v57  ;;  %v3128_v31 = vpop.f32.mrb[51].mxu0  ;;  %v2558_v57 = vadd.f32 %v7266_v33, %v7576_v51  ;;  %6402 = vtanh.f32 %v5455_v42  ;;  %v7755_v35 = vpop.eup %6384  ;;  %v5460_v54 = vadd.f32 %v7569_v56, %v7576_v51 }
 0x2f0   :  { %v7725_v28 = vadd.f32 %v3128_v31, %v2550_v53  ;;  %6404 = vtanh.f32 %v5456_v63  ;;  %v7763_v33 = vpop.eup %6386  ;;  %v5461_v55 = vadd.f32 %v7571_v36, %v7581_v18  ;;  %v5462_v43 = vadd.f32 %v7573_v0, %v7576_v51  ;;  %v8137_v63 = vld [vmem:[#allocation18_spill] sm:$0xff]  ;;  %v8138_v0 = vld [vmem:[#allocation19_spill] sm:$0xff] }
 0x2f1   :  { %6406 = vtanh.f32 %v5457_v13  ;;  %v7769_v21 = vpop.eup %6388 }
 0x2f2   :  { %6408 = vtanh.f32 %v5458_v8  ;;  %v7775_v56 = vpop.eup %6390 }
 0x2f3   :  { %6410 = vtanh.f32 %v5459_v45  ;;  %v7779_v42 = vpop.eup %6392 }
 0x2f4   :  { %v3132_v1 = vpop.f32.mrb[52].mxu0  ;;  %6412 = vtanh.f32 %v5460_v54  ;;  %v7781_v36 = vpop.eup %6394  ;;  %v8140_v54 = vld [vmem:[#allocation21_spill] sm:$0xff] }
 0x2f5   :  { %v7753_v34 = vadd.f32 %v3132_v1, %v2554_v27  ;;  %v3134_v10 = vpop.f32.mrb[53].mxu0  ;;  %v2564_v27 = vadd.f32 %v8137_v63, %v7576_v51  ;;  %6414 = vtanh.f32 %v5461_v55  ;;  %v7785_v13 = vpop.eup %6396 }
 0x2f6   :  { %v7761_v15 = vadd.f32 %v3134_v10, %v2556_v46  ;;  %v3136_v53 = vpop.f32.mrb[54].mxu0  ;;  %v2566_v46 = vadd.f32 %v8138_v0, %v7581_v18  ;;  %6416 = vtanh.f32 %v5462_v43  ;;  %v7789_v1 = vpop.eup %6398 }
 0x2f7   :  { %v7767_v38 = vadd.f32 %v3136_v53, %v2558_v57  ;;  %v3138_v61 = vpop.f32.mrb[55].mxu0  ;;  %v2568_v57 = vadd.f32 %v8139_v23, %v7576_v51  ;;  %6418 = vtanh.f32 %v5463_v49  ;;  %v2570_v53 = vadd.f32 %v8140_v54, %v7581_v18 }
 0x2f8   :  { %v7773_v31 = vadd.f32 %v3138_v61, %v2560_v6  ;;  %v7795_v6 = vpop.eup %6400  ;;  %6420 = vtanh.f32 %v7589_v24 }
 0x2f9   :  { %v7802_v43 = vpop.eup %6402  ;;  %6422 = vtanh.f32 %v7593_v47  ;;  %v8143_v47 = vld [vmem:[#allocation22_spill] sm:$0xff] }
 0x2fa   :  { %6424 = vtanh.f32 %v7595_v2  ;;  %v2574_v23 = vadd.f32 %v8143_v47, %v7576_v51  ;;  %v8145_v2 = vld [vmem:[#allocation23_spill] sm:$0xff]  ;;  %v8149_v47 = vld [vmem:[#allocation26_spill] sm:$0xff] }
 0x2fb   :  { %6426 = vtanh.f32 %v7597_v7 }
 0x2fc   :  { %v3142_v8 = vpop.f32.mrb[56].mxu0  ;;  %6428 = vtanh.f32 %v7605_v40 }
 0x2fd   :  { %v7793_v45 = vadd.f32 %v3142_v8, %v2564_v27  ;;  %v3144_v10 = vpop.f32.mrb[57].mxu0  ;;  %v7807_v27 = vpop.eup %6404  ;;  %6430 = vtanh.f32 %v7609_v41  ;;  %v459_v41 = vsub.s32 2, %v8149_v47 }
 0x2fe   :  { %v7800_v55 = vadd.f32 %v3144_v10, %v2566_v46  ;;  %v3146_v61 = vpop.f32.mrb[58].mxu0  ;;  %v7812_v8 = vpop.eup %6406  ;;  %v2576_v10 = vadd.f32 %v8145_v2, %v7581_v18  ;;  %6432 = vtanh.f32 %v7611_v50 }
 0x2ff   :  { %v7805_v63 = vadd.f32 %v3146_v61, %v2568_v57  ;;  %v3148_v49 = vpop.f32.mrb[59].mxu0  ;;  %v7815_v24 = vpop.eup %6408  ;;  %6434 = vtanh.f32 %v7613_v52 }
 0x300   :  { %v7810_v0 = vadd.f32 %v3148_v49, %v2570_v53  ;;  %v7818_v46 = vpop.eup %6410  ;;  %v8147_v53 = vld [vmem:[#allocation24_spill] sm:$0xff]  ;;  %6436 = vtanh.f32 %v7629_v25  ;;  %v8154_v25 = vld [vmem:[#allocation27_spill] sm:$0xff] }
 0x301   :  { %8142 = vst [vmem:[#allocation13_spill] sm:$0xff] %v7818_v46  ;;  %v7823_v57 = vpop.eup %6412  ;;  %v2578_v40 = vadd.f32 %v8147_v53, %v7576_v51  ;;  %v463_v46 = vsub.s32 3, %v8149_v47  ;;  %6438 = vtanh.f32 %v7635_v5 }
 0x302   :  { %8141 = vst [vmem:[#allocation12_spill] sm:$0xff] %v7810_v0  ;;  %8144 = vst [vmem:[#allocation14_spill] sm:$0xff] %v7823_v57  ;;  %v7828_v7 = vpop.eup %6414  ;;  %v8150_v57 = vld [vmem:[#allocation25_spill] sm:$0xff]  ;;  %6440 = vtanh.f32 %v7639_v14 }
 0x303   :  { %8146 = vst [vmem:[#allocation15_spill] sm:$0xff] %v7828_v7  ;;  %v7836_v0 = vpop.eup %6416  ;;  %v2580_v2 = vadd.f32 %v8150_v57, %v7581_v18  ;;  %6442 = vtanh.f32 %v7643_v9  ;;  %v7858_v57 = vrot.slane %v8154_v25, %v459_v41  ;;  %v7864_v5 = vrot.slane %v8154_v25, %v463_v46 }
 0x304   :  { %v3152_v54 = vpop.f32.mrb[60].mxu0  ;;  %v7844_v51 = vpop.eup %6418  ;;  %6444 = vtanh.f32 %v7661_v62 }
 0x305   :  { %v7833_v61 = vadd.f32 %v3152_v54, %v2574_v23  ;;  %v3154_v49 = vpop.f32.mrb[61].mxu0  ;;  %v7849_v54 = vpop.eup %6420  ;;  %6446 = vtanh.f32 %v7667_v22 }
 0x306   :  { %v7841_v50 = vadd.f32 %v3154_v49, %v2576_v10  ;;  %v3156_v7 = vpop.f32.mrb[62].mxu0  ;;  %v7854_v18 = vpop.eup %6422  ;;  %6448 = vtanh.f32 %v7671_v59 }
 0x307   :  { %8148 = vst [vmem:[#allocation16_spill] sm:$0xff] %v7833_v61  ;;  %v7847_v52 = vadd.f32 %v3156_v7, %v2578_v40  ;;  %v3158_v23 = vpop.f32.mrb[63].mxu0  ;;  %v7860_v10 = vpop.eup %6424  ;;  %6450 = vtanh.f32 %v7677_v39 }
 0x308   :  { %8151 = vst [vmem:[#allocation17_spill] sm:$0xff] %v7841_v50  ;;  %v7852_v53 = vadd.f32 %v3158_v23, %v2580_v2  ;;  %v7866_v7 = vpop.eup %6426  ;;  %6452 = vtanh.f32 %v7705_v60 }
 0x309   :  { %8152 = vst [vmem:[#allocation18_spill] sm:$0xff] %v7847_v52  ;;  %v7869_v14 = vpop.eup %6428  ;;  %6454 = vtanh.f32 %v7713_v11 }
 0x30a   :  { %8153 = vst [vmem:[#allocation19_spill] sm:$0xff] %v7852_v53  ;;  %v7872_v9 = vpop.eup %6430  ;;  %6456 = vtanh.f32 %v7719_v44 }
 0x30b   :  { %v7876_v62 = vpop.eup %6432 }
 0x30c   :  { %v3774_v40 = vpop.f32.mrb[32].mxu1  ;;  %v7880_v22 = vpop.eup %6434 }
 0x30d   :  { %v5528_v49 = vadd.f32 %v3774_v40, %v7858_v57  ;;  %v3776_v47 = vpop.f32.mrb[33].mxu1  ;;  %v7884_v25 = vpop.eup %6436 }
 0x30e   :  { %v5529_v46 = vadd.f32 %v3776_v47, %v7864_v5  ;;  %v3778_v41 = vpop.f32.mrb[34].mxu1  ;;  %v7888_v53 = vpop.eup %6438 }
 0x30f   :  { %v5207_v59 = vmul.f32 -1.442695, %v5528_v49  ;;  %v5530_v2 = vadd.f32 %v3778_v41, %v7858_v57  ;;  %v3780_v23 = vpop.f32.mrb[35].mxu1  ;;  %v7890_v47 = vpop.eup %6440 }
 0x310   :  { %v5208_v39 = vmul.f32 -1.442695, %v5529_v46  ;;  %v5531_v40 = vadd.f32 %v3780_v23, %v7864_v5  ;;  %v7892_v11 = vpop.eup %6442 }
 0x311   :  { %6458 = vpow2.f32 %v5207_v59  ;;  %v5209_v60 = vmul.f32 -1.442695, %v5530_v2  ;;  %8155 = vst [vmem:[#allocation20_spill] sm:$0xff] %v7892_v11  ;;  %v7894_v49 = vpop.eup %6444 }
 0x312   :  { %6460 = vpow2.f32 %v5208_v39  ;;  %v5210_v52 = vmul.f32 -1.442695, %v5531_v40  ;;  %8156 = vst [vmem:[#allocation21_spill] sm:$0xff] %v7894_v49  ;;  %v7896_v50 = vpop.eup %6446 }
 0x313   :  { %6462 = vpow2.f32 %v5209_v60  ;;  %8157 = vst [vmem:[#allocation22_spill] sm:$0xff] %v7896_v50  ;;  %v7900_v59 = vpop.eup %6448 }
 0x314   :  { %6464 = vpow2.f32 %v5210_v52  ;;  %v3784_v41 = vpop.f32.mrb[36].mxu1  ;;  %8158 = vst [vmem:[#allocation23_spill] sm:$0xff] %v7900_v59  ;;  %v7904_v39 = vpop.eup %6450 }
 0x315   :  { %6466 = vtanh.f32 %v7725_v28  ;;  %v5532_v44 = vadd.f32 %v3784_v41, %v7858_v57  ;;  %v3786_v46 = vpop.f32.mrb[37].mxu1  ;;  %8159 = vst [vmem:[#allocation24_spill] sm:$0xff] %v7904_v39  ;;  %v7908_v61 = vpop.eup %6452 }
 0x316   :  { %6468 = vtanh.f32 %v7753_v34  ;;  %v5533_v2 = vadd.f32 %v3786_v46, %v7864_v5  ;;  %v3788_v23 = vpop.f32.mrb[38].mxu1  ;;  %8160 = vst [vmem:[#allocation26_spill] sm:$0xff] %v7908_v61  ;;  %v7912_v59 = vpop.eup %6454 }
 0x317   :  { %6470 = vtanh.f32 %v7761_v15  ;;  %v5211_v52 = vmul.f32 -1.442695, %v5532_v44  ;;  %v5534_v40 = vadd.f32 %v3788_v23, %v7858_v57  ;;  %v3790_v60 = vpop.f32.mrb[39].mxu1  ;;  %8161 = vst [vmem:[#allocation25_spill] sm:$0xff] %v7912_v59  ;;  %v7914_v46 = vpop.eup %6456 }
 0x318   :  { %6472 = vtanh.f32 %v7767_v38  ;;  %v5212_v28 = vmul.f32 -1.442695, %v5533_v2  ;;  %v5535_v41 = vadd.f32 %v3790_v60, %v7864_v5  ;;  %8162 = vst [vmem:[#allocation27_spill] sm:$0xff] %v7914_v46 }
 0x319   :  { %6474 = vpow2.f32 %v5211_v52  ;;  %v5213_v34 = vmul.f32 -1.442695, %v5534_v40 }
 0x31a   :  { %6476 = vpow2.f32 %v5212_v28  ;;  %v5214_v39 = vmul.f32 -1.442695, %v5535_v41 }
 0x31b   :  { %v6459_v15 = vpop.eup %6458  ;;  %6478 = vpow2.f32 %v5213_v34 }
 0x31c   :  { %v6461_v44 = vpop.eup %6460  ;;  %v4189_v23 = vadd.f32 1.0, %v6459_v15  ;;  %6480 = vpow2.f32 %v5214_v39  ;;  %v3794_v50 = vpop.f32.mrb[40].mxu1 }
 0x31d   :  { %v6463_v61 = vpop.eup %6462  ;;  %6482 = vtanh.f32 %v7773_v31  ;;  %v4190_v38 = vadd.f32 1.0, %v6461_v44  ;;  %v5536_v2 = vadd.f32 %v3794_v50, %v7858_v57  ;;  %v3796_v60 = vpop.f32.mrb[41].mxu1 }
 0x31e   :  { %v6465_v59 = vpop.eup %6464  ;;  %6484 = vrcp.f32 %v4189_v23  ;;  %v4191_v52 = vadd.f32 1.0, %v6463_v61  ;;  %v5537_v40 = vadd.f32 %v3796_v60, %v7864_v5  ;;  %v3798_v28 = vpop.f32.mrb[42].mxu1 }
 0x31f   :  { %v7919_v41 = vpop.eup %6466  ;;  %6486 = vrcp.f32 %v4190_v38  ;;  %v4192_v34 = vadd.f32 1.0, %v6465_v59  ;;  %v5215_v15 = vmul.f32 -1.442695, %v5536_v2  ;;  %v5538_v39 = vadd.f32 %v3798_v28, %v7858_v57  ;;  %v3800_v46 = vpop.f32.mrb[43].mxu1 }
 0x320   :  { %8163 = vst [vmem:[#allocation28_spill] sm:$0xff] %v7919_v41  ;;  %v7922_v49 = vpop.eup %6468  ;;  %6488 = vrcp.f32 %v4191_v52  ;;  %v5216_v31 = vmul.f32 -1.442695, %v5537_v40  ;;  %v5539_v50 = vadd.f32 %v3800_v46, %v7864_v5 }
 0x321   :  { %8164 = vst [vmem:[#allocation29_spill] sm:$0xff] %v7922_v49  ;;  %v7925_v44 = vpop.eup %6470  ;;  %6490 = vrcp.f32 %v4192_v34  ;;  %v5217_v61 = vmul.f32 -1.442695, %v5538_v39 }
 0x322   :  { %8165 = vst [vmem:[#allocation30_spill] sm:$0xff] %v7925_v44  ;;  %v7927_v23 = vpop.eup %6472  ;;  %6492 = vpow2.f32 %v5215_v15  ;;  %v5218_v60 = vmul.f32 -1.442695, %v5539_v50 }
 0x323   :  { %8166 = vst [vmem:[#allocation31_spill] sm:$0xff] %v7927_v23  ;;  %v6475_v38 = vpop.eup %6474  ;;  %6494 = vpow2.f32 %v5216_v31 }
 0x324   :  { %v6477_v59 = vpop.eup %6476  ;;  %v4193_v2 = vadd.f32 1.0, %v6475_v38  ;;  %6496 = vpow2.f32 %v5217_v61  ;;  %v3804_v28 = vpop.f32.mrb[44].mxu1 }
 0x325   :  { %v6479_v41 = vpop.eup %6478  ;;  %v4194_v49 = vadd.f32 1.0, %v6477_v59  ;;  %6498 = vpow2.f32 %v5218_v60  ;;  %v5540_v52 = vadd.f32 %v3804_v28, %v7858_v57  ;;  %v3806_v46 = vpop.f32.mrb[45].mxu1 }
 0x326   :  { %v6481_v40 = vpop.eup %6480  ;;  %6500 = vrcp.f32 %v4193_v2  ;;  %v4195_v34 = vadd.f32 1.0, %v6479_v41  ;;  %v5541_v39 = vadd.f32 %v3806_v46, %v7864_v5  ;;  %v3808_v23 = vpop.f32.mrb[46].mxu1 }
 0x327   :  { %v7931_v15 = vpop.eup %6482  ;;  %6502 = vrcp.f32 %v4194_v49  ;;  %v4196_v31 = vadd.f32 1.0, %v6481_v40  ;;  %v5219_v50 = vmul.f32 -1.442695, %v5540_v52  ;;  %v5542_v61 = vadd.f32 %v3808_v23, %v7858_v57  ;;  %v3810_v38 = vpop.f32.mrb[47].mxu1 }
 0x328   :  { %8167 = vst [vmem:[#allocation32_spill] sm:$0xff] %v7931_v15  ;;  %v6485_v44 = vpop.eup %6484  ;;  %6504 = vrcp.f32 %v4195_v34  ;;  %v5220_v60 = vmul.f32 -1.442695, %v5541_v39  ;;  %v5543_v59 = vadd.f32 %v3810_v38, %v7864_v5 }
 0x329   :  { %v6487_v28 = vpop.eup %6486  ;;  %6506 = vrcp.f32 %v4196_v31  ;;  %v5221_v2 = vmul.f32 -1.442695, %v5542_v61  ;;  %v4381_v41 = vmul.f32 %v6485_v44, %v7673_v48 }
 0x32a   :  { %v6489_v46 = vpop.eup %6488  ;;  %6508 = vpow2.f32 %v5219_v50  ;;  %v5222_v11 = vmul.f32 -1.442695, %v5543_v59  ;;  %v4382_v49 = vmul.f32 %v6487_v28, %v7679_v32 }
 0x32b   :  { %v6491_v40 = vpop.eup %6490  ;;  %6510 = vpow2.f32 %v5220_v60  ;;  %v4383_v23 = vmul.f32 %v6489_v46, %v7683_v17 }
 0x32c   :  { %v6493_v52 = vpop.eup %6492  ;;  %6512 = vpow2.f32 %v5221_v2  ;;  %v3814_v34 = vpop.f32.mrb[48].mxu1  ;;  %v4384_v39 = vmul.f32 %v6491_v40, %v7687_v58 }
 0x32d   :  { %v6495_v38 = vpop.eup %6494  ;;  %v4197_v15 = vadd.f32 1.0, %v6493_v52  ;;  %6514 = vpow2.f32 %v5222_v11  ;;  %v5544_v31 = vadd.f32 %v3814_v34, %v7858_v57  ;;  %v3816_v48 = vpop.f32.mrb[49].mxu1  ;;  %v4445_v44 = vpack.c.bf16 %v4383_v23, %v4381_v41 }
 0x32e   :  { %v6497_v50 = vpop.eup %6496  ;;  %6516 = vtanh.f32 %v7793_v45  ;;  %v4198_v32 = vadd.f32 1.0, %v6495_v38  ;;  %v5545_v61 = vadd.f32 %v3816_v48, %v7864_v5  ;;  %v3818_v60 = vpop.f32.mrb[50].mxu1  ;;  %v4446_v17 = vpack.c.bf16 %v4384_v39, %v4382_v49 }
 0x32f   :  { %v6499_v59 = vpop.eup %6498  ;;  %6518 = vrcp.f32 %v4197_v15  ;;  %v4199_v28 = vadd.f32 1.0, %v6497_v50  ;;  %v5223_v2 = vmul.f32 -1.442695, %v5544_v31  ;;  %v5546_v58 = vadd.f32 %v3818_v60, %v7858_v57  ;;  %v3820_v46 = vpop.f32.mrb[51].mxu1 }
 0x330   :  { %v6501_v11 = vpop.eup %6500  ;;  %6520 = vrcp.f32 %v4198_v32  ;;  %v4200_v40 = vadd.f32 1.0, %v6499_v59  ;;  %v5224_v52 = vmul.f32 -1.442695, %v5545_v61  ;;  %v5547_v41 = vadd.f32 %v3820_v46, %v7864_v5  ;;  %4644 = vmatprep.mubr.bf16.mxu0 %v4446_v17 }
 0x331   :  { %v6503_v45 = vpop.eup %6502  ;;  %6522 = vrcp.f32 %v4199_v28  ;;  %v5225_v23 = vmul.f32 -1.442695, %v5546_v58  ;;  %4645 = vmatmul.mubr.bf16.vlgmr.msra.gmra.mrb[64].mxu0 %v4445_v44  ;;  %v4385_v49 = vmul.f32 %v6501_v11, %v7693_v20 }
 0x332   :  { %v6505_v34 = vpop.eup %6504  ;;  %6524 = vrcp.f32 %v4200_v40  ;;  %v5226_v15 = vmul.f32 -1.442695, %v5547_v41  ;;  %v4386_v39 = vmul.f32 %v6503_v45, %v7699_v16 }
 0x333   :  { %v6507_v38 = vpop.eup %6506  ;;  %6526 = vpow2.f32 %v5223_v2  ;;  %v4387_v31 = vmul.f32 %v6505_v34, %v7707_v26 }
 0x334   :  { %v6509_v48 = vpop.eup %6508  ;;  %6528 = vpow2.f32 %v5224_v52  ;;  %v3824_v50 = vpop.f32.mrb[52].mxu1  ;;  %v4388_v32 = vmul.f32 %v6507_v38, %v7715_v4 }
 0x335   :  { %v6511_v61 = vpop.eup %6510  ;;  %v4201_v60 = vadd.f32 1.0, %v6509_v48  ;;  %6530 = vpow2.f32 %v5225_v23  ;;  %v5548_v44 = vadd.f32 %v3824_v50, %v7858_v57  ;;  %v3826_v20 = vpop.f32.mrb[53].mxu1  ;;  %v4447_v17 = vpack.c.bf16 %v4387_v31, %v4385_v49 }
 0x336   :  { %v6513_v59 = vpop.eup %6512  ;;  %v4202_v28 = vadd.f32 1.0, %v6511_v61  ;;  %6532 = vpow2.f32 %v5226_v15  ;;  %v5549_v16 = vadd.f32 %v3826_v20, %v7864_v5  ;;  %v3828_v2 = vpop.f32.mrb[54].mxu1  ;;  %v4448_v58 = vpack.c.bf16 %v4388_v32, %v4386_v39 }
 0x337   :  { %v6515_v26 = vpop.eup %6514  ;;  %6534 = vrcp.f32 %v4201_v60  ;;  %v4203_v46 = vadd.f32 1.0, %v6513_v59  ;;  %v5227_v11 = vmul.f32 -1.442695, %v5548_v44  ;;  %v5550_v4 = vadd.f32 %v3828_v2, %v7858_v57  ;;  %v3830_v40 = vpop.f32.mrb[55].mxu1 }
 0x338   :  { %v7951_v52 = vpop.eup %6516  ;;  %6536 = vrcp.f32 %v4202_v28  ;;  %v4204_v41 = vadd.f32 1.0, %v6515_v26  ;;  %v5228_v45 = vmul.f32 -1.442695, %v5549_v16  ;;  %v5551_v23 = vadd.f32 %v3830_v40, %v7864_v5  ;;  %4652 = vmatprep.mubr.bf16.mxu0 %v4448_v58 }
 0x339   :  { %v6519_v49 = vpop.eup %6518  ;;  %6538 = vrcp.f32 %v4203_v46  ;;  %v5229_v34 = vmul.f32 -1.442695, %v5550_v4  ;;  %4653 = vmatmul.mubr.bf16.gmra.mrb[68].mxu0 %v4447_v17 }
 0x33a   :  { %v6521_v15 = vpop.eup %6520  ;;  %6540 = vrcp.f32 %v4204_v41  ;;  %v5230_v39 = vmul.f32 -1.442695, %v5551_v23  ;;  %v4389_v38 = vmul.f32 %v6519_v49, %v7721_v12 }
 0x33b   :  { %v6523_v31 = vpop.eup %6522  ;;  %6542 = vpow2.f32 %v5227_v11  ;;  %v4390_v48 = vmul.f32 %v6521_v15, %v7727_v37 }
 0x33c   :  { %v6525_v50 = vpop.eup %6524  ;;  %6544 = vpow2.f32 %v5228_v45  ;;  %v3834_v32 = vpop.f32.mrb[56].mxu1  ;;  %v4391_v61 = vmul.f32 %v6523_v31, %v7731_v30 }
 0x33d   :  { %v6527_v60 = vpop.eup %6526  ;;  %6546 = vpow2.f32 %v5229_v34  ;;  %v5552_v44 = vadd.f32 %v3834_v32, %v7858_v57  ;;  %v3836_v20 = vpop.f32.mrb[57].mxu1  ;;  %v4392_v17 = vmul.f32 %v6525_v50, %v7735_v19 }
 0x33e   :  { %v6529_v59 = vpop.eup %6528  ;;  %v4205_v28 = vadd.f32 1.0, %v6527_v60  ;;  %6548 = vpow2.f32 %v5230_v39  ;;  %v5553_v12 = vadd.f32 %v3836_v20, %v7864_v5  ;;  %v3838_v16 = vpop.f32.mrb[58].mxu1  ;;  %v4449_v2 = vpack.c.bf16 %v4391_v61, %v4389_v38 }
 0x33f   :  { %v6531_v37 = vpop.eup %6530  ;;  %6550 = vtanh.f32 %v7800_v55  ;;  %v4206_v58 = vadd.f32 1.0, %v6529_v59  ;;  %v5554_v30 = vadd.f32 %v3838_v16, %v7858_v57  ;;  %v3840_v26 = vpop.f32.mrb[59].mxu1  ;;  %v4450_v46 = vpack.c.bf16 %v4392_v17, %v4390_v48 }
 0x340   :  { %v6533_v11 = vpop.eup %6532  ;;  %6552 = vrcp.f32 %v4205_v28  ;;  %v4207_v4 = vadd.f32 1.0, %v6531_v37  ;;  %v5231_v40 = vmul.f32 -1.442695, %v5552_v44  ;;  %v5555_v19 = vadd.f32 %v3840_v26, %v7864_v5 }
 0x341   :  { %v6535_v41 = vpop.eup %6534  ;;  %6554 = vrcp.f32 %v4206_v58  ;;  %v4208_v45 = vadd.f32 1.0, %v6533_v11  ;;  %v5232_v23 = vmul.f32 -1.442695, %v5553_v12  ;;  %4660 = vmatprep.mubr.bf16.mxu0 %v4450_v46  ;;  %v5233_v34 = vmul.f32 -1.442695, %v5554_v30 }
 0x342   :  { %v6537_v49 = vpop.eup %6536  ;;  %6556 = vrcp.f32 %v4207_v4  ;;  %4661 = vmatmul.mubr.bf16.gmra.mrb[72].mxu0 %v4449_v2  ;;  %v4393_v55 = vmul.f32 %v6535_v41, %v7741_v3  ;;  %v5234_v39 = vmul.f32 -1.442695, %v5555_v19 }
 0x343   :  { %v6539_v15 = vpop.eup %6538  ;;  %6558 = vrcp.f32 %v4208_v45  ;;  %v4394_v38 = vmul.f32 %v6537_v49, %v7747_v29 }
 0x344   :  { %v6541_v31 = vpop.eup %6540  ;;  %6560 = vpow2.f32 %v5231_v40  ;;  %v3844_v48 = vpop.f32.mrb[60].mxu1  ;;  %v4395_v50 = vmul.f32 %v6539_v15, %v7755_v35 }
 0x345   :  { %v6543_v32 = vpop.eup %6542  ;;  %6562 = vpow2.f32 %v5232_v23  ;;  %v5556_v61 = vadd.f32 %v3844_v48, %v7858_v57  ;;  %v3846_v60 = vpop.f32.mrb[61].mxu1  ;;  %v4396_v44 = vmul.f32 %v6541_v31, %v7763_v33 }
 0x346   :  { %v6545_v20 = vpop.eup %6544  ;;  %v4209_v17 = vadd.f32 1.0, %v6543_v32  ;;  %6564 = vpow2.f32 %v5233_v34  ;;  %v5557_v3 = vadd.f32 %v3846_v60, %v7864_v5  ;;  %v3848_v59 = vpop.f32.mrb[62].mxu1  ;;  %v4451_v28 = vpack.c.bf16 %v4395_v50, %v4393_v55 }
 0x347   :  { %v6547_v29 = vpop.eup %6546  ;;  %v4210_v12 = vadd.f32 1.0, %v6545_v20  ;;  %6566 = vpow2.f32 %v5234_v39  ;;  %v5558_v16 = vadd.f32 %v3848_v59, %v7858_v57  ;;  %v3850_v35 = vpop.f32.mrb[63].mxu1  ;;  %v5235_v58 = vmul.f32 -1.442695, %v5556_v61 }
 0x348   :  { %v6549_v2 = vpop.eup %6548  ;;  %6568 = vrcp.f32 %v4209_v17  ;;  %v4211_v37 = vadd.f32 1.0, %v6547_v29  ;;  %v5559_v30 = vadd.f32 %v3850_v35, %v7864_v5  ;;  %v5236_v46 = vmul.f32 -1.442695, %v5557_v3 }
 0x349   :  { %v7971_v33 = vpop.eup %6550  ;;  %6570 = vrcp.f32 %v4210_v12  ;;  %v4212_v26 = vadd.f32 1.0, %v6549_v2  ;;  %v4452_v11 = vpack.c.bf16 %v4396_v44, %v4394_v38  ;;  %v5237_v40 = vmul.f32 -1.442695, %v5558_v16 }
 0x34a   :  { %v6553_v4 = vpop.eup %6552  ;;  %6572 = vrcp.f32 %v4211_v37  ;;  %v5238_v41 = vmul.f32 -1.442695, %v5559_v30 }
 0x34b   :  { %v6555_v19 = vpop.eup %6554  ;;  %6574 = vrcp.f32 %v4212_v26  ;;  %4668 = vmatprep.mubr.bf16.mxu0 %v4452_v11  ;;  %v4397_v45 = vmul.f32 %v6553_v4, %v7769_v21 }
 0x34c   :  { %v6557_v23 = vpop.eup %6556  ;;  %6576 = vpow2.f32 %v5235_v58  ;;  %4669 = vmatmul.mubr.bf16.gmra.mrb[76].mxu0 %v4451_v28  ;;  %v3854_v49 = vpop.f32.mrb[64].mxu1  ;;  %v4398_v34 = vmul.f32 %v6555_v19, %v7775_v56 }
 0x34d   :  { %v6559_v55 = vpop.eup %6558  ;;  %6578 = vpow2.f32 %v5236_v46  ;;  %v5560_v15 = vadd.f32 %v3854_v49, %v7858_v57  ;;  %v3856_v39 = vpop.f32.mrb[65].mxu1  ;;  %v4399_v38 = vmul.f32 %v6557_v23, %v7779_v42 }
 0x34e   :  { %v6561_v31 = vpop.eup %6560  ;;  %6580 = vpow2.f32 %v5237_v40  ;;  %v5561_v48 = vadd.f32 %v3856_v39, %v7864_v5  ;;  %v3858_v50 = vpop.f32.mrb[66].mxu1  ;;  %v4400_v21 = vmul.f32 %v6559_v55, %v7781_v36 }
 0x34f   :  { %v6563_v32 = vpop.eup %6562  ;;  %v4213_v61 = vadd.f32 1.0, %v6561_v31  ;;  %6582 = vpow2.f32 %v5238_v41  ;;  %v5562_v60 = vadd.f32 %v3858_v50, %v7858_v57  ;;  %v3860_v56 = vpop.f32.mrb[67].mxu1  ;;  %v5239_v28 = vmul.f32 -1.442695, %v5560_v15 }
 0x350   :  { %v6565_v44 = vpop.eup %6564  ;;  %6584 = vtanh.f32 %v7805_v63  ;;  %v4214_v20 = vadd.f32 1.0, %v6563_v32  ;;  %v5563_v17 = vadd.f32 %v3860_v56, %v7864_v5  ;;  %v4454_v42 = vpack.c.bf16 %v4400_v21, %v4398_v34 }
 0x351   :  { %v6567_v3 = vpop.eup %6566  ;;  %6586 = vrcp.f32 %v4213_v61  ;;  %v4215_v59 = vadd.f32 1.0, %v6565_v44  ;;  %v4453_v29 = vpack.c.bf16 %v4399_v38, %v4397_v45  ;;  %v5240_v16 = vmul.f32 -1.442695, %v5561_v48 }
 0x352   :  { %v6569_v12 = vpop.eup %6568  ;;  %6588 = vrcp.f32 %v4214_v20  ;;  %v4216_v36 = vadd.f32 1.0, %v6567_v3  ;;  %4676 = vmatprep.mubr.bf16.mxu0 %v4454_v42  ;;  %v5241_v2 = vmul.f32 -1.442695, %v5562_v60  ;;  %v5242_v58 = vmul.f32 -1.442695, %v5563_v17 }
 0x353   :  { %v6571_v35 = vpop.eup %6570  ;;  %6590 = vrcp.f32 %v4215_v59  ;;  %v4401_v37 = vmul.f32 %v6569_v12, %v7785_v13 }
 0x354   :  { %v6573_v63 = vpop.eup %6572  ;;  %6592 = vrcp.f32 %v4216_v36  ;;  %4677 = vmatmul.mubr.bf16.gmra.mrb[80].mxu0 %v4453_v29  ;;  %v3864_v30 = vpop.f32.mrb[68].mxu1  ;;  %v4402_v26 = vmul.f32 %v6571_v35, %v7789_v1 }
 0x355   :  { %v6575_v46 = vpop.eup %6574  ;;  %6594 = vpow2.f32 %v5239_v28  ;;  %v5564_v11 = vadd.f32 %v3864_v30, %v7858_v57  ;;  %v3866_v4 = vpop.f32.mrb[69].mxu1  ;;  %v4403_v40 = vmul.f32 %v6573_v63, %v7795_v6  ;;  %v8168_v63 = vld [vmem:[#allocation13_spill] sm:$0xff] }
 0x356   :  { %v6577_v19 = vpop.eup %6576  ;;  %6596 = vpow2.f32 %v5240_v16  ;;  %v5565_v41 = vadd.f32 %v3866_v4, %v7864_v5  ;;  %v3868_v45 = vpop.f32.mrb[70].mxu1  ;;  %v4404_v13 = vmul.f32 %v6575_v46, %v7802_v43 }
 0x357   :  { %v6579_v23 = vpop.eup %6578  ;;  %v4217_v49 = vadd.f32 1.0, %v6577_v19  ;;  %6598 = vpow2.f32 %v5241_v2  ;;  %v5566_v34 = vadd.f32 %v3868_v45, %v7858_v57  ;;  %v3870_v1 = vpop.f32.mrb[71].mxu1  ;;  %v5243_v31 = vmul.f32 -1.442695, %v5564_v11 }
 0x358   :  { %v6581_v55 = vpop.eup %6580  ;;  %v4218_v15 = vadd.f32 1.0, %v6579_v23  ;;  %6600 = vpow2.f32 %v5242_v58  ;;  %v5567_v39 = vadd.f32 %v3870_v1, %v7864_v5  ;;  %v4456_v48 = vpack.c.bf16 %v4404_v13, %v4402_v26 }
 0x359   :  { %v6583_v38 = vpop.eup %6582  ;;  %6602 = vrcp.f32 %v4217_v49  ;;  %v4219_v6 = vadd.f32 1.0, %v6581_v55  ;;  %v5244_v21 = vmul.f32 -1.442695, %v5565_v41  ;;  %v4455_v32 = vpack.c.bf16 %v4403_v40, %v4401_v37  ;;  %v8169_v55 = vld [vmem:[#allocation14_spill] sm:$0xff] }
 0x35a   :  { %v7990_v50 = vpop.eup %6584  ;;  %6604 = vrcp.f32 %v4218_v15  ;;  %v4220_v43 = vadd.f32 1.0, %v6583_v38  ;;  %v5245_v60 = vmul.f32 -1.442695, %v5566_v34  ;;  %4684 = vmatprep.mubr.bf16.mxu0 %v4456_v48  ;;  %v5246_v44 = vmul.f32 -1.442695, %v5567_v39 }
 0x35b   :  { %v6587_v61 = vpop.eup %6586  ;;  %6606 = vrcp.f32 %v4219_v6 }
 0x35c   :  { %v6589_v56 = vpop.eup %6588  ;;  %6608 = vrcp.f32 %v4220_v43  ;;  %4685 = vmatmul.mubr.bf16.gmra.mrb[84].mxu0 %v4455_v32  ;;  %v3874_v20 = vpop.f32.mrb[72].mxu1  ;;  %v4405_v17 = vmul.f32 %v6587_v61, %v7807_v27 }
 0x35d   :  { %v6591_v42 = vpop.eup %6590  ;;  %6610 = vpow2.f32 %v5243_v31  ;;  %v5568_v3 = vadd.f32 %v3874_v20, %v7858_v57  ;;  %v3876_v59 = vpop.f32.mrb[73].mxu1  ;;  %v4406_v28 = vmul.f32 %v6589_v56, %v7812_v8  ;;  %v8170_v31 = vld [vmem:[#allocation15_spill] sm:$0xff] }
 0x35e   :  { %v6593_v29 = vpop.eup %6592  ;;  %6612 = vpow2.f32 %v5244_v21  ;;  %v5569_v12 = vadd.f32 %v3876_v59, %v7864_v5  ;;  %v3878_v36 = vpop.f32.mrb[74].mxu1  ;;  %v4407_v16 = vmul.f32 %v6591_v42, %v7815_v24 }
 0x35f   :  { %v6595_v35 = vpop.eup %6594  ;;  %6614 = vpow2.f32 %v5245_v60  ;;  %v5247_v2 = vmul.f32 -1.442695, %v5568_v3  ;;  %v5570_v37 = vadd.f32 %v3878_v36, %v7858_v57  ;;  %v3880_v27 = vpop.f32.mrb[75].mxu1  ;;  %v4408_v58 = vmul.f32 %v6593_v29, %v8168_v63 }
 0x360   :  { %v6597_v30 = vpop.eup %6596  ;;  %v4221_v26 = vadd.f32 1.0, %v6595_v35  ;;  %6616 = vpow2.f32 %v5246_v44  ;;  %v5571_v8 = vadd.f32 %v3880_v27, %v7864_v5  ;;  %v5248_v19 = vmul.f32 -1.442695, %v5569_v12 }
 0x361   :  { %v6599_v46 = vpop.eup %6598  ;;  %v4222_v11 = vadd.f32 1.0, %v6597_v30  ;;  %6618 = vpow2.f32 %v5247_v2  ;;  %v4458_v4 = vpack.c.bf16 %v4408_v58, %v4406_v28  ;;  %v4457_v41 = vpack.c.bf16 %v4407_v16, %v4405_v17 }
 0x362   :  { %v6601_v40 = vpop.eup %6600  ;;  %6620 = vrcp.f32 %v4221_v26  ;;  %v4223_v24 = vadd.f32 1.0, %v6599_v46  ;;  %v5249_v23 = vmul.f32 -1.442695, %v5570_v37  ;;  %v5250_v34 = vmul.f32 -1.442695, %v5571_v8 }
 0x363   :  { %v6603_v45 = vpop.eup %6602  ;;  %6622 = vrcp.f32 %v4222_v11  ;;  %v4224_v13 = vadd.f32 1.0, %v6601_v40  ;;  %4692 = vmatprep.mubr.bf16.mxu0 %v4458_v4 }
 0x364   :  { %v6605_v49 = vpop.eup %6604  ;;  %6624 = vrcp.f32 %v4223_v24  ;;  %4693 = vmatmul.mubr.bf16.gmra.mrb[88].mxu0 %v4457_v41  ;;  %v3884_v1 = vpop.f32.mrb[76].mxu1  ;;  %v4409_v15 = vmul.f32 %v6603_v45, %v8169_v55 }
 0x365   :  { %v6607_v39 = vpop.eup %6606  ;;  %6626 = vrcp.f32 %v4224_v13  ;;  %v5572_v38 = vadd.f32 %v3884_v1, %v7858_v57  ;;  %v3886_v6 = vpop.f32.mrb[77].mxu1  ;;  %v4410_v48 = vmul.f32 %v6605_v49, %v8170_v31 }
 0x366   :  { %v6609_v43 = vpop.eup %6608  ;;  %6628 = vpow2.f32 %v5248_v19  ;;  %v3888_v21 = vpop.f32.mrb[78].mxu1  ;;  %v4411_v32 = vmul.f32 %v6607_v39, %v7836_v0  ;;  %v5573_v56 = vadd.f32 %v3886_v6, %v7864_v5 }
 0x367   :  { %v6611_v61 = vpop.eup %6610  ;;  %6630 = vpow2.f32 %v5249_v23  ;;  %v5251_v60 = vmul.f32 -1.442695, %v5572_v38  ;;  %v3890_v44 = vpop.f32.mrb[79].mxu1  ;;  %v4412_v20 = vmul.f32 %v6609_v43, %v7844_v51  ;;  %v5574_v3 = vadd.f32 %v3888_v21, %v7858_v57 }
 0x368   :  { %v6613_v17 = vpop.eup %6612  ;;  %v4225_v42 = vadd.f32 1.0, %v6611_v61  ;;  %6632 = vpow2.f32 %v5250_v34  ;;  %v5575_v29 = vadd.f32 %v3890_v44, %v7864_v5  ;;  %v4459_v16 = vpack.c.bf16 %v4411_v32, %v4409_v15 }
 0x369   :  { %v6615_v59 = vpop.eup %6614  ;;  %v4226_v28 = vadd.f32 1.0, %v6613_v17  ;;  %6634 = vpow2.f32 %v5251_v60  ;;  %v4460_v12 = vpack.c.bf16 %v4412_v20, %v4410_v48  ;;  %v5252_v37 = vmul.f32 -1.442695, %v5573_v56 }
 0x36a   :  { %v6617_v0 = vpop.eup %6616  ;;  %6636 = vrcp.f32 %v4225_v42  ;;  %v4227_v36 = vadd.f32 1.0, %v6615_v59  ;;  %v5253_v63 = vmul.f32 -1.442695, %v5574_v3  ;;  %v5254_v26 = vmul.f32 -1.442695, %v5575_v29 }
 0x36b   :  { %v6619_v35 = vpop.eup %6618  ;;  %6638 = vrcp.f32 %v4226_v28  ;;  %v4228_v2 = vadd.f32 1.0, %v6617_v0  ;;  %4700 = vmatprep.mubr.bf16.mxu0 %v4460_v12 }
 0x36c   :  { %v6621_v51 = vpop.eup %6620  ;;  %6640 = vrcp.f32 %v4227_v36  ;;  %v4229_v27 = vadd.f32 1.0, %v6619_v35  ;;  %4701 = vmatmul.mubr.bf16.gmra.mrb[92].mxu0 %v4459_v16  ;;  %v3894_v58 = vpop.f32.mrb[80].mxu1 }
 0x36d   :  { %v6623_v30 = vpop.eup %6622  ;;  %6642 = vrcp.f32 %v4228_v2  ;;  %v5576_v8 = vadd.f32 %v3894_v58, %v7858_v57  ;;  %v3896_v46 = vpop.f32.mrb[81].mxu1  ;;  %v4413_v11 = vmul.f32 %v6621_v51, %v7849_v54 }
 0x36e   :  { %v6625_v4 = vpop.eup %6624  ;;  %6644 = vrcp.f32 %v4229_v27  ;;  %v3898_v40 = vpop.f32.mrb[82].mxu1  ;;  %v4414_v24 = vmul.f32 %v6623_v30, %v7854_v18  ;;  %v5577_v45 = vadd.f32 %v3896_v46, %v7864_v5 }
 0x36f   :  { %v6627_v19 = vpop.eup %6626  ;;  %6646 = vpow2.f32 %v5252_v37  ;;  %v5255_v41 = vmul.f32 -1.442695, %v5576_v8  ;;  %v3900_v13 = vpop.f32.mrb[83].mxu1  ;;  %v4415_v23 = vmul.f32 %v6625_v4, %v7860_v10  ;;  %v5578_v34 = vadd.f32 %v3898_v40, %v7858_v57 }
 0x370   :  { %v6629_v49 = vpop.eup %6628  ;;  %6648 = vpow2.f32 %v5253_v63  ;;  %v4416_v1 = vmul.f32 %v6627_v19, %v7866_v7  ;;  %v5579_v15 = vadd.f32 %v3900_v13, %v7864_v5  ;;  %v5256_v10 = vmul.f32 -1.442695, %v5577_v45 }
 0x371   :  { %v6631_v54 = vpop.eup %6630  ;;  %v4230_v55 = vadd.f32 1.0, %v6629_v49  ;;  %6650 = vpow2.f32 %v5254_v26  ;;  %v4461_v18 = vpack.c.bf16 %v4415_v23, %v4413_v11  ;;  %v5257_v32 = vmul.f32 -1.442695, %v5578_v34 }
 0x372   :  { %v6633_v39 = vpop.eup %6632  ;;  %v4231_v38 = vadd.f32 1.0, %v6631_v54  ;;  %6652 = vpow2.f32 %v5255_v41  ;;  %v4462_v6 = vpack.c.bf16 %v4416_v1, %v4414_v24  ;;  %v5258_v60 = vmul.f32 -1.442695, %v5579_v15  ;;  %v8171_v15 = vld [vmem:[#allocation20_spill] sm:$0xff] }
 0x373   :  { %v6635_v31 = vpop.eup %6634  ;;  %6654 = vrcp.f32 %v4230_v55  ;;  %v4232_v48 = vadd.f32 1.0, %v6633_v39 }
 0x374   :  { %v6637_v43 = vpop.eup %6636  ;;  %6656 = vrcp.f32 %v4231_v38  ;;  %v4233_v21 = vadd.f32 1.0, %v6635_v31  ;;  %4708 = vmatprep.mubr.bf16.mxu0 %v4462_v6  ;;  %v3904_v7 = vpop.f32.mrb[84].mxu1  ;;  %v8172_v31 = vld [vmem:[#allocation21_spill] sm:$0xff] }
 0x375   :  { %v6639_v61 = vpop.eup %6638  ;;  %6658 = vrcp.f32 %v4232_v48  ;;  %4709 = vmatmul.mubr.bf16.gmra.mrb[96].mxu0 %v4461_v18  ;;  %v5580_v56 = vadd.f32 %v3904_v7, %v7858_v57  ;;  %v3906_v44 = vpop.f32.mrb[85].mxu1  ;;  %v4417_v20 = vmul.f32 %v6637_v43, %v7869_v14 }
 0x376   :  { %v6641_v17 = vpop.eup %6640  ;;  %6660 = vrcp.f32 %v4233_v21  ;;  %v5581_v42 = vadd.f32 %v3906_v44, %v7864_v5  ;;  %v3908_v3 = vpop.f32.mrb[86].mxu1  ;;  %v4418_v59 = vmul.f32 %v6639_v61, %v7872_v9 }
 0x377   :  { %v6643_v28 = vpop.eup %6642  ;;  %6662 = vpow2.f32 %v5256_v10  ;;  %v5259_v29 = vmul.f32 -1.442695, %v5580_v56  ;;  %v3910_v12 = vpop.f32.mrb[87].mxu1  ;;  %v4419_v0 = vmul.f32 %v6641_v17, %v7876_v62  ;;  %v5582_v35 = vadd.f32 %v3908_v3, %v7858_v57 }
 0x378   :  { %v6645_v36 = vpop.eup %6644  ;;  %6664 = vpow2.f32 %v5257_v32  ;;  %v5260_v16 = vmul.f32 -1.442695, %v5581_v42  ;;  %v4420_v14 = vmul.f32 %v6643_v28, %v7880_v22  ;;  %v5583_v37 = vadd.f32 %v3910_v12, %v7864_v5 }
 0x379   :  { %v6647_v2 = vpop.eup %6646  ;;  %6666 = vpow2.f32 %v5258_v60  ;;  %v4463_v51 = vpack.c.bf16 %v4419_v0, %v4417_v20  ;;  %v4421_v9 = vmul.f32 %v6645_v36, %v7884_v25  ;;  %v5261_v46 = vmul.f32 -1.442695, %v5582_v35  ;;  %v8173_v35 = vld [vmem:[#allocation22_spill] sm:$0xff] }
 0x37a   :  { %v6649_v27 = vpop.eup %6648  ;;  %v4234_v63 = vadd.f32 1.0, %v6647_v2  ;;  %6668 = vpow2.f32 %v5259_v29  ;;  %v4464_v58 = vpack.c.bf16 %v4420_v14, %v4418_v59  ;;  %v5262_v40 = vmul.f32 -1.442695, %v5583_v37 }
 0x37b   :  { %v6651_v30 = vpop.eup %6650  ;;  %v4235_v62 = vadd.f32 1.0, %v6649_v27  ;;  %6670 = vpow2.f32 %v5260_v16 }
 0x37c   :  { %v6653_v26 = vpop.eup %6652  ;;  %6672 = vrcp.f32 %v4234_v63  ;;  %v4236_v8 = vadd.f32 1.0, %v6651_v30  ;;  %4716 = vmatprep.mubr.bf16.mxu0 %v4464_v58  ;;  %v3914_v22 = vpop.f32.mrb[88].mxu1  ;;  %v8175_v58 = vld [vmem:[#allocation24_spill] sm:$0xff] }
 0x37d   :  { %v6655_v11 = vpop.eup %6654  ;;  %6674 = vrcp.f32 %v4235_v62  ;;  %v4237_v4 = vadd.f32 1.0, %v6653_v26  ;;  %4717 = vmatmul.mubr.bf16.gmra.mrb[100].mxu0 %v4463_v51  ;;  %v5584_v25 = vadd.f32 %v3914_v22, %v7858_v57  ;;  %v3916_v24 = vpop.f32.mrb[89].mxu1  ;;  %v8174_v51 = vld [vmem:[#allocation23_spill] sm:$0xff] }
 0x37e   :  { %v6657_v19 = vpop.eup %6656  ;;  %6676 = vrcp.f32 %v4236_v8  ;;  %v5585_v41 = vadd.f32 %v3916_v24, %v7864_v5  ;;  %v3918_v45 = vpop.f32.mrb[90].mxu1  ;;  %v4422_v13 = vmul.f32 %v6655_v11, %v7888_v53 }
 0x37f   :  { %v6659_v23 = vpop.eup %6658  ;;  %6678 = vrcp.f32 %v4237_v4  ;;  %v5263_v49 = vmul.f32 -1.442695, %v5584_v25  ;;  %v3920_v34 = vpop.f32.mrb[91].mxu1  ;;  %v4423_v1 = vmul.f32 %v6657_v19, %v7890_v47  ;;  %v5586_v38 = vadd.f32 %v3918_v45, %v7858_v57 }
 0x380   :  { %v6661_v54 = vpop.eup %6660  ;;  %6680 = vpow2.f32 %v5261_v46  ;;  %v5264_v55 = vmul.f32 -1.442695, %v5585_v41  ;;  %v4424_v18 = vmul.f32 %v6659_v23, %v8171_v15  ;;  %v5587_v43 = vadd.f32 %v3920_v34, %v7864_v5  ;;  %v8176_v46 = vld [vmem:[#allocation26_spill] sm:$0xff] }
 0x381   :  { %v6663_v39 = vpop.eup %6662  ;;  %6682 = vpow2.f32 %v5262_v40  ;;  %v4465_v6 = vpack.c.bf16 %v4423_v1, %v4421_v9  ;;  %v4425_v48 = vmul.f32 %v6661_v54, %v8172_v31  ;;  %v5265_v20 = vmul.f32 -1.442695, %v5586_v38  ;;  %v8178_v54 = vld [vmem:[#allocation27_spill] sm:$0xff]  ;;  %v8180_v31 = vld [vmem:[#allocation29_spill] sm:$0xff] }
 0x382   :  { %v6665_v10 = vpop.eup %6664  ;;  %v4238_v53 = vadd.f32 1.0, %v6663_v39  ;;  %6684 = vpow2.f32 %v5263_v49  ;;  %v4466_v21 = vpack.c.bf16 %v4424_v18, %v4422_v13  ;;  %v5266_v28 = vmul.f32 -1.442695, %v5587_v43  ;;  %v8177_v49 = vld [vmem:[#allocation25_spill] sm:$0xff]  ;;  %v8179_v18 = vld [vmem:[#allocation28_spill] sm:$0xff] }
 0x383   :  { %v6667_v32 = vpop.eup %6666  ;;  %v4239_v47 = vadd.f32 1.0, %v6665_v10  ;;  %6686 = vpow2.f32 %v5264_v55 }
 0x384   :  { %v6669_v7 = vpop.eup %6668  ;;  %6688 = vrcp.f32 %v4238_v53  ;;  %v4240_v61 = vadd.f32 1.0, %v6667_v32  ;;  %4724 = vmatprep.mubr.bf16.mxu0 %v4466_v21  ;;  %v3924_v60 = vpop.f32.mrb[92].mxu1  ;;  %v8181_v53 = vld [vmem:[#allocation12_spill] sm:$0xff]  ;;  %v8182_v21 = vld [vmem:[#allocation30_spill] sm:$0xff] }
 0x385   :  { %v6671_v56 = vpop.eup %6670  ;;  %6690 = vrcp.f32 %v4239_v47  ;;  %v4241_v44 = vadd.f32 1.0, %v6669_v7  ;;  %4725 = vmatmul.mubr.bf16.gmra.mrb[104].mxu0 %v4465_v6  ;;  %v5588_v17 = vadd.f32 %v3924_v60, %v7858_v57  ;;  %v3926_v42 = vpop.f32.mrb[93].mxu1  ;;  %v8183_v7 = vld [vmem:[#allocation16_spill] sm:$0xff] }
 0x386   :  { %v6673_v3 = vpop.eup %6672  ;;  %6692 = vrcp.f32 %v4240_v61  ;;  %v4242_v59 = vadd.f32 1.0, %v6671_v56  ;;  %v5589_v29 = vadd.f32 %v3926_v42, %v7864_v5  ;;  %v3928_v12 = vpop.f32.mrb[94].mxu1  ;;  %v8184_v56 = vld [vmem:[#allocation17_spill] sm:$0xff] }
 0x387   :  { %v6675_v0 = vpop.eup %6674  ;;  %6694 = vrcp.f32 %v4241_v44  ;;  %v5267_v36 = vmul.f32 -1.442695, %v5588_v17  ;;  %v3930_v16 = vpop.f32.mrb[95].mxu1  ;;  %v4426_v14 = vmul.f32 %v6673_v3, %v8173_v35  ;;  %v5590_v63 = vadd.f32 %v3928_v12, %v7858_v57 }
 0x388   :  { %v6677_v2 = vpop.eup %6676  ;;  %6696 = vrcp.f32 %v4242_v59  ;;  %v5268_v37 = vmul.f32 -1.442695, %v5589_v29  ;;  %v4427_v9 = vmul.f32 %v6675_v0, %v8174_v51  ;;  %v5591_v26 = vadd.f32 %v3930_v16, %v7864_v5  ;;  %v8186_v0 = vld [vmem:[#allocation32_spill] sm:$0xff] }
 0x389   :  { %v6679_v27 = vpop.eup %6678  ;;  %6698 = vpow2.f32 %v5265_v20  ;;  %v4428_v30 = vmul.f32 %v6677_v2, %v8175_v58  ;;  %v5269_v57 = vmul.f32 -1.442695, %v5590_v63 }
 0x38a   :  { %v6681_v62 = vpop.eup %6680  ;;  %6700 = vpow2.f32 %v5266_v28  ;;  %v4467_v8 = vpack.c.bf16 %v4427_v9, %v4425_v48  ;;  %v4429_v22 = vmul.f32 %v6679_v27, %v8176_v46  ;;  %v5270_v23 = vmul.f32 -1.442695, %v5591_v26  ;;  %v8185_v28 = vld [vmem:[#allocation31_spill] sm:$0xff]  ;;  %v8187_v27 = vld [vmem:[#allocation18_spill] sm:$0xff] }
 0x38b   :  { %v6683_v11 = vpop.eup %6682  ;;  %v4243_v4 = vadd.f32 1.0, %v6681_v62  ;;  %6702 = vpow2.f32 %v5267_v36  ;;  %v4468_v40 = vpack.c.bf16 %v4428_v30, %v4426_v14  ;;  %v8188_v30 = vld [vmem:[#allocation19_spill] sm:$0xff] }
 0x38c   :  { %v6685_v25 = vpop.eup %6684  ;;  %v4244_v24 = vadd.f32 1.0, %v6683_v11  ;;  %6704 = vpow2.f32 %v5268_v37 }
 0x38d   :  { %v6687_v19 = vpop.eup %6686  ;;  %6706 = vrcp.f32 %v4243_v4  ;;  %v4245_v41 = vadd.f32 1.0, %v6685_v25  ;;  %4732 = vmatprep.mubr.bf16.mxu0 %v4468_v40 }
 0x38e   :  { %v6689_v45 = vpop.eup %6688  ;;  %6708 = vrcp.f32 %v4244_v24  ;;  %v4246_v13 = vadd.f32 1.0, %v6687_v19  ;;  %4733 = vmatmul.mubr.bf16.gmra.mrb[108].mxu0 %v4467_v8 }
 0x38f   :  { %v6691_v5 = vpop.eup %6690  ;;  %6710 = vrcp.f32 %v4245_v41  ;;  %v4430_v34 = vmul.f32 %v6689_v45, %v8177_v49 }
 0x390   :  { %v6693_v1 = vpop.eup %6692  ;;  %6712 = vrcp.f32 %v4246_v13  ;;  %v4431_v55 = vmul.f32 %v6691_v5, %v8178_v54 }
 0x391   :  { %v6695_v15 = vpop.eup %6694  ;;  %6714 = vpow2.f32 %v5269_v57  ;;  %v4432_v39 = vmul.f32 %v6693_v1, %v8179_v18  ;;  %v8059_v1 = vld [vmem:[%s8109_s4] ss:$0 sm:$0xff]  ;;  %s6843_s4 = smov [#allocation8]  }
 0x392   :  { %v6697_v38 = vpop.eup %6696  ;;  %6716 = vpow2.f32 %v5270_v23  ;;  %v4469_v6 = vpack.c.bf16 %v4431_v55, %v4429_v22  ;;  %v4433_v48 = vmul.f32 %v6695_v15, %v8180_v31  ;;  %s4810_s10 = sshll.u32 %s6843_s4, 4  ;;  %s4811_s10 = int_to_ptr.vmem [resolvable:$true] %s4810_s10 }
 0x393   :  { %v6699_v10 = vpop.eup %6698  ;;  %6718 = vtanh.f32 %v8181_v53  ;;  %v4470_v43 = vpack.c.bf16 %v4432_v39, %v4430_v34  ;;  %v4434_v32 = vmul.f32 %v6697_v38, %v8182_v21  ;;  %s6806_s11 = scalar_lea.vmem %s4811_s10, 4096  ;;  %p6811_p11 = scmp.lt.s32.totalorder %s4811_s10, %s4811_s10 }
 0x394   :  { %v6701_v47 = vpop.eup %6700  ;;  %6720 = vtanh.f32 %v8183_v7  ;;  %v4247_v61 = vadd.f32 1.0, %v6699_v10  ;;  %p6807_p10 = scmp.ne.s32.totalorder %s4811_s10, %s6806_s11  ;;  %p6812_p12 = scmp.lt.s32.totalorder %s6806_s11, %s6806_s11 }
 0x395   :  { %v6703_v60 = vpop.eup %6702  ;;  %6722 = vtanh.f32 %v8184_v56  ;;  %v4248_v44 = vadd.f32 1.0, %v6701_v47  ;;  %4740 = vmatprep.mubr.bf16.mxu0 %v4470_v43 }
 0x396   :  { %v6705_v20 = vpop.eup %6704  ;;  %6724 = vrcp.f32 %v4247_v61  ;;  %v4249_v17 = vadd.f32 1.0, %v6703_v60  ;;  %4741 = vmatmul.mubr.bf16.gmra.mrb[112].mxu0 %v4469_v6  ;;  %p6813_p13 = por %p6812_p12, %p6811_p11 }
 0x397   :  { %v6707_v42 = vpop.eup %6706  ;;  %6726 = vrcp.f32 %v4248_v44  ;;  %v4250_v3 = vadd.f32 1.0, %v6705_v20 }
 0x398   :  { %v6709_v59 = vpop.eup %6708  ;;  %6728 = vrcp.f32 %v4249_v17  ;;  %v4435_v29 = vmul.f32 %v6707_v42, %v8185_v28  ;;  %p6814_p0 = pnand %p6813_p13, %p6807_p10 }
 0x399   :  { %v6711_v12 = vpop.eup %6710  ;;  %6730 = vrcp.f32 %v4250_v3  ;;  %v4436_v36 = vmul.f32 %v6709_v59, %v8186_v0 }
 0x39a   :  { %v6713_v16 = vpop.eup %6712  ;;  %v4471_v35 = vpack.c.bf16 %v4435_v29, %v4433_v48  ;;  %v4437_v14 = vmul.f32 %v6711_v12, %v7951_v52  ;;  %6732 = vtanh.f32 %v8187_v27 }
 0x39b   :  { %v6715_v2 = vpop.eup %6714  ;;  %v4472_v37 = vpack.c.bf16 %v4436_v36, %v4434_v32  ;;  %v4438_v51 = vmul.f32 %v6713_v16, %v7971_v33  ;;  %6734 = vtanh.f32 %v8188_v30 }
 0x39c   :  { %v6717_v9 = vpop.eup %6716  ;;  %v4251_v63 = vadd.f32 1.0, %v6715_v2 }
 0x39d   :  { %v6719_v58 = vpop.eup %6718  ;;  %v4252_v62 = vadd.f32 1.0, %v6717_v9  ;;  %4748 = vmatprep.mubr.bf16.mxu0 %v4472_v37 }
 0x39e   :  { %v6721_v26 = vpop.eup %6720  ;;  %6736 = vrcp.f32 %v4251_v63  ;;  %4749 = vmatmul.mubr.bf16.gmra.mrb[116].mxu0 %v4471_v35 }
 0x39f   :  { %v6723_v8 = vpop.eup %6722  ;;  %6738 = vrcp.f32 %v4252_v62 }
 0x3a0   :  { %v6725_v46 = vpop.eup %6724 }
 0x3a1   :  { %v6727_v52 = vpop.eup %6726  ;;  %v4439_v22 = vmul.f32 %v6725_v46, %v7990_v50 }
 0x3a2   :  { %v6729_v11 = vpop.eup %6728  ;;  %v4440_v33 = vmul.f32 %v6727_v52, %v6719_v58 }
 0x3a3   :  { %v6731_v4 = vpop.eup %6730  ;;  %v4473_v40 = vpack.c.bf16 %v4439_v22, %v4437_v14  ;;  %v4441_v25 = vmul.f32 %v6729_v11, %v6721_v26 }
 0x3a4   :  { %v4474_v24 = vpack.c.bf16 %v4440_v33, %v4438_v51  ;;  %v4442_v19 = vmul.f32 %v6731_v4, %v6723_v8  ;;  %v6733_v41 = vpop.eup %6732 }
 0x3a5   :  { %v6735_v57 = vpop.eup %6734 }
 0x3a6   :  { %4756 = vmatprep.mubr.bf16.mxu0 %v4474_v24 }
 0x3a7   :  { %4757 = vmatmul.mubr.bf16.gmra.mrb[120].mxu0 %v4473_v40 }
 0x3a8   :  { %v6737_v45 = vpop.eup %6736 }
 0x3a9   :  { %v6739_v13 = vpop.eup %6738  ;;  %v4443_v23 = vmul.f32 %v6737_v45, %v6733_v41 }
 0x3aa   :  { %v4444_v5 = vmul.f32 %v6739_v13, %v6735_v57 }
 0x3ab   :  { %v4475_v49 = vpack.c.bf16 %v4443_v23, %v4441_v25 }
 0x3ac   :  { %v4476_v34 = vpack.c.bf16 %v4444_v5, %v4442_v19 }
 0x3ae   :  { %4764 = vmatprep.mubr.bf16.mxu0 %v4476_v34 }
 0x3af   :  { %4765 = vmatmul.mubr.bf16.gmra.mrb[124].mxu0 %v4475_v49 }
 0x404   :  { %v5304_v50 = vpop.f32.mrb[64].mxu0 }
 0x405   :  { %v5305_v54 = vpop.f32.mrb[65].mxu0 }
 0x406   :  { %v5306_v55 = vadd.f32 %v5305_v54, %v5304_v50  ;;  %v5307_v15 = vpop.f32.mrb[66].mxu0 }
 0x407   :  { %v5308_v18 = vpop.f32.mrb[67].mxu0 }
 0x408   :  { %v4647_v39 = vadd.f32 %v5306_v55, %v8059_v1  ;;  %v5309_v38 = vadd.f32 %v5308_v18, %v5307_v15 }
 0x40a   :  { %4773 = vst [vmem:[#allocation8] sm:$0xff] %v4647_v39  ;;  %v4650_v6 = vadd.f32 %v5309_v38, %v8059_v1 }
 0x40c   :  { %4774 = vst [vmem:[#allocation8 + $0x8] sm:$0xff] %v4650_v6  ;;  %v5310_v31 = vpop.f32.mrb[68].mxu0 }
 0x40d   :  { %v5311_v48 = vpop.f32.mrb[69].mxu0 }
 0x40e   :  { %v5312_v10 = vadd.f32 %v5311_v48, %v5310_v31  ;;  %v5313_v53 = vpop.f32.mrb[70].mxu0 }
 0x40f   :  { %v5314_v43 = vpop.f32.mrb[71].mxu0 }
 0x410   :  { %v4655_v21 = vadd.f32 %v5312_v10, %v8059_v1  ;;  %v5315_v32 = vadd.f32 %v5314_v43, %v5313_v53 }
 0x412   :  { %4775 = vst [vmem:[#allocation8 + $0x10] sm:$0xff] %v4655_v21  ;;  %v4658_v47 = vadd.f32 %v5315_v32, %v8059_v1 }
 0x414   :  { %4776 = vst [vmem:[#allocation8 + $0x18] sm:$0xff] %v4658_v47 }
 0x415   :  { %v5316_v7 = vpop.f32.mrb[72].mxu0 }
 0x416   :  { %v5317_v61 = vpop.f32.mrb[73].mxu0 }
 0x417   :  { %v5318_v60 = vadd.f32 %v5317_v61, %v5316_v7  ;;  %v5319_v56 = vpop.f32.mrb[74].mxu0 }
 0x418   :  { %v5320_v44 = vpop.f32.mrb[75].mxu0 }
 0x419   :  { %v4663_v20 = vadd.f32 %v5318_v60, %v8059_v1  ;;  %v5321_v17 = vadd.f32 %v5320_v44, %v5319_v56 }
 0x41b   :  { %4777 = vst [vmem:[#allocation8 + $0x20] sm:$0xff] %v4663_v20  ;;  %v4666_v42 = vadd.f32 %v5321_v17, %v8059_v1 }
 0x41d   :  { %4778 = vst [vmem:[#allocation8 + $0x28] sm:$0xff] %v4666_v42 }
 0x41f   :  { %v5322_v3 = vpop.f32.mrb[76].mxu0 }
 0x420   :  { %v5323_v59 = vpop.f32.mrb[77].mxu0 }
 0x421   :  { %v5324_v28 = vadd.f32 %v5323_v59, %v5322_v3  ;;  %v5325_v29 = vpop.f32.mrb[78].mxu0 }
 0x422   :  { %v5326_v12 = vpop.f32.mrb[79].mxu0 }
 0x423   :  { %v4671_v0 = vadd.f32 %v5324_v28, %v8059_v1  ;;  %v5327_v36 = vadd.f32 %v5326_v12, %v5325_v29 }
 0x425   :  { %4779 = vst [vmem:[#allocation8 + $0x30] sm:$0xff] %v4671_v0  ;;  %v4674_v16 = vadd.f32 %v5327_v36, %v8059_v1 }
 0x427   :  { %4780 = vst [vmem:[#allocation8 + $0x38] sm:$0xff] %v4674_v16  ;;  %v5328_v35 = vpop.f32.mrb[80].mxu0 }
 0x428   :  { %v5329_v14 = vpop.f32.mrb[81].mxu0 }
 0x429   :  { %v5330_v2 = vadd.f32 %v5329_v14, %v5328_v35  ;;  %v5331_v37 = vpop.f32.mrb[82].mxu0 }
 0x42a   :  { %v5332_v51 = vpop.f32.mrb[83].mxu0 }
 0x42b   :  { %v4679_v9 = vadd.f32 %v5330_v2, %v8059_v1  ;;  %v5333_v27 = vadd.f32 %v5332_v51, %v5331_v37 }
 0x42d   :  { %4781 = vst [vmem:[#allocation8 + $0x40] sm:$0xff] %v4679_v9  ;;  %v4682_v63 = vadd.f32 %v5333_v27, %v8059_v1 }
 0x42f   :  { %4782 = vst [vmem:[#allocation8 + $0x48] sm:$0xff] %v4682_v63  ;;  %v5334_v58 = vpop.f32.mrb[84].mxu0 }
 0x430   :  { %v5335_v30 = vpop.f32.mrb[85].mxu0 }
 0x431   :  { %v5336_v62 = vadd.f32 %v5335_v30, %v5334_v58  ;;  %v5337_v26 = vpop.f32.mrb[86].mxu0 }
 0x432   :  { %v5338_v8 = vpop.f32.mrb[87].mxu0 }
 0x433   :  { %v4687_v46 = vadd.f32 %v5336_v62, %v8059_v1  ;;  %v5339_v52 = vadd.f32 %v5338_v8, %v5337_v26 }
 0x435   :  { %4783 = vst [vmem:[#allocation8 + $0x50] sm:$0xff] %v4687_v46  ;;  %v4690_v22 = vadd.f32 %v5339_v52, %v8059_v1 }
 0x437   :  { %4784 = vst [vmem:[#allocation8 + $0x58] sm:$0xff] %v4690_v22  ;;  %v5340_v11 = vpop.f32.mrb[88].mxu0 }
 0x438   :  { %v5341_v33 = vpop.f32.mrb[89].mxu0 }
 0x439   :  { %v5342_v4 = vadd.f32 %v5341_v33, %v5340_v11  ;;  %v5343_v40 = vpop.f32.mrb[90].mxu0 }
 0x43a   :  { %v5344_v25 = vpop.f32.mrb[91].mxu0 }
 0x43b   :  { %v4695_v24 = vadd.f32 %v5342_v4, %v8059_v1  ;;  %v5345_v19 = vadd.f32 %v5344_v25, %v5343_v40 }
 0x43d   :  { %4785 = vst [vmem:[#allocation8 + $0x60] sm:$0xff] %v4695_v24  ;;  %v4698_v41 = vadd.f32 %v5345_v19, %v8059_v1 }
 0x43f   :  { %4786 = vst [vmem:[#allocation8 + $0x68] sm:$0xff] %v4698_v41  ;;  %v5346_v57 = vpop.f32.mrb[92].mxu0 }
 0x440   :  { %v5347_v45 = vpop.f32.mrb[93].mxu0 }
 0x441   :  { %v5348_v13 = vadd.f32 %v5347_v45, %v5346_v57  ;;  %v5349_v23 = vpop.f32.mrb[94].mxu0 }
 0x442   :  { %v5350_v5 = vpop.f32.mrb[95].mxu0 }
 0x443   :  { %v4703_v49 = vadd.f32 %v5348_v13, %v8059_v1  ;;  %v5351_v34 = vadd.f32 %v5350_v5, %v5349_v23 }
 0x445   :  { %4787 = vst [vmem:[#allocation8 + $0x70] sm:$0xff] %v4703_v49  ;;  %v4706_v50 = vadd.f32 %v5351_v34, %v8059_v1 }
 0x447   :  { %4788 = vst [vmem:[#allocation8 + $0x78] sm:$0xff] %v4706_v50 }
 0x448   :  { %v5352_v54 = vpop.f32.mrb[96].mxu0 }
 0x449   :  { %v5353_v55 = vpop.f32.mrb[97].mxu0 }
 0x44a   :  { %v5354_v15 = vadd.f32 %v5353_v55, %v5352_v54  ;;  %v5355_v18 = vpop.f32.mrb[98].mxu0 }
 0x44b   :  { %v5356_v39 = vpop.f32.mrb[99].mxu0 }
 0x44c   :  { %v4711_v38 = vadd.f32 %v5354_v15, %v8059_v1  ;;  %v5357_v6 = vadd.f32 %v5356_v39, %v5355_v18 }
 0x44e   :  { %4789 = vst [vmem:[#allocation8 + $0x80] sm:$0xff] %v4711_v38  ;;  %v4714_v31 = vadd.f32 %v5357_v6, %v8059_v1 }
 0x450   :  { %4790 = vst [vmem:[#allocation8 + $0x88] sm:$0xff] %v4714_v31  ;;  %v5358_v48 = vpop.f32.mrb[100].mxu0 }
 0x451   :  { %v5359_v10 = vpop.f32.mrb[101].mxu0 }
 0x452   :  { %v5360_v53 = vadd.f32 %v5359_v10, %v5358_v48  ;;  %v5361_v43 = vpop.f32.mrb[102].mxu0 }
 0x453   :  { %v5362_v21 = vpop.f32.mrb[103].mxu0 }
 0x454   :  { %v4719_v32 = vadd.f32 %v5360_v53, %v8059_v1  ;;  %v5363_v47 = vadd.f32 %v5362_v21, %v5361_v43 }
 0x456   :  { %4791 = vst [vmem:[#allocation8 + $0x90] sm:$0xff] %v4719_v32  ;;  %v4722_v7 = vadd.f32 %v5363_v47, %v8059_v1 }
 0x458   :  { %4792 = vst [vmem:[#allocation8 + $0x98] sm:$0xff] %v4722_v7  ;;  %v5364_v61 = vpop.f32.mrb[104].mxu0 }
 0x459   :  { %v5365_v60 = vpop.f32.mrb[105].mxu0 }
 0x45a   :  { %v5366_v56 = vadd.f32 %v5365_v60, %v5364_v61  ;;  %v5367_v44 = vpop.f32.mrb[106].mxu0 }
 0x45b   :  { %v5368_v20 = vpop.f32.mrb[107].mxu0 }
 0x45c   :  { %v4727_v17 = vadd.f32 %v5366_v56, %v8059_v1  ;;  %v5369_v42 = vadd.f32 %v5368_v20, %v5367_v44 }
 0x45e   :  { %4793 = vst [vmem:[#allocation8 + $0xa0] sm:$0xff] %v4727_v17  ;;  %v4730_v3 = vadd.f32 %v5369_v42, %v8059_v1 }
 0x460   :  { %4794 = vst [vmem:[#allocation8 + $0xa8] sm:$0xff] %v4730_v3 }
 0x461   :  { %v5370_v59 = vpop.f32.mrb[108].mxu0 }
 0x462   :  { %v5371_v28 = vpop.f32.mrb[109].mxu0 }
 0x463   :  { %v5372_v29 = vadd.f32 %v5371_v28, %v5370_v59  ;;  %v5373_v12 = vpop.f32.mrb[110].mxu0 }
 0x464   :  { %v5374_v0 = vpop.f32.mrb[111].mxu0 }
 0x465   :  { %v4735_v36 = vadd.f32 %v5372_v29, %v8059_v1  ;;  %v5375_v16 = vadd.f32 %v5374_v0, %v5373_v12 }
 0x467   :  { %4795 = vst [vmem:[#allocation8 + $0xb0] sm:$0xff] %v4735_v36  ;;  %v4738_v35 = vadd.f32 %v5375_v16, %v8059_v1 }
 0x469   :  { %4796 = vst [vmem:[#allocation8 + $0xb8] sm:$0xff] %v4738_v35  ;;  %v5376_v14 = vpop.f32.mrb[112].mxu0 }
 0x46a   :  { %v5377_v2 = vpop.f32.mrb[113].mxu0 }
 0x46b   :  { %v5378_v37 = vadd.f32 %v5377_v2, %v5376_v14  ;;  %v5379_v51 = vpop.f32.mrb[114].mxu0 }
 0x46c   :  { %v5380_v9 = vpop.f32.mrb[115].mxu0 }
 0x46d   :  { %v4743_v27 = vadd.f32 %v5378_v37, %v8059_v1  ;;  %v5381_v63 = vadd.f32 %v5380_v9, %v5379_v51 }
 0x46f   :  { %4797 = vst [vmem:[#allocation8 + $0xc0] sm:$0xff] %v4743_v27  ;;  %v4746_v58 = vadd.f32 %v5381_v63, %v8059_v1 }
 0x471   :  { %4798 = vst [vmem:[#allocation8 + $0xc8] sm:$0xff] %v4746_v58  ;;  %v5382_v30 = vpop.f32.mrb[116].mxu0 }
 0x472   :  { %v5383_v62 = vpop.f32.mrb[117].mxu0 }
 0x473   :  { %v5384_v26 = vadd.f32 %v5383_v62, %v5382_v30  ;;  %v5385_v8 = vpop.f32.mrb[118].mxu0 }
 0x474   :  { %v5386_v46 = vpop.f32.mrb[119].mxu0 }
 0x475   :  { %v4751_v52 = vadd.f32 %v5384_v26, %v8059_v1  ;;  %v5387_v22 = vadd.f32 %v5386_v46, %v5385_v8 }
 0x477   :  { %4799 = vst [vmem:[#allocation8 + $0xd0] sm:$0xff] %v4751_v52  ;;  %v4754_v11 = vadd.f32 %v5387_v22, %v8059_v1 }
 0x479   :  { %4800 = vst [vmem:[#allocation8 + $0xd8] sm:$0xff] %v4754_v11 }
 0x47a   :  { %v5388_v33 = vpop.f32.mrb[120].mxu0 }
 0x47b   :  { %v5389_v4 = vpop.f32.mrb[121].mxu0 }
 0x47c   :  { %v5390_v40 = vadd.f32 %v5389_v4, %v5388_v33  ;;  %v5391_v25 = vpop.f32.mrb[122].mxu0 }
 0x47d   :  { %v5392_v24 = vpop.f32.mrb[123].mxu0 }
 0x47e   :  { %v4759_v19 = vadd.f32 %v5390_v40, %v8059_v1  ;;  %v5393_v41 = vadd.f32 %v5392_v24, %v5391_v25 }
 0x480   :  { %4801 = vst [vmem:[#allocation8 + $0xe0] sm:$0xff] %v4759_v19  ;;  %v4762_v57 = vadd.f32 %v5393_v41, %v8059_v1 }
 0x482   :  { %4802 = vst [vmem:[#allocation8 + $0xe8] sm:$0xff] %v4762_v57  ;;  %v5394_v45 = vpop.f32.mrb[124].mxu0 }
 0x483   :  { %v5395_v13 = vpop.f32.mrb[125].mxu0 }
 0x484   :  { %v5396_v23 = vadd.f32 %v5395_v13, %v5394_v45  ;;  %v5397_v5 = vpop.f32.mrb[126].mxu0 }
 0x485   :  { %v5398_v49 = vpop.f32.mrb[127].mxu0 }
 0x486   :  { %v4767_v34 = vadd.f32 %v5396_v23, %v8059_v1  ;;  %v5399_v50 = vadd.f32 %v5398_v49, %v5397_v5 }
 0x488   :  { %4803 = vst [vmem:[#allocation8 + $0xf0] sm:$0xff] %v4767_v34  ;;  %v4770_v54 = vadd.f32 %v5399_v50, %v8059_v1 }
 0x48a   :  { %4804 = vst [vmem:[#allocation8 + $0xf8] sm:$0xff] %v4770_v54 }
 0x48b   :  { %6817 = shalt.err (!%p6814_p0)
}
 0x48c   :  { %s6818_s14 = scalar_lea.hbm %s8110_s5, 4096 }
 0x48d   :  { %p6819_p1 = scmp.ne.s32.totalorder %s8110_s5, %s6818_s14  ;;  %p6822_p2 = scmp.lt.u32.totalorder %s6818_s14, %s8110_s5 }
 0x48f   :  { %p6824_p3 = pnand %p6822_p2, %p6819_p1 }
 0x491   :  { %6827 = shalt.err (!%p6824_p3)
}
 0x492   :  { %s6844_s18 = smov 128   ;;  %s6845_s19 = smov 8  }
 0x493   :  { %4816 = dma.vmem_to_hbm [thread:$0]  %s4811_s10, 4096, %s8110_s5, [#allocation4], %s6844_s18, %s6844_s18, %s6845_s19  }
 0x494   :  { %6832 = dma.done.wait [#allocation4], 4096  }
 0x495   :  { %6833 = vsyncadd [#allocation4], 4294963200 }
 0x496   :  { %4820 = vsyncpa [#allocation3], 1 }
 0x497   :  { %4821 = vsyncpa [#allocation6], 1 }
 0x498   :  { %4822 = vsyncpa [#allocation4], 1 }

</bundles_post_ra>
